<compile_context>
chip_gen: v5e
topology: v5e:2x2
jax: 0.10.0
libtpu: 0.0.40
codegen_flags: <defaults>
</compile_context>

<pallas_src>
import functools

import jax
import jax.numpy as jnp
import numpy as np
from jax.experimental import pallas as pl
from jax.experimental.pallas import tpu as pltpu

HIDDEN = 512


def dueling_dqn_kernel(
    x_ref,
    w1, b1, w2, b2, w3, b3, w4, b4,
    wh1, bh1,            # fused [adv1 | val1] layer-1 head weights: (512, 1024)
    wa2, ba2,            # flat advantage head: (512, A*atoms)
    wv2, bv2,            # value head: (512, atoms)
    out_ref,             # (B, A*atoms) per-action softmax distributions
):
    batch = x_ref.shape[0]
    hidden = wh1.shape[0]
    atoms = wv2.shape[1]
    num_actions = out_ref.shape[1] // atoms

    def dense(h, w_ref, b_ref):
        # bf16 x bf16 MXU matmul, f32 accumulation; bias add in f32.
        return (
            jnp.dot(h.astype(jnp.bfloat16), w_ref[...],
                    preferred_element_type=jnp.float32)
            + b_ref[...]
        )

    def relu(z):
        return jnp.maximum(z, 0.0)

    # 4-layer trunk.
    h = x_ref[...]
    h = relu(dense(h, w1, b1))
    h = relu(dense(h, w2, b2))
    h = relu(dense(h, w3, b3))
    h = relu(dense(h, w4, b4))

    # Fused head layer 1: one (B,512)x(512,1024) matmul, 128-aligned lane slices.
    head = relu(dense(h, wh1, bh1))          # (B, 1024)
    adv_h = head[:, :hidden]                 # (B, 512)
    val_h = head[:, hidden:]                 # (B, 512)

    # Head layer 2: one flat advantage matmul + one value matmul.
    adv_full = dense(adv_h, wa2, ba2)        # (B, A*atoms)
    val = dense(val_h, wv2, bv2)             # (B, atoms)

    # Per-action segments of the flat advantage output (static lane slices).
    segs = [adv_full[:, a * atoms:(a + 1) * atoms] for a in range(num_actions)]

    adv_sum = segs[0]
    for a in range(1, num_actions):
        adv_sum = adv_sum + segs[a]
    corr = val - adv_sum * (1.0 / float(num_actions))        # (B, atoms)

    # Stack actions along sublanes -> ONE softmax chain over (A*B, atoms).
    logits = (jnp.concatenate(segs, axis=0)
              + jnp.concatenate([corr] * num_actions, axis=0))   # (A*B, atoms)
    m = jnp.max(logits, axis=-1, keepdims=True)
    e = jnp.exp(logits - m)
    s = jnp.sum(e, axis=-1, keepdims=True)
    p = e * pl.reciprocal(s)                                     # exact reciprocal

    # Scatter back to the lane-dense (B, A*atoms) output slab; single store.
    out_ref[...] = jnp.concatenate(
        [p[a * batch:(a + 1) * batch, :] for a in range(num_actions)], axis=-1)


def categorical_dueling_dqn_forward(x, kparams, num_actions, atoms):
    batch = x.shape[0]
    vmem = pl.BlockSpec(memory_space=pltpu.MemorySpace.VMEM)

    # NOTE: no grid at B=8 (whole problem fits VMEM trivially).
    # TODO(synk): if batch ever grows (replay-buffer eval), add a batch grid with
    # dimension_semantics=("parallel",) so v7x's two TensorCores split the batch.
    out2d = pl.pallas_call(
        dueling_dqn_kernel,
        out_shape=jax.ShapeDtypeStruct((batch, num_actions * atoms), jnp.float32),
        in_specs=[vmem] * (1 + len(kparams)),
        out_specs=vmem,
        compiler_params=pltpu.CompilerParams(vmem_limit_bytes=32 * 1024 * 1024),
    )(x, *kparams)

    # Layout-preserving reshape (replaces the previous wrapper transpose op).
    return out2d.reshape(batch, num_actions, atoms)


def init_params(key, in_dim, num_actions, atoms):
    """Deterministic synthetic 'effective' NoisyLinear weights (mu + sigma*eps folded),
    pre-transposed to (in, out) so the kernel computes x @ W + b."""
    def dense(k, fan_in, fan_out):
        kw, kb = jax.random.split(k)
        scale = 1.0 / np.sqrt(fan_in)
        w = jax.random.uniform(kw, (fan_in, fan_out), jnp.float32, -scale, scale)
        b = jax.random.uniform(kb, (1, fan_out), jnp.float32, -scale, scale)
        return w, b

    keys = jax.random.split(key, 8)
    w1, b1 = dense(keys[0], in_dim, HIDDEN)
    w2, b2 = dense(keys[1], HIDDEN, HIDDEN)
    w3, b3 = dense(keys[2], HIDDEN, HIDDEN)
    w4, b4 = dense(keys[3], HIDDEN, HIDDEN)
    wa1, ba1 = dense(keys[4], HIDDEN, HIDDEN)
    wa2, ba2 = dense(keys[5], HIDDEN, num_actions * atoms)
    wv1, bv1 = dense(keys[6], HIDDEN, HIDDEN)
    wv2, bv2 = dense(keys[7], HIDDEN, atoms)
    return (w1, b1, w2, b2, w3, b3, w4, b4,
            wa1, ba1, wa2, ba2, wv1, bv1, wv2, bv2)


def pack_params(raw):
    """Fuse adv1/val1 into one head-1 weight and cast weights to bf16 (biases stay f32)."""
    (w1, b1, w2, b2, w3, b3, w4, b4,
     wa1, ba1, wa2, ba2, wv1, bv1, wv2, bv2) = raw
    wh1 = jnp.concatenate([wa1, wv1], axis=1)      # (512, 1024)
    bh1 = jnp.concatenate([ba1, bv1], axis=1)      # (1, 1024)
    bf = lambda w: w.astype(jnp.bfloat16)
    return (bf(w1), b1, bf(w2), b2, bf(w3), b3, bf(w4), b4,
            bf(wh1), bh1, bf(wa2), ba2, bf(wv2), bv2)


def ref_forward(x, raw, num_actions, atoms):
    """Pure-JAX reference mirroring the PyTorch forward (same bf16-weight precision path)."""
    (w1, b1, w2, b2, w3, b3, w4, b4,
     wa1, ba1, wa2, ba2, wv1, bv1, wv2, bv2) = raw

    def dense(h, w, b):
        return jnp.dot(h.astype(jnp.bfloat16), w.astype(jnp.bfloat16),
                       preferred_element_type=jnp.float32) + b

    relu = lambda z: jnp.maximum(z, 0.0)
    h = relu(dense(x, w1, b1))
    h = relu(dense(h, w2, b2))
    h = relu(dense(h, w3, b3))
    h = relu(dense(h, w4, b4))
    adv = relu(dense(h, wa1, ba1))
    adv = dense(adv, wa2, ba2).reshape(-1, num_actions, atoms)
    val = relu(dense(h, wv1, bv1))
    val = dense(val, wv2, bv2).reshape(-1, 1, atoms)
    final = val + adv - adv.mean(axis=1, keepdims=True)
    return jax.nn.softmax(final, axis=2)


if __name__ == "__main__":
    batch = 8
    in_dim = 64          # input_shape[0]
    num_actions = 6
    atoms = 51

    key = jax.random.PRNGKey(0)
    k_x, k_p = jax.random.split(key)
    x = jax.random.normal(k_x, (batch, in_dim), jnp.float32)

    raw = init_params(k_p, in_dim, num_actions, atoms)
    kparams = pack_params(raw)

    fwd = jax.jit(functools.partial(
        categorical_dueling_dqn_forward, num_actions=num_actions, atoms=atoms))
    out = jax.block_until_ready(fwd(x, kparams))

    ref = ref_forward(x, raw, num_actions, atoms)

    assert out.shape == (batch, num_actions, atoms), out.shape
    np.testing.assert_allclose(np.asarray(out), np.asarray(ref), rtol=2e-3, atol=1e-5)
    # distributions should sum to 1 over atoms
    np.testing.assert_allclose(np.asarray(out).sum(-1), 1.0, rtol=1e-4, atol=1e-4)

    print("KERNEL_OK")
</pallas_src>

<mosaic_0001>
module attributes {stable_mosaic.version = 11 : i64} {
  func.func @dueling_dqn_kernel(%arg0: memref<8x64xf32, #tpu.memory_space<vmem>>, %arg1: memref<64x512xbf16, #tpu.memory_space<vmem>>, %arg2: memref<1x512xf32, #tpu.memory_space<vmem>>, %arg3: memref<512x512xbf16, #tpu.memory_space<vmem>>, %arg4: memref<1x512xf32, #tpu.memory_space<vmem>>, %arg5: memref<512x512xbf16, #tpu.memory_space<vmem>>, %arg6: memref<1x512xf32, #tpu.memory_space<vmem>>, %arg7: memref<512x512xbf16, #tpu.memory_space<vmem>>, %arg8: memref<1x512xf32, #tpu.memory_space<vmem>>, %arg9: memref<512x1024xbf16, #tpu.memory_space<vmem>>, %arg10: memref<1x1024xf32, #tpu.memory_space<vmem>>, %arg11: memref<512x306xbf16, #tpu.memory_space<vmem>>, %arg12: memref<1x306xf32, #tpu.memory_space<vmem>>, %arg13: memref<512x51xbf16, #tpu.memory_space<vmem>>, %arg14: memref<1x51xf32, #tpu.memory_space<vmem>>, %arg15: memref<8x306xf32, #tpu.memory_space<vmem>>) attributes {dimension_semantics = [], scalar_prefetch = 0 : i64, scratch_operands = 0 : i64, tpu.core_type = #tpu.core_type<tc>} {
    %c0 = arith.constant 0 : index
    %c0_0 = arith.constant 0 : index
    %0 = vector.load %arg0[%c0, %c0_0] : memref<8x64xf32, #tpu.memory_space<vmem>>, vector<8x64xf32>
    %1 = arith.truncf %0 : vector<8x64xf32> to vector<8x64xbf16>
    %c0_1 = arith.constant 0 : index
    %c0_2 = arith.constant 0 : index
    %2 = vector.load %arg1[%c0_1, %c0_2] : memref<64x512xbf16, #tpu.memory_space<vmem>>, vector<64x512xbf16>
    %cst = arith.constant dense<0.000000e+00> : vector<8x512xf32>
    %3 = tpu.matmul %1, %2, %cst {dimension_numbers = #tpu.dot_dimension_numbers<[1], [0], [0], [1], [0, 0, 1, 1], [], []>} : vector<8x64xbf16>, vector<64x512xbf16>, vector<8x512xf32> -> vector<8x512xf32>
    %c0_3 = arith.constant 0 : index
    %c0_4 = arith.constant 0 : index
    %4 = vector.load %arg2[%c0_3, %c0_4] : memref<1x512xf32, #tpu.memory_space<vmem>>, vector<1x512xf32>
    %5 = vector.broadcast %4 : vector<1x512xf32> to vector<8x512xf32>
    %6 = arith.addf %3, %5 : vector<8x512xf32>
    %cst_5 = arith.constant 0.000000e+00 : f32
    %7 = vector.broadcast %cst_5 : f32 to vector<8x512xf32>
    %8 = arith.maximumf %6, %7 : vector<8x512xf32>
    %9 = arith.truncf %8 : vector<8x512xf32> to vector<8x512xbf16>
    %c0_6 = arith.constant 0 : index
    %c0_7 = arith.constant 0 : index
    %10 = vector.load %arg3[%c0_6, %c0_7] : memref<512x512xbf16, #tpu.memory_space<vmem>>, vector<512x512xbf16>
    %cst_8 = arith.constant dense<0.000000e+00> : vector<8x512xf32>
    %11 = tpu.matmul %9, %10, %cst_8 {dimension_numbers = #tpu.dot_dimension_numbers<[1], [0], [0], [1], [0, 0, 1, 1], [], []>} : vector<8x512xbf16>, vector<512x512xbf16>, vector<8x512xf32> -> vector<8x512xf32>
    %c0_9 = arith.constant 0 : index
    %c0_10 = arith.constant 0 : index
    %12 = vector.load %arg4[%c0_9, %c0_10] : memref<1x512xf32, #tpu.memory_space<vmem>>, vector<1x512xf32>
    %13 = vector.broadcast %12 : vector<1x512xf32> to vector<8x512xf32>
    %14 = arith.addf %11, %13 : vector<8x512xf32>
    %cst_11 = arith.constant 0.000000e+00 : f32
    %15 = vector.broadcast %cst_11 : f32 to vector<8x512xf32>
    %16 = arith.maximumf %14, %15 : vector<8x512xf32>
    %17 = arith.truncf %16 : vector<8x512xf32> to vector<8x512xbf16>
    %c0_12 = arith.constant 0 : index
    %c0_13 = arith.constant 0 : index
    %18 = vector.load %arg5[%c0_12, %c0_13] : memref<512x512xbf16, #tpu.memory_space<vmem>>, vector<512x512xbf16>
    %cst_14 = arith.constant dense<0.000000e+00> : vector<8x512xf32>
    %19 = tpu.matmul %17, %18, %cst_14 {dimension_numbers = #tpu.dot_dimension_numbers<[1], [0], [0], [1], [0, 0, 1, 1], [], []>} : vector<8x512xbf16>, vector<512x512xbf16>, vector<8x512xf32> -> vector<8x512xf32>
    %c0_15 = arith.constant 0 : index
    %c0_16 = arith.constant 0 : index
    %20 = vector.load %arg6[%c0_15, %c0_16] : memref<1x512xf32, #tpu.memory_space<vmem>>, vector<1x512xf32>
    %21 = vector.broadcast %20 : vector<1x512xf32> to vector<8x512xf32>
    %22 = arith.addf %19, %21 : vector<8x512xf32>
    %cst_17 = arith.constant 0.000000e+00 : f32
    %23 = vector.broadcast %cst_17 : f32 to vector<8x512xf32>
    %24 = arith.maximumf %22, %23 : vector<8x512xf32>
    %25 = arith.truncf %24 : vector<8x512xf32> to vector<8x512xbf16>
    %c0_18 = arith.constant 0 : index
    %c0_19 = arith.constant 0 : index
    %26 = vector.load %arg7[%c0_18, %c0_19] : memref<512x512xbf16, #tpu.memory_space<vmem>>, vector<512x512xbf16>
    %cst_20 = arith.constant dense<0.000000e+00> : vector<8x512xf32>
    %27 = tpu.matmul %25, %26, %cst_20 {dimension_numbers = #tpu.dot_dimension_numbers<[1], [0], [0], [1], [0, 0, 1, 1], [], []>} : vector<8x512xbf16>, vector<512x512xbf16>, vector<8x512xf32> -> vector<8x512xf32>
    %c0_21 = arith.constant 0 : index
    %c0_22 = arith.constant 0 : index
    %28 = vector.load %arg8[%c0_21, %c0_22] : memref<1x512xf32, #tpu.memory_space<vmem>>, vector<1x512xf32>
    %29 = vector.broadcast %28 : vector<1x512xf32> to vector<8x512xf32>
    %30 = arith.addf %27, %29 : vector<8x512xf32>
    %cst_23 = arith.constant 0.000000e+00 : f32
    %31 = vector.broadcast %cst_23 : f32 to vector<8x512xf32>
    %32 = arith.maximumf %30, %31 : vector<8x512xf32>
    %33 = arith.truncf %32 : vector<8x512xf32> to vector<8x512xbf16>
    %c0_24 = arith.constant 0 : index
    %c0_25 = arith.constant 0 : index
    %34 = vector.load %arg9[%c0_24, %c0_25] : memref<512x1024xbf16, #tpu.memory_space<vmem>>, vector<512x1024xbf16>
    %cst_26 = arith.constant dense<0.000000e+00> : vector<8x1024xf32>
    %35 = tpu.matmul %33, %34, %cst_26 {dimension_numbers = #tpu.dot_dimension_numbers<[1], [0], [0], [1], [0, 0, 1, 1], [], []>} : vector<8x512xbf16>, vector<512x1024xbf16>, vector<8x1024xf32> -> vector<8x1024xf32>
    %c0_27 = arith.constant 0 : index
    %c0_28 = arith.constant 0 : index
    %36 = vector.load %arg10[%c0_27, %c0_28] : memref<1x1024xf32, #tpu.memory_space<vmem>>, vector<1x1024xf32>
    %37 = vector.broadcast %36 : vector<1x1024xf32> to vector<8x1024xf32>
    %38 = arith.addf %35, %37 : vector<8x1024xf32>
    %cst_29 = arith.constant 0.000000e+00 : f32
    %39 = vector.broadcast %cst_29 : f32 to vector<8x1024xf32>
    %40 = arith.maximumf %38, %39 : vector<8x1024xf32>
    %41 = vector.extract_strided_slice %40 {offsets = [0, 0], sizes = [8, 512], strides = [1, 1]} : vector<8x1024xf32> to vector<8x512xf32>
    %42 = vector.extract_strided_slice %40 {offsets = [0, 512], sizes = [8, 512], strides = [1, 1]} : vector<8x1024xf32> to vector<8x512xf32>
    %43 = arith.truncf %41 : vector<8x512xf32> to vector<8x512xbf16>
    %c0_30 = arith.constant 0 : index
    %c0_31 = arith.constant 0 : index
    %44 = vector.load %arg11[%c0_30, %c0_31] : memref<512x306xbf16, #tpu.memory_space<vmem>>, vector<512x306xbf16>
    %cst_32 = arith.constant dense<0.000000e+00> : vector<8x306xf32>
    %45 = tpu.matmul %43, %44, %cst_32 {dimension_numbers = #tpu.dot_dimension_numbers<[1], [0], [0], [1], [0, 0, 1, 1], [], []>} : vector<8x512xbf16>, vector<512x306xbf16>, vector<8x306xf32> -> vector<8x306xf32>
    %c0_33 = arith.constant 0 : index
    %c0_34 = arith.constant 0 : index
    %46 = vector.load %arg12[%c0_33, %c0_34] : memref<1x306xf32, #tpu.memory_space<vmem>>, vector<1x306xf32>
    %47 = vector.broadcast %46 : vector<1x306xf32> to vector<8x306xf32>
    %48 = arith.addf %45, %47 : vector<8x306xf32>
    %49 = arith.truncf %42 : vector<8x512xf32> to vector<8x512xbf16>
    %c0_35 = arith.constant 0 : index
    %c0_36 = arith.constant 0 : index
    %50 = vector.load %arg13[%c0_35, %c0_36] : memref<512x51xbf16, #tpu.memory_space<vmem>>, vector<512x51xbf16>
    %cst_37 = arith.constant dense<0.000000e+00> : vector<8x51xf32>
    %51 = tpu.matmul %49, %50, %cst_37 {dimension_numbers = #tpu.dot_dimension_numbers<[1], [0], [0], [1], [0, 0, 1, 1], [], []>} : vector<8x512xbf16>, vector<512x51xbf16>, vector<8x51xf32> -> vector<8x51xf32>
    %c0_38 = arith.constant 0 : index
    %c0_39 = arith.constant 0 : index
    %52 = vector.load %arg14[%c0_38, %c0_39] : memref<1x51xf32, #tpu.memory_space<vmem>>, vector<1x51xf32>
    %53 = vector.broadcast %52 : vector<1x51xf32> to vector<8x51xf32>
    %54 = arith.addf %51, %53 : vector<8x51xf32>
    %55 = vector.extract_strided_slice %48 {offsets = [0, 0], sizes = [8, 51], strides = [1, 1]} : vector<8x306xf32> to vector<8x51xf32>
    %56 = vector.extract_strided_slice %48 {offsets = [0, 51], sizes = [8, 51], strides = [1, 1]} : vector<8x306xf32> to vector<8x51xf32>
    %57 = vector.extract_strided_slice %48 {offsets = [0, 102], sizes = [8, 51], strides = [1, 1]} : vector<8x306xf32> to vector<8x51xf32>
    %58 = vector.extract_strided_slice %48 {offsets = [0, 153], sizes = [8, 51], strides = [1, 1]} : vector<8x306xf32> to vector<8x51xf32>
    %59 = vector.extract_strided_slice %48 {offsets = [0, 204], sizes = [8, 51], strides = [1, 1]} : vector<8x306xf32> to vector<8x51xf32>
    %60 = vector.extract_strided_slice %48 {offsets = [0, 255], sizes = [8, 51], strides = [1, 1]} : vector<8x306xf32> to vector<8x51xf32>
    %61 = arith.addf %55, %56 : vector<8x51xf32>
    %62 = arith.addf %61, %57 : vector<8x51xf32>
    %63 = arith.addf %62, %58 : vector<8x51xf32>
    %64 = arith.addf %63, %59 : vector<8x51xf32>
    %65 = arith.addf %64, %60 : vector<8x51xf32>
    %cst_40 = arith.constant 0.166666672 : f32
    %66 = vector.broadcast %cst_40 : f32 to vector<8x51xf32>
    %67 = arith.mulf %65, %66 : vector<8x51xf32>
    %68 = arith.subf %54, %67 : vector<8x51xf32>
    %69 = tpu.concatenate %55, %56, %57, %58, %59, %60 in 0 : vector<8x51xf32>, vector<8x51xf32>, vector<8x51xf32>, vector<8x51xf32>, vector<8x51xf32>, vector<8x51xf32> -> vector<48x51xf32>
    %70 = tpu.concatenate %68, %68, %68, %68, %68, %68 in 0 : vector<8x51xf32>, vector<8x51xf32>, vector<8x51xf32>, vector<8x51xf32>, vector<8x51xf32>, vector<8x51xf32> -> vector<48x51xf32>
    %71 = arith.addf %69, %70 : vector<48x51xf32>
    %cst_41 = arith.constant dense<0xFF800000> : vector<48xf32>
    %72 = vector.multi_reduction <maximumf>, %71, %cst_41 [1] : vector<48x51xf32> to vector<48xf32>
    %73 = vector.shape_cast %72 : vector<48xf32> to vector<48x1xf32>
    %74 = vector.broadcast %73 : vector<48x1xf32> to vector<48x51xf32>
    %75 = arith.subf %71, %74 : vector<48x51xf32>
    %76 = math.exp %75 : vector<48x51xf32>
    %cst_42 = arith.constant dense<0.000000e+00> : vector<48xf32>
    %77 = vector.multi_reduction <add>, %76, %cst_42 [1] : vector<48x51xf32> to vector<48xf32>
    %78 = vector.shape_cast %77 : vector<48xf32> to vector<48x1xf32>
    %79 = tpu.reciprocal %78 : vector<48x1xf32> -> vector<48x1xf32>
    %80 = vector.broadcast %79 : vector<48x1xf32> to vector<48x51xf32>
    %81 = arith.mulf %76, %80 : vector<48x51xf32>
    %82 = vector.extract_strided_slice %81 {offsets = [0, 0], sizes = [8, 51], strides = [1, 1]} : vector<48x51xf32> to vector<8x51xf32>
    %83 = vector.extract_strided_slice %81 {offsets = [8, 0], sizes = [8, 51], strides = [1, 1]} : vector<48x51xf32> to vector<8x51xf32>
    %84 = vector.extract_strided_slice %81 {offsets = [16, 0], sizes = [8, 51], strides = [1, 1]} : vector<48x51xf32> to vector<8x51xf32>
    %85 = vector.extract_strided_slice %81 {offsets = [24, 0], sizes = [8, 51], strides = [1, 1]} : vector<48x51xf32> to vector<8x51xf32>
    %86 = vector.extract_strided_slice %81 {offsets = [32, 0], sizes = [8, 51], strides = [1, 1]} : vector<48x51xf32> to vector<8x51xf32>
    %87 = vector.extract_strided_slice %81 {offsets = [40, 0], sizes = [8, 51], strides = [1, 1]} : vector<48x51xf32> to vector<8x51xf32>
    %88 = tpu.concatenate %82, %83, %84, %85, %86, %87 in 1 : vector<8x51xf32>, vector<8x51xf32>, vector<8x51xf32>, vector<8x51xf32>, vector<8x51xf32>, vector<8x51xf32> -> vector<8x306xf32>
    %c0_43 = arith.constant 0 : index
    %c0_44 = arith.constant 0 : index
    %89 = vector.load %arg15[%c0_43, %c0_44] : memref<8x306xf32, #tpu.memory_space<vmem>>, vector<8x306xf32>
    tpu.vector_store %arg15[%c0_43, %c0_44], %88 {strides = array<i32>} : memref<8x306xf32, #tpu.memory_space<vmem>>, vector<8x306xf32>,
    return
  }
}

</mosaic_0001>

<bundles_post_ra>
// kernel: categorical_dueling_dqn_forward.1
= control target key start
LH: loop header
LB: loop body
LE: loop exit
PB: predicated region body
PF: predicated region fallthrough
CT: control target
= control target key end

     0   :  { %20 = vsyncpa [#allocation3], 0  ;;  %s12660_s0 = inlined_call_operand.vmem [shape: f32[8,64], index: 0, kind: input, shape index: {}]   ;;  %s12661_s1 = inlined_call_operand.vmem [shape: bf16[64,512], index: 1, kind: input, shape index: {}]   ;;  %s12662_s2 = inlined_call_operand.vmem [shape: f32[1,512], index: 2, kind: input, shape index: {}]   ;;  %s12663_s3 = inlined_call_operand.vmem [shape: bf16[512,512], index: 3, kind: input, shape index: {}]   ;;  %s12664_s4 = inlined_call_operand.vmem [shape: f32[1,512], index: 4, kind: input, shape index: {}]   ;;  %s12665_s5 = inlined_call_operand.hbm [shape: bf16[512,512], index: 5, kind: input, shape index: {}]   ;;  %s12666_s6 = inlined_call_operand.vmem [shape: f32[1,512], index: 6, kind: input, shape index: {}]   ;;  %s12667_s7 = inlined_call_operand.hbm [shape: bf16[512,512], index: 7, kind: input, shape index: {}]   ;;  %s12668_s8 = inlined_call_operand.vmem [shape: f32[1,512], index: 8, kind: input, shape index: {}]   ;;  %s12669_s9 = inlined_call_operand.hbm [shape: bf16[512,1024], index: 9, kind: input, shape index: {}]   ;;  %s12670_s10 = inlined_call_operand.vmem [shape: f32[1,1024], index: 10, kind: input, shape index: {}]   ;;  %s12671_s11 = inlined_call_operand.vmem [shape: bf16[512,306], index: 11, kind: input, shape index: {}]   ;;  %s12672_s12 = inlined_call_operand.vmem [shape: f32[1,306], index: 12, kind: input, shape index: {}]   ;;  %s12673_s13 = inlined_call_operand.vmem [shape: bf16[512,51], index: 13, kind: input, shape index: {}]   ;;  %s12674_s14 = inlined_call_operand.vmem [shape: f32[1,51], index: 14, kind: input, shape index: {}]   ;;  %s12675_s15 = inlined_call_operand.vmem [shape: f32[8,306], index: 15, kind: output, shape index: {}]  }
   0x1   :  { %21 = vsyncpa [#allocation5], 0  ;;  %s51_s20 = sshll.u32 %s12667_s7, 4  ;;  %s10620_s21 = smov [#allocation4]   ;;  %s52_s20 = int_to_ptr.hbm [resolvable:$true] %s51_s20 }
   0x2   :  { %s53_s22 = sshll.u32 %s10620_s21, 4  ;;  %s36_s25 = sshll.u32 %s12665_s5, 4  ;;  %s54_s22 = int_to_ptr.vmem [resolvable:$true] %s53_s22  ;;  %s37_s25 = int_to_ptr.hbm [resolvable:$true] %s36_s25 }
   0x3   :  { %s10621_s26 = smov 256   ;;  %s10622_s27 = smov 16  }
   0x4   :  { %59 = dma.hbm_to_vmem [thread:$0]  %s52_s20, 16384, %s54_s22, [#allocation5], %s10621_s26, %s10621_s26, %s10622_s27  }
   0x5   :  { %s10623_s28 = smov [#allocation2]   ;;  %s66_s17 = sshll.u32 %s12669_s9, 4  ;;  %s67_s17 = int_to_ptr.hbm [resolvable:$true] %s66_s17 }
   0x6   :  { %s38_s29 = sshll.u32 %s10623_s28, 4  ;;  %s10624_s7 = smov [#allocation6]   ;;  %s39_s29 = int_to_ptr.vmem [resolvable:$true] %s38_s29 }
   0x7   :  { %44 = dma.hbm_to_vmem [thread:$0]  %s37_s25, 16384, %s39_s29, [#allocation3], %s10621_s26, %s10621_s26, %s10622_s27  }
   0x8   :  { %s68_s18 = sshll.u32 %s10624_s7, 4  ;;  %s10625_s19 = smov 512   ;;  %s69_s18 = int_to_ptr.vmem [resolvable:$true] %s68_s18 }
   0x9   :  { %s10626_s21 = smov 32  }
   0xa   :  { %74 = dma.hbm_to_vmem [thread:$0]  %s67_s17, 32768, %s69_s18, [#allocation5], %s10625_s19, %s10625_s19, %s10626_s21  }
   0xb   :  { %10616 = dma.done.wait [#allocation3], 16384  }
   0xc   :  { %10617 = vsyncadd [#allocation3], 4294950912 }
   0xd   :  { %10618 = dma.done.wait [#allocation5], 49152  }
   0xe   :  { %10619 = vsyncadd [#allocation5], 4294918144  ;;  %v6627_v0 = vld [vmem:[%s12661_s1 + $0x60] sm:$0xf]  ;;  %v9731_v1 = vld [vmem:[%s12661_s1 + $0x6c] sm:$0xf0] }
   0xf   :  { %v9729_v2 = vld [vmem:[%s12661_s1 + $0x64] sm:$0xf]  ;;  %v6628_v3 = vor.u32 %v9731_v1, %v6627_v0  ;;  %v6629_v4 = vld [vmem:[%s12661_s1 + $0x70] sm:$0xf0]  ;;  %v6635_v5 = vld [vmem:[%s12661_s1 + $0x68] sm:$0xf] }
  0x10   :  { %v9732_v6 = vld [vmem:[%s12661_s1 + $0x74] sm:$0xf0]  ;;  %v6632_v7 = vor.u32 %v9729_v2, %v6629_v4  ;;  %v9730_v9 = vld [vmem:[%s12661_s1 + $0x6c] sm:$0xf]  ;;  %v6637_v10 = vld [vmem:[%s12661_s1 + $0x78] sm:$0xf0] }
  0x11   :  { %v6636_v8 = vor.u32 %v9732_v6, %v6635_v5  ;;  %v6611_v11 = vld [vmem:[%s12661_s1 + $0x40] sm:$0xf]  ;;  %214 = vmatpush.bf16.msra.mxu0 %v6628_v3  ;;  %v6640_v12 = vor.u32 %v9730_v9, %v6637_v10  ;;  %v9727_v13 = vld [vmem:[%s12661_s1 + $0x4c] sm:$0xf0]  ;;  %v9725_v14 = vld [vmem:[%s12661_s1 + $0x44] sm:$0xf] }
  0x12   :  { %v6613_v15 = vld [vmem:[%s12661_s1 + $0x50] sm:$0xf0]  ;;  %227 = vmatpush.bf16.msra.mxu1 %v6632_v7  ;;  %v6612_v16 = vor.u32 %v9727_v13, %v6611_v11  ;;  %v6619_v18 = vld [vmem:[%s12661_s1 + $0x48] sm:$0xf]  ;;  %v9728_v19 = vld [vmem:[%s12661_s1 + $0x54] sm:$0xf0] }
  0x13   :  { %240 = vmatpush.bf16.msra.mxu2 %v6636_v8  ;;  %v6616_v17 = vor.u32 %v9725_v14, %v6613_v15  ;;  %v9726_v20 = vld [vmem:[%s12661_s1 + $0x4c] sm:$0xf]  ;;  %253 = vmatpush.bf16.msra.mxu3 %v6640_v12  ;;  %v6620_v21 = vor.u32 %v9728_v19, %v6619_v18  ;;  %v6621_v22 = vld [vmem:[%s12661_s1 + $0x58] sm:$0xf0]  ;;  %v6595_v23 = vld [vmem:[%s12661_s1 + $0x20] sm:$0xf] }
  0x14   :  { %v9723_v24 = vld [vmem:[%s12661_s1 + $0x2c] sm:$0xf0]  ;;  %v6624_v25 = vor.u32 %v9726_v20, %v6621_v22  ;;  %v9721_v26 = vld [vmem:[%s12661_s1 + $0x24] sm:$0xf]  ;;  %v6597_v27 = vld [vmem:[%s12661_s1 + $0x30] sm:$0xf0] }
  0x15   :  { %v6603_v28 = vld [vmem:[%s12661_s1 + $0x28] sm:$0xf]  ;;  %215 = vmatpush.bf16.msra.mxu0 %v6612_v16  ;;  %v6596_v29 = vor.u32 %v9723_v24, %v6595_v23  ;;  %v9724_v30 = vld [vmem:[%s12661_s1 + $0x34] sm:$0xf0]  ;;  %v9722_v31 = vld [vmem:[%s12661_s1 + $0x2c] sm:$0xf]  ;;  %v6600_v33 = vor.u32 %v9721_v26, %v6597_v27 }
  0x16   :  { %v6605_v32 = vld [vmem:[%s12661_s1 + $0x38] sm:$0xf0]  ;;  %228 = vmatpush.bf16.msra.mxu1 %v6616_v17  ;;  %v6604_v34 = vor.u32 %v9724_v30, %v6603_v28  ;;  %v6579_v35 = vld [vmem:[%s12661_s1] sm:$0xf]  ;;  %v9719_v36 = vld [vmem:[%s12661_s1 + $0xc] sm:$0xf0] }
  0x17   :  { %241 = vmatpush.bf16.msra.mxu2 %v6620_v21  ;;  %v9717_v37 = vld [vmem:[%s12661_s1 + $0x4] sm:$0xf]  ;;  %254 = vmatpush.bf16.msra.mxu3 %v6624_v25  ;;  %v6608_v38 = vor.u32 %v9722_v31, %v6605_v32  ;;  %v6581_v39 = vld [vmem:[%s12661_s1 + $0x10] sm:$0xf0]  ;;  %v6587_v40 = vld [vmem:[%s12661_s1 + $0x8] sm:$0xf]  ;;  %v6580_v45 = vor.u32 %v9719_v36, %v6579_v35 }
  0x18   :  { %v9720_v41 = vld [vmem:[%s12661_s1 + $0x14] sm:$0xf0]  ;;  %v9718_v42 = vld [vmem:[%s12661_s1 + $0xc] sm:$0xf]  ;;  %v6589_v43 = vld [vmem:[%s12661_s1 + $0x18] sm:$0xf0]  ;;  %v6584_v49 = vor.u32 %v9717_v37, %v6581_v39 }
  0x19   :  { %v98_v44 = vld [vmem:[%s12660_s0] sm:$0xff]  ;;  %216 = vmatpush.bf16.msra.mxu0 %v6596_v29  ;;  %v9763_v47 = vld [vmem:[%s12663_s3 + $0xec] sm:$0xf0]  ;;  %v6588_v50 = vor.u32 %v9720_v41, %v6587_v40  ;;  %v6592_v52 = vor.u32 %v9718_v42, %v6589_v43  ;;  %vm206_vm0 = vcmask 523264   ;;  %s10630_s21 = smov 1   ;;  %s10631_s1 = smov 103  }
  0x1a   :  { %v6759_v46 = vld [vmem:[%s12663_s3 + $0xe0] sm:$0xf]  ;;  %229 = vmatpush.bf16.msra.mxu1 %v6600_v33  ;;  %v9795_v51 = vld [vmem:[%s12663_s3 + $0x1ec] sm:$0xf0]  ;;  %v99_v57 = vpack.c.bf16 %v98_v44, %v98_v44  ;;  %vm6364_vm1 = vcmask 211968   ;;  %vm6381_vm2 = vcmask 7168  }
  0x1b   :  { %v6887_v48 = vld [vmem:[%s12663_s3 + $0x1e0] sm:$0xf]  ;;  %242 = vmatpush.bf16.msra.mxu2 %v6604_v34  ;;  %255 = vmatpush.bf16.msra.mxu3 %v6608_v38  ;;  %v6760_v53 = vor.u32 %v9763_v47, %v6759_v46  ;;  %v9759_v55 = vld [vmem:[%s12663_s3 + $0xcc] sm:$0xf0]  ;;  %vm6393_vm3 = vcmask 416768   ;;  %s10633_s20 = smov 102  }
  0x1c   :  { %v6743_v54 = vld [vmem:[%s12663_s3 + $0xc0] sm:$0xf]  ;;  %v6888_v58 = vor.u32 %v9795_v51, %v6887_v48  ;;  %v9827_v59 = vld [vmem:[%s12663_s3 + $0x2ec] sm:$0xf0]  ;;  %s10634_s22 = smov 51   ;;  %s10635_s23 = smov 127  }
  0x1d   :  { %v7015_v56 = vld [vmem:[%s12663_s3 + $0x2e0] sm:$0xf]  ;;  %v9859_v61 = vld [vmem:[%s12663_s3 + $0x3ec] sm:$0xf0]  ;;  %217 = vmatpush.bf16.msra.mxu0 %v6580_v45  ;;  %v6744_v1 = vor.u32 %v9759_v55, %v6743_v54  ;;  %s10636_s9 = smov 76  }
  0x1e   :  { %v7143_v60 = vld [vmem:[%s12663_s3 + $0x3e0] sm:$0xf]  ;;  %v9791_v63 = vld [vmem:[%s12663_s3 + $0x1cc] sm:$0xf0]  ;;  %230 = vmatpush.bf16.msra.mxu1 %v6584_v49  ;;  %v7016_v0 = vor.u32 %v9827_v59, %v7015_v56 }
  0x1f   :  { %v6871_v62 = vld [vmem:[%s12663_s3 + $0x1c0] sm:$0xf]  ;;  %243 = vmatpush.bf16.msra.mxu2 %v6588_v50  ;;  %256 = vmatpush.bf16.msra.mxu3 %v6592_v52  ;;  %v7144_v2 = vor.u32 %v9859_v61, %v7143_v60  ;;  %v9823_v5 = vld [vmem:[%s12663_s3 + $0x2cc] sm:$0xf0] }
  0x20   :  { %v6727_v3 = vld [vmem:[%s12663_s3 + $0xa0] sm:$0xf]  ;;  %6641 = vmatmul.msk.bf16.vlgmr.msra.gmra.mxu0 %vm206_vm0, %v99_v57  ;;  %v6872_v6 = vor.u32 %v9791_v63, %v6871_v62  ;;  %v9755_v7 = vld [vmem:[%s12663_s3 + $0xac] sm:$0xf0] }
  0x21   :  { %1048 = vmatpush.bf16.msrb.mxu0 %v6760_v53  ;;  %v6999_v4 = vld [vmem:[%s12663_s3 + $0x2c0] sm:$0xf]  ;;  %v9855_v9 = vld [vmem:[%s12663_s3 + $0x3cc] sm:$0xf0]  ;;  %6642 = vmatmul.msk.bf16.vlgmr.msra.gmra.mxu1 %vm206_vm0, %v99_v57  ;;  %v6728_v13 = vor.u32 %v9755_v7, %v6727_v3 }
  0x22   :  { %1061 = vmatpush.bf16.msrb.mxu1 %v6888_v58  ;;  %v7127_v8 = vld [vmem:[%s12663_s3 + $0x3c0] sm:$0xf]  ;;  %6643 = vmatmul.msk.bf16.vlgmr.msra.gmra.mxu2 %vm206_vm0, %v99_v57  ;;  %v9787_v11 = vld [vmem:[%s12663_s3 + $0x1ac] sm:$0xf0]  ;;  %v7000_v12 = vor.u32 %v9823_v5, %v6999_v4 }
  0x23   :  { %v6855_v10 = vld [vmem:[%s12663_s3 + $0x1a0] sm:$0xf]  ;;  %6644 = vmatmul.msk.bf16.vlgmr.msra.gmra.mxu3 %vm206_vm0, %v99_v57  ;;  %1074 = vmatpush.bf16.msrb.mxu2 %v7016_v0  ;;  %v7128_v14 = vor.u32 %v9855_v9, %v7127_v8  ;;  %v9819_v17 = vld [vmem:[%s12663_s3 + $0x2ac] sm:$0xf0]  ;;  %v9761_v8 = vld [vmem:[%s12663_s3 + $0xe4] sm:$0xf] }
  0x24   :  { %1087 = vmatpush.bf16.msrb.mxu3 %v7144_v2  ;;  %v6711_v15 = vld [vmem:[%s12663_s3 + $0x80] sm:$0xf]  ;;  %v6856_v18 = vor.u32 %v9787_v11, %v6855_v10  ;;  %v9751_v19 = vld [vmem:[%s12663_s3 + $0x8c] sm:$0xf0]  ;;  %v6761_v9 = vld [vmem:[%s12663_s3 + $0xf0] sm:$0xf0] }
  0x25   :  { %1049 = vmatpush.bf16.msrb.mxu0 %v6744_v1  ;;  %v6983_v16 = vld [vmem:[%s12663_s3 + $0x2a0] sm:$0xf]  ;;  %v9851_v21 = vld [vmem:[%s12663_s3 + $0x3ac] sm:$0xf0]  ;;  %v6712_v25 = vor.u32 %v9751_v19, %v6711_v15  ;;  %v9793_v10 = vld [vmem:[%s12663_s3 + $0x1e4] sm:$0xf] }
  0x26   :  { %1062 = vmatpush.bf16.msrb.mxu1 %v6872_v6  ;;  %v7111_v20 = vld [vmem:[%s12663_s3 + $0x3a0] sm:$0xf]  ;;  %v9783_v23 = vld [vmem:[%s12663_s3 + $0x18c] sm:$0xf0]  ;;  %v6984_v24 = vor.u32 %v9819_v17, %v6983_v16  ;;  %v6889_v11 = vld [vmem:[%s12663_s3 + $0x1f0] sm:$0xf0] }
  0x27   :  { %v6839_v22 = vld [vmem:[%s12663_s3 + $0x180] sm:$0xf]  ;;  %1075 = vmatpush.bf16.msrb.mxu2 %v7000_v12  ;;  %v7112_v26 = vor.u32 %v9851_v21, %v7111_v20  ;;  %v9815_v29 = vld [vmem:[%s12663_s3 + $0x28c] sm:$0xf0]  ;;  %v9757_v15 = vld [vmem:[%s12663_s3 + $0xc4] sm:$0xf]  ;;  %v6764_v20 = vor.u32 %v9761_v8, %v6761_v9 }
  0x28   :  { %1088 = vmatpush.bf16.msrb.mxu3 %v7128_v14  ;;  %v6695_v27 = vld [vmem:[%s12663_s3 + $0x60] sm:$0xf]  ;;  %v6840_v30 = vor.u32 %v9783_v23, %v6839_v22  ;;  %v9747_v31 = vld [vmem:[%s12663_s3 + $0x6c] sm:$0xf0]  ;;  %v9825_v22 = vld [vmem:[%s12663_s3 + $0x2e4] sm:$0xf] }
  0x29   :  { %1050 = vmatpush.bf16.msrb.mxu0 %v6728_v13  ;;  %v6967_v28 = vld [vmem:[%s12663_s3 + $0x280] sm:$0xf]  ;;  %v9847_v33 = vld [vmem:[%s12663_s3 + $0x38c] sm:$0xf0]  ;;  %v6696_v37 = vor.u32 %v9747_v31, %v6695_v27  ;;  %v7017_v23 = vld [vmem:[%s12663_s3 + $0x2f0] sm:$0xf0] }
  0x2a   :  { %1063 = vmatpush.bf16.msrb.mxu1 %v6856_v18  ;;  %v7095_v32 = vld [vmem:[%s12663_s3 + $0x380] sm:$0xf]  ;;  %v9779_v35 = vld [vmem:[%s12663_s3 + $0x16c] sm:$0xf0]  ;;  %v6968_v36 = vor.u32 %v9815_v29, %v6967_v28  ;;  %v7145_v27 = vld [vmem:[%s12663_s3 + $0x3f0] sm:$0xf0] }
  0x2b   :  { %v6823_v34 = vld [vmem:[%s12663_s3 + $0x160] sm:$0xf]  ;;  %1076 = vmatpush.bf16.msrb.mxu2 %v6984_v24  ;;  %v7096_v38 = vor.u32 %v9847_v33, %v7095_v32  ;;  %v9811_v41 = vld [vmem:[%s12663_s3 + $0x26c] sm:$0xf0]  ;;  %v6892_v24 = vor.u32 %v9793_v10, %v6889_v11  ;;  %v9789_v28 = vld [vmem:[%s12663_s3 + $0x1c4] sm:$0xf]  ;;  %v7020_v32 = vor.u32 %v9825_v22, %v7017_v23 }
  0x2c   :  { %1089 = vmatpush.bf16.msrb.mxu3 %v7112_v26  ;;  %v6679_v39 = vld [vmem:[%s12663_s3 + $0x40] sm:$0xf]  ;;  %v6824_v42 = vor.u32 %v9779_v35, %v6823_v34  ;;  %v9743_v43 = vld [vmem:[%s12663_s3 + $0x4c] sm:$0xf0]  ;;  %v9857_v26 = vld [vmem:[%s12663_s3 + $0x3e4] sm:$0xf] }
  0x2d   :  { %1051 = vmatpush.bf16.msrb.mxu0 %v6712_v25  ;;  %v6951_v40 = vld [vmem:[%s12663_s3 + $0x260] sm:$0xf]  ;;  %v9843_v45 = vld [vmem:[%s12663_s3 + $0x36c] sm:$0xf0]  ;;  %v6680_v49 = vor.u32 %v9743_v43, %v6679_v39  ;;  %v6745_v25 = vld [vmem:[%s12663_s3 + $0xd0] sm:$0xf0]  ;;  %v7148_v35 = vor.u32 %v9857_v26, %v7145_v27 }
  0x2e   :  { %1064 = vmatpush.bf16.msrb.mxu1 %v6840_v30  ;;  %v7079_v44 = vld [vmem:[%s12663_s3 + $0x360] sm:$0xf]  ;;  %v9775_v47 = vld [vmem:[%s12663_s3 + $0x14c] sm:$0xf0]  ;;  %v6952_v48 = vor.u32 %v9811_v41, %v6951_v40  ;;  %v6873_v29 = vld [vmem:[%s12663_s3 + $0x1d0] sm:$0xf0]  ;;  %v6748_v34 = vor.u32 %v9757_v15, %v6745_v25 }
  0x2f   :  { %v6807_v46 = vld [vmem:[%s12663_s3 + $0x140] sm:$0xf]  ;;  %1077 = vmatpush.bf16.msrb.mxu2 %v6968_v36  ;;  %v7080_v50 = vor.u32 %v9843_v45, %v7079_v44  ;;  %v9807_v53 = vld [vmem:[%s12663_s3 + $0x24c] sm:$0xf0]  ;;  %v9753_v33 = vld [vmem:[%s12663_s3 + $0xa4] sm:$0xf] }
  0x30   :  { %1090 = vmatpush.bf16.msrb.mxu3 %v7096_v38  ;;  %v6663_v51 = vld [vmem:[%s12663_s3 + $0x20] sm:$0xf]  ;;  %v6808_v54 = vor.u32 %v9775_v47, %v6807_v46  ;;  %v9739_v55 = vld [vmem:[%s12663_s3 + $0x2c] sm:$0xf0]  ;;  %v9821_v36 = vld [vmem:[%s12663_s3 + $0x2c4] sm:$0xf]  ;;  %v6876_v38 = vor.u32 %v9789_v28, %v6873_v29 }
  0x31   :  { %1052 = vmatpush.bf16.msrb.mxu0 %v6696_v37  ;;  %v6935_v52 = vld [vmem:[%s12663_s3 + $0x240] sm:$0xf]  ;;  %v9839_v57 = vld [vmem:[%s12663_s3 + $0x34c] sm:$0xf0]  ;;  %v6664_v62 = vor.u32 %v9739_v55, %v6663_v51  ;;  %v7001_v37 = vld [vmem:[%s12663_s3 + $0x2d0] sm:$0xf0] }
  0x32   :  { %1065 = vmatpush.bf16.msrb.mxu1 %v6824_v42  ;;  %v7063_v56 = vld [vmem:[%s12663_s3 + $0x340] sm:$0xf]  ;;  %v9771_v59 = vld [vmem:[%s12663_s3 + $0x12c] sm:$0xf0]  ;;  %v6936_v60 = vor.u32 %v9807_v53, %v6935_v52  ;;  %v6729_v39 = vld [vmem:[%s12663_s3 + $0xb0] sm:$0xf0]  ;;  %v7004_v44 = vor.u32 %v9821_v36, %v7001_v37 }
  0x33   :  { %v6791_v58 = vld [vmem:[%s12663_s3 + $0x120] sm:$0xf]  ;;  %1078 = vmatpush.bf16.msrb.mxu2 %v6952_v48  ;;  %v7064_v63 = vor.u32 %v9839_v57, %v7063_v56  ;;  %v9735_v0 = vld [vmem:[%s12663_s3 + $0xc] sm:$0xf0]  ;;  %v9853_v40 = vld [vmem:[%s12663_s3 + $0x3c4] sm:$0xf]  ;;  %v6732_v45 = vor.u32 %v9753_v33, %v6729_v39 }
  0x34   :  { %v6647_v61 = vld [vmem:[%s12663_s3] sm:$0xf]  ;;  %1091 = vmatpush.bf16.msrb.mxu3 %v7080_v50  ;;  %v9803_v2 = vld [vmem:[%s12663_s3 + $0x22c] sm:$0xf0]  ;;  %v6792_v3 = vor.u32 %v9771_v59, %v6791_v58  ;;  %v7129_v41 = vld [vmem:[%s12663_s3 + $0x3d0] sm:$0xf0] }
  0x35   :  { %1053 = vmatpush.bf16.msrb.mxu0 %v6680_v49  ;;  %v6919_v1 = vld [vmem:[%s12663_s3 + $0x220] sm:$0xf]  ;;  %v9835_v6 = vld [vmem:[%s12663_s3 + $0x32c] sm:$0xf0]  ;;  %v6648_v13 = vor.u32 %v9735_v0, %v6647_v61  ;;  %v9785_v42 = vld [vmem:[%s12663_s3 + $0x1a4] sm:$0xf]  ;;  %v7132_v46 = vor.u32 %v9853_v40, %v7129_v41 }
  0x36   :  { %1066 = vmatpush.bf16.msrb.mxu1 %v6808_v54  ;;  %v6775_v4 = vld [vmem:[%s12663_s3 + $0x100] sm:$0xf]  ;;  %v9767_v7 = vld [vmem:[%s12663_s3 + $0x10c] sm:$0xf0]  ;;  %v6920_v12 = vor.u32 %v9803_v2, %v6919_v1  ;;  %v6857_v43 = vld [vmem:[%s12663_s3 + $0x1b0] sm:$0xf0] }
  0x37   :  { %v7047_v5 = vld [vmem:[%s12663_s3 + $0x320] sm:$0xf]  ;;  %1079 = vmatpush.bf16.msrb.mxu2 %v6936_v60  ;;  %v9799_v17 = vld [vmem:[%s12663_s3 + $0x20c] sm:$0xf0]  ;;  %v6776_v19 = vor.u32 %v9767_v7, %v6775_v4  ;;  %v9749_v47 = vld [vmem:[%s12663_s3 + $0x84] sm:$0xf]  ;;  %v6860_v50 = vor.u32 %v9785_v42, %v6857_v43 }
  0x38   :  { %1092 = vmatpush.bf16.msrb.mxu3 %v7064_v63  ;;  %v7048_v14 = vor.u32 %v9835_v6, %v7047_v5  ;;  %v6903_v16 = vld [vmem:[%s12663_s3 + $0x200] sm:$0xf]  ;;  %v9831_v21 = vld [vmem:[%s12663_s3 + $0x30c] sm:$0xf0]  ;;  %v9817_v48 = vld [vmem:[%s12663_s3 + $0x2a4] sm:$0xf] }
  0x39   :  { %1054 = vmatpush.bf16.msrb.mxu0 %v6664_v62  ;;  %v7031_v18 = vld [vmem:[%s12663_s3 + $0x300] sm:$0xf]  ;;  %v6904_v30 = vor.u32 %v9799_v17, %v6903_v16  ;;  %v6985_v49 = vld [vmem:[%s12663_s3 + $0x2b0] sm:$0xf0]  ;;  %v9849_v52 = vld [vmem:[%s12663_s3 + $0x3a4] sm:$0xf] }
  0x3a   :  { %1067 = vmatpush.bf16.msrb.mxu1 %v6792_v3  ;;  %v7032_v31 = vor.u32 %v9831_v21, %v7031_v18  ;;  %v6713_v51 = vld [vmem:[%s12663_s3 + $0x90] sm:$0xf0]  ;;  %v9781_v54 = vld [vmem:[%s12663_s3 + $0x184] sm:$0xf]  ;;  %v6988_v56 = vor.u32 %v9817_v48, %v6985_v49 }
  0x3b   :  { %1080 = vmatpush.bf16.msrb.mxu2 %v6920_v12  ;;  %v7113_v53 = vld [vmem:[%s12663_s3 + $0x3b0] sm:$0xf0]  ;;  %v6716_v57 = vor.u32 %v9749_v47, %v6713_v51  ;;  %v9745_v59 = vld [vmem:[%s12663_s3 + $0x64] sm:$0xf] }
  0x3c   :  { %1093 = vmatpush.bf16.msrb.mxu3 %v7048_v14  ;;  %v6841_v55 = vld [vmem:[%s12663_s3 + $0x190] sm:$0xf0]  ;;  %v7116_v58 = vor.u32 %v9849_v52, %v7113_v53  ;;  %v9813_v60 = vld [vmem:[%s12663_s3 + $0x284] sm:$0xf] }
  0x3d   :  { %1055 = vmatpush.bf16.msrb.mxu0 %v6648_v13  ;;  %v6969_v61 = vld [vmem:[%s12663_s3 + $0x290] sm:$0xf0]  ;;  %v6844_v62 = vor.u32 %v9781_v54, %v6841_v55  ;;  %v9845_v0 = vld [vmem:[%s12663_s3 + $0x384] sm:$0xf] }
  0x3e   :  { %1068 = vmatpush.bf16.msrb.mxu1 %v6776_v19  ;;  %v6697_v63 = vld [vmem:[%s12663_s3 + $0x70] sm:$0xf0]  ;;  %v9777_v2 = vld [vmem:[%s12663_s3 + $0x164] sm:$0xf]  ;;  %v6972_v4 = vor.u32 %v9813_v60, %v6969_v61  ;;  %v9796_v60 = vld [vmem:[%s12663_s3 + $0x1f4] sm:$0xf0] }
  0x3f   :  { %1081 = vmatpush.bf16.msrb.mxu2 %v6904_v30  ;;  %v7097_v1 = vld [vmem:[%s12663_s3 + $0x390] sm:$0xf0]  ;;  %v6700_v5 = vor.u32 %v9745_v59, %v6697_v63  ;;  %v9741_v8 = vld [vmem:[%s12663_s3 + $0x44] sm:$0xf]  ;;  %v6895_v59 = vld [vmem:[%s12663_s3 + $0x1e8] sm:$0xf] }
  0x40   :  { %1094 = vmatpush.bf16.msrb.mxu3 %v7032_v31  ;;  %v6825_v3 = vld [vmem:[%s12663_s3 + $0x170] sm:$0xf0]  ;;  %v7100_v6 = vor.u32 %v9845_v0, %v7097_v1  ;;  %v9773_v10 = vld [vmem:[%s12663_s3 + $0x144] sm:$0xf] }
  0x41   :  { %1100 = vmatpush.bf16.msra.mxu0 %v6764_v20  ;;  %v6828_v7 = vor.u32 %v9777_v2, %v6825_v3  ;;  %v6681_v9 = vld [vmem:[%s12663_s3 + $0x50] sm:$0xf0]  ;;  %v9809_v14 = vld [vmem:[%s12663_s3 + $0x264] sm:$0xf]  ;;  %v6896_v3 = vor.u32 %v9796_v60, %v6895_v59 }
  0x42   :  { %1113 = vmatpush.bf16.msra.mxu1 %v6892_v24  ;;  %v6809_v11 = vld [vmem:[%s12663_s3 + $0x150] sm:$0xf0]  ;;  %v6684_v12 = vor.u32 %v9741_v8, %v6681_v9  ;;  %v9841_v16 = vld [vmem:[%s12663_s3 + $0x364] sm:$0xf]  ;;  %v9792_v8 = vld [vmem:[%s12663_s3 + $0x1d4] sm:$0xf0] }
  0x43   :  { %1126 = vmatpush.bf16.msra.mxu2 %v7020_v32  ;;  %v6812_v13 = vor.u32 %v9773_v10, %v6809_v11  ;;  %v6953_v15 = vld [vmem:[%s12663_s3 + $0x270] sm:$0xf0]  ;;  %v9737_v20 = vld [vmem:[%s12663_s3 + $0x24] sm:$0xf] }
  0x44   :  { %1139 = vmatpush.bf16.msra.mxu3 %v7148_v35  ;;  %v6956_v17 = vor.u32 %v9809_v14, %v6953_v15  ;;  %v7081_v18 = vld [vmem:[%s12663_s3 + $0x370] sm:$0xf0]  ;;  %v9769_v23 = vld [vmem:[%s12663_s3 + $0x124] sm:$0xf]  ;;  %v7023_v14 = vld [vmem:[%s12663_s3 + $0x2e8] sm:$0xf] }
  0x45   :  { %1101 = vmatpush.bf16.msra.mxu0 %v6748_v34  ;;  %v7084_v19 = vor.u32 %v9841_v16, %v7081_v18  ;;  %v6665_v21 = vld [vmem:[%s12663_s3 + $0x30] sm:$0xf0]  ;;  %v9805_v26 = vld [vmem:[%s12663_s3 + $0x244] sm:$0xf]  ;;  %v9828_v15 = vld [vmem:[%s12663_s3 + $0x2f4] sm:$0xf0] }
  0x46   :  { %1114 = vmatpush.bf16.msra.mxu1 %v6876_v38  ;;  %v6668_v22 = vor.u32 %v9737_v20, %v6665_v21  ;;  %v6793_v24 = vld [vmem:[%s12663_s3 + $0x130] sm:$0xf0]  ;;  %v9837_v28 = vld [vmem:[%s12663_s3 + $0x344] sm:$0xf]  ;;  %v7151_v16 = vld [vmem:[%s12663_s3 + $0x3e8] sm:$0xf] }
  0x47   :  { %1127 = vmatpush.bf16.msra.mxu2 %v7004_v44  ;;  %v6796_v25 = vor.u32 %v9769_v23, %v6793_v24  ;;  %v6937_v27 = vld [vmem:[%s12663_s3 + $0x250] sm:$0xf0]  ;;  %v9733_v32 = vld [vmem:[%s12663_s3 + $0x4] sm:$0xf]  ;;  %v9860_v20 = vld [vmem:[%s12663_s3 + $0x3f4] sm:$0xf0] }
  0x48   :  { %1140 = vmatpush.bf16.msra.mxu3 %v7132_v46  ;;  %v6940_v29 = vor.u32 %v9805_v26, %v6937_v27  ;;  %v7065_v30 = vld [vmem:[%s12663_s3 + $0x350] sm:$0xf0]  ;;  %v9765_v34 = vld [vmem:[%s12663_s3 + $0x104] sm:$0xf]  ;;  %v6735_v21 = vld [vmem:[%s12663_s3 + $0xa8] sm:$0xf]  ;;  %v7024_v27 = vor.u32 %v9828_v15, %v7023_v14 }
  0x49   :  { %1102 = vmatpush.bf16.msra.mxu0 %v6732_v45  ;;  %v7068_v31 = vor.u32 %v9837_v28, %v7065_v30  ;;  %v6649_v33 = vld [vmem:[%s12663_s3 + $0x10] sm:$0xf0]  ;;  %v9801_v38 = vld [vmem:[%s12663_s3 + $0x224] sm:$0xf]  ;;  %v6863_v24 = vld [vmem:[%s12663_s3 + $0x1a8] sm:$0xf] }
  0x4a   :  { %1115 = vmatpush.bf16.msra.mxu1 %v6860_v50  ;;  %v6652_v35 = vor.u32 %v9733_v32, %v6649_v33  ;;  %v6777_v36 = vld [vmem:[%s12663_s3 + $0x110] sm:$0xf0]  ;;  %v9833_v41 = vld [vmem:[%s12663_s3 + $0x324] sm:$0xf]  ;;  %v116_v50 = vld [vmem:[%s12662_s2] sm:$0xf] }
  0x4b   :  { %1128 = vmatpush.bf16.msra.mxu2 %v6988_v56  ;;  %v6780_v37 = vor.u32 %v9765_v34, %v6777_v36  ;;  %v6921_v39 = vld [vmem:[%s12663_s3 + $0x230] sm:$0xf0]  ;;  %v9797_v44 = vld [vmem:[%s12663_s3 + $0x204] sm:$0xf]  ;;  %v118_v51 = vperm.slane %v116_v50, 0  ;;  %v119_v52 = vperm.slane %v116_v50, 1 }
  0x4c   :  { %1141 = vmatpush.bf16.msra.mxu3 %v7116_v58  ;;  %v6924_v40 = vor.u32 %v9801_v38, %v6921_v39  ;;  %v7049_v42 = vld [vmem:[%s12663_s3 + $0x330] sm:$0xf0]  ;;  %v9829_v47 = vld [vmem:[%s12663_s3 + $0x304] sm:$0xf]  ;;  %v6767_v56 = vld [vmem:[%s12663_s3 + $0xe8] sm:$0xf] }
  0x4d   :  { %1103 = vmatpush.bf16.msra.mxu0 %v6716_v57  ;;  %v7052_v43 = vor.u32 %v9833_v41, %v7049_v42  ;;  %v6905_v45 = vld [vmem:[%s12663_s3 + $0x210] sm:$0xf0]  ;;  %v9764_v57 = vld [vmem:[%s12663_s3 + $0xf4] sm:$0xf0]  ;;  %v120_v63 = vperm.slane %v116_v50, 2  ;;  %v121_v2 = vperm.slane %v116_v50, 3 }
  0x4e   :  { %1116 = vmatpush.bf16.msra.mxu1 %v6844_v62  ;;  %v6908_v46 = vor.u32 %v9797_v44, %v6905_v45  ;;  %v7033_v48 = vld [vmem:[%s12663_s3 + $0x310] sm:$0xf0]  ;;  %v6768_v0 = vor.u32 %v9764_v57, %v6767_v56  ;;  %v9824_v32 = vld [vmem:[%s12663_s3 + $0x2d4] sm:$0xf0]  ;;  %v7135_v33 = vld [vmem:[%s12663_s3 + $0x3c8] sm:$0xf] }
  0x4f   :  { %1129 = vmatpush.bf16.msra.mxu2 %v6972_v4  ;;  %v7036_v49 = vor.u32 %v9829_v47, %v7033_v48  ;;  %v6751_v4 = vld [vmem:[%s12663_s3 + $0xc8] sm:$0xf]  ;;  %v9856_v36 = vld [vmem:[%s12663_s3 + $0x3d4] sm:$0xf0]  ;;  %s10628_s2 = smov 26  }
  0x50   :  { %1142 = vmatpush.bf16.msra.mxu3 %v7100_v6  ;;  %v9752_v38 = vld [vmem:[%s12663_s3 + $0x94] sm:$0xf0]  ;;  %v6847_v39 = vld [vmem:[%s12663_s3 + $0x188] sm:$0xf]  ;;  %v7136_v44 = vor.u32 %v9856_v36, %v7135_v33  ;;  %v9794_v33 = vld [vmem:[%s12663_s3 + $0x1ec] sm:$0xf] }
  0x51   :  { %1104 = vmatpush.bf16.msra.mxu0 %v6700_v5  ;;  %v9760_v5 = vld [vmem:[%s12663_s3 + $0xd4] sm:$0xf0]  ;;  %v6975_v57 = vld [vmem:[%s12663_s3 + $0x288] sm:$0xf] }
  0x52   :  { %1117 = vmatpush.bf16.msra.mxu1 %v6828_v7  ;;  %v6879_v7 = vld [vmem:[%s12663_s3 + $0x1c8] sm:$0xf]  ;;  %v9820_v47 = vld [vmem:[%s12663_s3 + $0x2b4] sm:$0xf0] }
  0x53   :  { %1130 = vmatpush.bf16.msra.mxu2 %v6956_v17  ;;  %v9852_v50 = vld [vmem:[%s12663_s3 + $0x3b4] sm:$0xf0]  ;;  %v6799_v15 = vld [vmem:[%s12663_s3 + $0x128] sm:$0xf] }
  0x54   :  { %1143 = vmatpush.bf16.msra.mxu3 %v7084_v19  ;;  %v6880_v19 = vor.u32 %v9792_v8, %v6879_v7  ;;  %v6959_v7 = vld [vmem:[%s12663_s3 + $0x268] sm:$0xf]  ;;  %v9812_v8 = vld [vmem:[%s12663_s3 + $0x274] sm:$0xf0] }
  0x55   :  { %1105 = vmatpush.bf16.msra.mxu0 %v6684_v12  ;;  %v9740_v14 = vld [vmem:[%s12663_s3 + $0x34] sm:$0xf0] }
  0x56   :  { %1118 = vmatpush.bf16.msra.mxu1 %v6812_v13  ;;  %v6752_v13 = vor.u32 %v9760_v5, %v6751_v4 }
  0x57   :  { %1131 = vmatpush.bf16.msra.mxu2 %v6940_v29  ;;  %v7152_v29 = vor.u32 %v9860_v20, %v7151_v16  ;;  %v9772_v16 = vld [vmem:[%s12663_s3 + $0x134] sm:$0xf0] }
  0x58   :  { %1144 = vmatpush.bf16.msra.mxu3 %v7068_v31  ;;  %v7007_v31 = vld [vmem:[%s12663_s3 + $0x2c8] sm:$0xf]  ;;  %v9808_v20 = vld [vmem:[%s12663_s3 + $0x254] sm:$0xf0] }
  0x59   :  { %1106 = vmatpush.bf16.msra.mxu0 %v6668_v22  ;;  %v9756_v22 = vld [vmem:[%s12663_s3 + $0xb4] sm:$0xf0]  ;;  %v7008_v42 = vor.u32 %v9824_v32, %v7007_v31  ;;  %v6769_v32 = vld [vmem:[%s12663_s3 + $0xf8] sm:$0xf0] }
  0x5a   :  { %1119 = vmatpush.bf16.msra.mxu1 %v6796_v25  ;;  %v9788_v25 = vld [vmem:[%s12663_s3 + $0x1b4] sm:$0xf0]  ;;  %v6736_v30 = vor.u32 %v9756_v22, %v6735_v21  ;;  %v7071_v21 = vld [vmem:[%s12663_s3 + $0x348] sm:$0xf] }
  0x5b   :  { %1132 = vmatpush.bf16.msra.mxu2 %v6924_v40  ;;  %v9784_v40 = vld [vmem:[%s12663_s3 + $0x194] sm:$0xf0] }
  0x5c   :  { %1145 = vmatpush.bf16.msra.mxu3 %v7052_v43  ;;  %v6848_v48 = vor.u32 %v9784_v40, %v6847_v39 }
  0x5d   :  { %1107 = vmatpush.bf16.msra.mxu0 %v6652_v35  ;;  %v6864_v35 = vor.u32 %v9788_v25, %v6863_v24  ;;  %v9840_v24 = vld [vmem:[%s12663_s3 + $0x354] sm:$0xf0]  ;;  %v6655_v25 = vld [vmem:[%s12663_s3 + $0x8] sm:$0xf] }
  0x5e   :  { %1120 = vmatpush.bf16.msra.mxu1 %v6780_v37  ;;  %v6719_v37 = vld [vmem:[%s12663_s3 + $0x88] sm:$0xf]  ;;  %v7072_v36 = vor.u32 %v9840_v24, %v7071_v21  ;;  %v7121_v24 = vld [vmem:[%s12663_s3 + $0x3b8] sm:$0xf0] }
  0x5f   :  { %1133 = vmatpush.bf16.msra.mxu2 %v6908_v46  ;;  %v6720_v45 = vor.u32 %v9752_v38, %v6719_v37  ;;  %v6991_v46 = vld [vmem:[%s12663_s3 + $0x2a8] sm:$0xf]  ;;  %v9804_v38 = vld [vmem:[%s12663_s3 + $0x234] sm:$0xf0] }
  0x60   :  { %1146 = vmatpush.bf16.msra.mxu3 %v7036_v49  ;;  %v7119_v49 = vld [vmem:[%s12663_s3 + $0x3a8] sm:$0xf] }
  0x61   :  { %v7120_v56 = vor.u32 %v9852_v50, %v7119_v49  ;;  %v6927_v37 = vld [vmem:[%s12663_s3 + $0x228] sm:$0xf]  ;;  %v6881_v49 = vld [vmem:[%s12663_s3 + $0x1d8] sm:$0xf0] }
  0x9d   :  { %v219_v53 = vpop.f32.mrf.mxu0 }
  0x9e   :  { %v220_v54 = vadd.f32 %v219_v53, %v118_v51  ;;  %v232_v55 = vpop.f32.mrf.mxu1  ;;  %v6703_v51 = vld [vmem:[%s12663_s3 + $0x68] sm:$0xf] }
  0x9f   :  { %v233_v58 = vadd.f32 %v232_v55, %v119_v52  ;;  %v9748_v52 = vld [vmem:[%s12663_s3 + $0x74] sm:$0xf0]  ;;  %v6831_v53 = vld [vmem:[%s12663_s3 + $0x168] sm:$0xf]  ;;  %v6992_v55 = vor.u32 %v9820_v47, %v6991_v46  ;;  %v6928_v46 = vor.u32 %v9804_v38, %v6927_v37  ;;  %v6753_v47 = vld [vmem:[%s12663_s3 + $0xd8] sm:$0xf0] }
  0xa0   :  { %v262_v61 = vmax.f32 %v220_v54, 0.0  ;;  %v9780_v54 = vld [vmem:[%s12663_s3 + $0x174] sm:$0xf0]  ;;  %v6704_v59 = vor.u32 %v9748_v52, %v6703_v51  ;;  %v6911_v51 = vld [vmem:[%s12663_s3 + $0x208] sm:$0xf] }
  0xa1   :  { %v263_v62 = vmax.f32 %v233_v58, 0.0  ;;  %v9816_v58 = vld [vmem:[%s12663_s3 + $0x294] sm:$0xf0]  ;;  %v6832_v60 = vor.u32 %v9780_v54, %v6831_v53  ;;  %v7039_v53 = vld [vmem:[%s12663_s3 + $0x308] sm:$0xf] }
  0xa2   :  { %v11228_v1 = vpack.c.bf16 %v262_v61, %v262_v61  ;;  %v7103_v61 = vld [vmem:[%s12663_s3 + $0x388] sm:$0xf]  ;;  %v6976_v4 = vor.u32 %v9816_v58, %v6975_v57  ;;  %v9800_v52 = vld [vmem:[%s12663_s3 + $0x214] sm:$0xf0]  ;;  %v9846_v37 = vld [vmem:[%s12663_s3 + $0x38c] sm:$0xf] }
  0xa3   :  { %v11236_v6 = vpack.c.bf16 %v263_v62, %v263_v62  ;;  %v9848_v62 = vld [vmem:[%s12663_s3 + $0x394] sm:$0xf0]  ;;  %v7105_v38 = vld [vmem:[%s12663_s3 + $0x398] sm:$0xf0] }
  0xa4   :  { %1056 = vmatmul.bf16.vlgmr.msrb.gmra.mxu0 %v11228_v1  ;;  %v7104_v5 = vor.u32 %v9848_v62, %v7103_v61  ;;  %v9832_v54 = vld [vmem:[%s12663_s3 + $0x314] sm:$0xf0]  ;;  %v9754_v61 = vld [vmem:[%s12663_s3 + $0xac] sm:$0xf]  ;;  %v6912_v62 = vor.u32 %v9800_v52, %v6911_v51  ;;  %v6673_v52 = vld [vmem:[%s12663_s3 + $0x38] sm:$0xf0] }
  0xa5   :  { %v245_v9 = vpop.f32.mrf.mxu2  ;;  %1069 = vmatmul.bf16.vlgmr.msrb.gmra.mxu1 %v11236_v6  ;;  %1152 = vmatpush.bf16.msrb.mxu0 %v6768_v0  ;;  %v221_v12 = vpop.f32.mrf.mxu0  ;;  %v9744_v0 = vld [vmem:[%s12663_s3 + $0x54] sm:$0xf0]  ;;  %v9738_v51 = vld [vmem:[%s12663_s3 + $0x2c] sm:$0xf] }
  0xa6   :  { %v246_v10 = vadd.f32 %v245_v9, %v120_v63  ;;  %v258_v11 = vpop.f32.mrf.mxu3  ;;  %1165 = vmatpush.bf16.msrb.mxu1 %v6896_v3  ;;  %v234_v18 = vpop.f32.mrf.mxu1  ;;  %v6687_v63 = vld [vmem:[%s12663_s3 + $0x48] sm:$0xf]  ;;  %v9776_v3 = vld [vmem:[%s12663_s3 + $0x154] sm:$0xf0] }
  0xa7   :  { %v259_v17 = vadd.f32 %v258_v11, %v121_v2  ;;  %v6815_v2 = vld [vmem:[%s12663_s3 + $0x148] sm:$0xf]  ;;  %v6688_v9 = vor.u32 %v9744_v0, %v6687_v63  ;;  %v9844_v12 = vld [vmem:[%s12663_s3 + $0x374] sm:$0xf0]  ;;  %v6737_v63 = vld [vmem:[%s12663_s3 + $0xb8] sm:$0xf0] }
  0xa8   :  { %v264_v23 = vmax.f32 %v246_v10, 0.0  ;;  %v6816_v10 = vor.u32 %v9776_v3, %v6815_v2  ;;  %v7087_v11 = vld [vmem:[%s12663_s3 + $0x368] sm:$0xf]  ;;  %v9786_v0 = vld [vmem:[%s12663_s3 + $0x1ac] sm:$0xf]  ;;  %v7040_v3 = vor.u32 %v9832_v54, %v7039_v53 }
  0xa9   :  { %v265_v26 = vmax.f32 %v259_v17, 0.0  ;;  %1153 = vmatpush.bf16.msrb.mxu0 %v6752_v13  ;;  %v6671_v13 = vld [vmem:[%s12663_s3 + $0x28] sm:$0xf]  ;;  %v6960_v17 = vor.u32 %v9812_v8, %v6959_v7  ;;  %v7088_v18 = vor.u32 %v9844_v12, %v7087_v11  ;;  %v6865_v2 = vld [vmem:[%s12663_s3 + $0x1b8] sm:$0xf0] }
  0xaa   :  { %v11270_v28 = vpack.c.bf16 %v264_v23, %v264_v23  ;;  %1166 = vmatpush.bf16.msrb.mxu1 %v6880_v19  ;;  %v6943_v19 = vld [vmem:[%s12663_s3 + $0x248] sm:$0xf]  ;;  %v6672_v22 = vor.u32 %v9740_v14, %v6671_v13  ;;  %v6800_v23 = vor.u32 %v9772_v16, %v6799_v15  ;;  %v9822_v7 = vld [vmem:[%s12663_s3 + $0x2cc] sm:$0xf]  ;;  %v7009_v8 = vld [vmem:[%s12663_s3 + $0x2d8] sm:$0xf0] }
  0xab   :  { %v11281_v34 = vpack.c.bf16 %v265_v26, %v265_v26  ;;  %v9736_v26 = vld [vmem:[%s12663_s3 + $0x14] sm:$0xf0]  ;;  %v6944_v31 = vor.u32 %v9808_v20, %v6943_v19  ;;  %v9854_v11 = vld [vmem:[%s12663_s3 + $0x3cc] sm:$0xf]  ;;  %v7137_v12 = vld [vmem:[%s12663_s3 + $0x3d8] sm:$0xf0] }
  0xac   :  { %1082 = vmatmul.bf16.vlgmr.msrb.gmra.mxu2 %v11270_v28  ;;  %v6656_v39 = vor.u32 %v9736_v26, %v6655_v25  ;;  %v9750_v13 = vld [vmem:[%s12663_s3 + $0x8c] sm:$0xf]  ;;  %v6721_v14 = vld [vmem:[%s12663_s3 + $0x98] sm:$0xf0] }
  0xad   :  { %1095 = vmatmul.bf16.vlgmr.msrb.gmra.mxu3 %v11281_v34  ;;  %1178 = vmatpush.bf16.msrb.mxu2 %v7024_v27  ;;  %v247_v41 = vpop.f32.mrf.mxu2  ;;  %v6783_v27 = vld [vmem:[%s12663_s3 + $0x108] sm:$0xf]  ;;  %v9782_v15 = vld [vmem:[%s12663_s3 + $0x18c] sm:$0xf]  ;;  %v6849_v16 = vld [vmem:[%s12663_s3 + $0x198] sm:$0xf0]  ;;  %v6724_v21 = vor.u32 %v9750_v13, %v6721_v14 }
  0xae   :  { %1191 = vmatpush.bf16.msrb.mxu3 %v7152_v29  ;;  %v260_v43 = vpop.f32.mrf.mxu3  ;;  %1154 = vmatpush.bf16.msrb.mxu0 %v6736_v30  ;;  %v9768_v29 = vld [vmem:[%s12663_s3 + $0x114] sm:$0xf0]  ;;  %v9762_v30 = vld [vmem:[%s12663_s3 + $0xec] sm:$0xf]  ;;  %v7055_v41 = vld [vmem:[%s12663_s3 + $0x328] sm:$0xf] }
  0xaf   :  { %1167 = vmatpush.bf16.msrb.mxu1 %v6864_v35  ;;  %v6897_v35 = vld [vmem:[%s12663_s3 + $0x1f8] sm:$0xf0]  ;;  %v6784_v40 = vor.u32 %v9768_v29, %v6783_v27  ;;  %v6772_v43 = vor.u32 %v9762_v30, %v6769_v32  ;;  %v9818_v19 = vld [vmem:[%s12663_s3 + $0x2ac] sm:$0xf] }
  0xb0   :  { %v6993_v20 = vld [vmem:[%s12663_s3 + $0x2b8] sm:$0xf0]  ;;  %v9746_v25 = vld [vmem:[%s12663_s3 + $0x6c] sm:$0xf] }
  0xb1   :  { %1179 = vmatpush.bf16.msrb.mxu2 %v7008_v42  ;;  %v9836_v42 = vld [vmem:[%s12663_s3 + $0x334] sm:$0xf0]  ;;  %v6705_v26 = vld [vmem:[%s12663_s3 + $0x78] sm:$0xf0]  ;;  %v9778_v27 = vld [vmem:[%s12663_s3 + $0x16c] sm:$0xf]  ;;  %v6996_v30 = vor.u32 %v9818_v19, %v6993_v20 }
  0xb2   :  { %1192 = vmatpush.bf16.msrb.mxu3 %v7136_v44  ;;  %1155 = vmatpush.bf16.msrb.mxu0 %v6720_v45  ;;  %v6900_v44 = vor.u32 %v9794_v33, %v6897_v35  ;;  %v9758_v45 = vld [vmem:[%s12663_s3 + $0xcc] sm:$0xf]  ;;  %v7056_v50 = vor.u32 %v9836_v42, %v7055_v41  ;;  %v6833_v29 = vld [vmem:[%s12663_s3 + $0x178] sm:$0xf0]  ;;  %v6708_v35 = vor.u32 %v9746_v25, %v6705_v26 }
  0xb3   :  { %1168 = vmatpush.bf16.msrb.mxu1 %v6848_v48  ;;  %v9790_v48 = vld [vmem:[%s12663_s3 + $0x1cc] sm:$0xf]  ;;  %v6756_v57 = vor.u32 %v9758_v45, %v6753_v47  ;;  %v6977_v33 = vld [vmem:[%s12663_s3 + $0x298] sm:$0xf0] }
  0xb4   :  { %1108 = vmatmul.bf16.vlgmr.msra.gmra.mxu0 %v11228_v1  ;;  %v6884_v58 = vor.u32 %v9790_v48, %v6881_v49  ;;  %v9814_v32 = vld [vmem:[%s12663_s3 + $0x28c] sm:$0xf]  ;;  %v6817_v42 = vld [vmem:[%s12663_s3 + $0x158] sm:$0xf0] }
  0xb5   :  { %1180 = vmatpush.bf16.msrb.mxu2 %v6992_v55  ;;  %1121 = vmatmul.bf16.vlgmr.msra.gmra.mxu1 %v11236_v6  ;;  %v9826_v55 = vld [vmem:[%s12663_s3 + $0x2ec] sm:$0xf]  ;;  %v6801_v54 = vld [vmem:[%s12663_s3 + $0x138] sm:$0xf0] }
  0xb6   :  { %1193 = vmatpush.bf16.msrb.mxu3 %v7120_v56  ;;  %1156 = vmatpush.bf16.msrb.mxu0 %v6704_v59  ;;  %v7025_v56 = vld [vmem:[%s12663_s3 + $0x2f8] sm:$0xf0]  ;;  %v9858_v59 = vld [vmem:[%s12663_s3 + $0x3ec] sm:$0xf] }
  0xb7   :  { %1169 = vmatpush.bf16.msrb.mxu1 %v6832_v60  ;;  %v7153_v60 = vld [vmem:[%s12663_s3 + $0x3f8] sm:$0xf0]  ;;  %v9774_v41 = vld [vmem:[%s12663_s3 + $0x14c] sm:$0xf] }
  0xb8   :  { %v9810_v45 = vld [vmem:[%s12663_s3 + $0x26c] sm:$0xf]  ;;  %v6820_v48 = vor.u32 %v9774_v41, %v6817_v42  ;;  %v6913_v26 = vld [vmem:[%s12663_s3 + $0x218] sm:$0xf0]  ;;  %v7511_v42 = vld [vmem:[#allocation2 + $0x2c0] sm:$0xf] }
  0xb9   :  { %1181 = vmatpush.bf16.msrb.mxu2 %v6976_v4  ;;  %v7028_v4 = vor.u32 %v9826_v55, %v7025_v56  ;;  %v9842_v49 = vld [vmem:[%s12663_s3 + $0x36c] sm:$0xf] }
  0xba   :  { %1194 = vmatpush.bf16.msrb.mxu3 %v7104_v5  ;;  %1157 = vmatpush.bf16.msrb.mxu0 %v6688_v9  ;;  %v7156_v5 = vor.u32 %v9858_v59, %v7153_v60  ;;  %v6740_v9 = vor.u32 %v9754_v61, %v6737_v63  ;;  %v9770_v53 = vld [vmem:[%s12663_s3 + $0x12c] sm:$0xf]  ;;  %v6676_v60 = vor.u32 %v9738_v51, %v6673_v52  ;;  %v9875_v51 = vld [vmem:[#allocation2 + $0x6c] sm:$0xf0] }
  0xbb   :  { %1170 = vmatpush.bf16.msrb.mxu1 %v6816_v10  ;;  %v6868_v10 = vor.u32 %v9786_v0, %v6865_v2  ;;  %v9838_v59 = vld [vmem:[%s12663_s3 + $0x34c] sm:$0xf]  ;;  %v6804_v61 = vor.u32 %v9770_v53, %v6801_v54  ;;  %v6657_v0 = vld [vmem:[%s12663_s3 + $0x18] sm:$0xf0]  ;;  %v7335_v53 = vld [vmem:[#allocation2 + $0x160] sm:$0xf] }
  0xbc   :  { %1134 = vmatmul.bf16.vlgmr.msra.gmra.mxu2 %v11270_v28  ;;  %v9734_v63 = vld [vmem:[%s12663_s3 + $0xc] sm:$0xf]  ;;  %v9907_v54 = vld [vmem:[#allocation2 + $0x16c] sm:$0xf0] }
  0xbd   :  { %1147 = vmatmul.bf16.vlgmr.msra.gmra.mxu3 %v11281_v34  ;;  %1182 = vmatpush.bf16.msrb.mxu2 %v6960_v17  ;;  %v7012_v17 = vor.u32 %v9822_v7, %v7009_v8  ;;  %v9766_v2 = vld [vmem:[%s12663_s3 + $0x10c] sm:$0xf]  ;;  %v9891_v7 = vld [vmem:[#allocation2 + $0xec] sm:$0xf0]  ;;  %v7399_v8 = vld [vmem:[#allocation2 + $0x1e0] sm:$0xf]  ;;  %v6660_v13 = vor.u32 %v9734_v63, %v6657_v0 }
  0xbe   :  { %1195 = vmatpush.bf16.msrb.mxu3 %v7088_v18  ;;  %1158 = vmatpush.bf16.msrb.mxu0 %v6672_v22  ;;  %v7140_v18 = vor.u32 %v9854_v11, %v7137_v12  ;;  %v6852_v22 = vor.u32 %v9782_v15, %v6849_v16  ;;  %v9802_v11 = vld [vmem:[%s12663_s3 + $0x22c] sm:$0xf]  ;;  %v6929_v12 = vld [vmem:[%s12663_s3 + $0x238] sm:$0xf0]  ;;  %v7159_v0 = vld [vmem:[#allocation2] sm:$0xf] }
  0xbf   :  { %1171 = vmatpush.bf16.msrb.mxu1 %v6800_v23  ;;  %v9850_v23 = vld [vmem:[%s12663_s3 + $0x3ac] sm:$0xf]  ;;  %v7057_v16 = vld [vmem:[%s12663_s3 + $0x338] sm:$0xf0]  ;;  %v6932_v20 = vor.u32 %v9802_v11, %v6929_v12  ;;  %v9881_v11 = vld [vmem:[#allocation2 + $0xa4] sm:$0xf] }
  0xc0   :  { %v9834_v15 = vld [vmem:[%s12663_s3 + $0x32c] sm:$0xf]  ;;  %v7241_v12 = vld [vmem:[#allocation2 + $0xb0] sm:$0xf0] }
  0xc1   :  { %1183 = vmatpush.bf16.msrb.mxu2 %v6944_v31  ;;  %v7124_v31 = vor.u32 %v9850_v23, %v7121_v24  ;;  %v9919_v23 = vld [vmem:[#allocation2 + $0x1cc] sm:$0xf0]  ;;  %v7060_v24 = vor.u32 %v9834_v15, %v7057_v16  ;;  %v9798_v25 = vld [vmem:[%s12663_s3 + $0x20c] sm:$0xf]  ;;  %v7495_v16 = vld [vmem:[#allocation2 + $0x2a0] sm:$0xf] }
  0xc2   :  { %1196 = vmatpush.bf16.msrb.mxu3 %v7072_v36  ;;  %1159 = vmatpush.bf16.msrb.mxu0 %v6656_v39  ;;  %v6836_v36 = vor.u32 %v9778_v27, %v6833_v29  ;;  %v9742_v39 = vld [vmem:[%s12663_s3 + $0x4c] sm:$0xf]  ;;  %v7041_v29 = vld [vmem:[%s12663_s3 + $0x318] sm:$0xf0]  ;;  %v9899_v15 = vld [vmem:[#allocation2 + $0x12c] sm:$0xf0] }
  0xc3   :  { %1172 = vmatpush.bf16.msrb.mxu1 %v6784_v40  ;;  %v6689_v40 = vld [vmem:[%s12663_s3 + $0x58] sm:$0xf0]  ;;  %v9830_v27 = vld [vmem:[%s12663_s3 + $0x30c] sm:$0xf] }
  0xc4   :  { %v6692_v47 = vor.u32 %v9742_v39, %v6689_v40  ;;  %v7367_v39 = vld [vmem:[#allocation2 + $0x1a0] sm:$0xf]  ;;  %v9915_v40 = vld [vmem:[#allocation2 + $0x1ac] sm:$0xf0] }
  0xc5   :  { %1184 = vmatpush.bf16.msrb.mxu2 %v6928_v46  ;;  %1160 = vmatmul.bf16.vlgmr.msrb.gmra.mxu0 %v11228_v1  ;;  %v6961_v46 = vld [vmem:[%s12663_s3 + $0x278] sm:$0xf0] }
  0xc6   :  { %1204 = vmatpush.bf16.msra.mxu0 %v6772_v43  ;;  %1197 = vmatpush.bf16.msrb.mxu3 %v7056_v50  ;;  %v6980_v43 = vor.u32 %v9814_v32, %v6977_v33  ;;  %v7089_v50 = vld [vmem:[%s12663_s3 + $0x378] sm:$0xf0]  ;;  %v6964_v55 = vor.u32 %v9810_v45, %v6961_v46  ;;  %v7223_v45 = vld [vmem:[#allocation2 + $0x80] sm:$0xf]  ;;  %v9879_v46 = vld [vmem:[#allocation2 + $0x8c] sm:$0xf0] }
  0xc7   :  { %1217 = vmatpush.bf16.msra.mxu1 %v6900_v44  ;;  %v7108_v44 = vor.u32 %v9846_v37, %v7105_v38  ;;  %v7092_v56 = vor.u32 %v9842_v49, %v7089_v50  ;;  %v9883_v37 = vld [vmem:[#allocation2 + $0xac] sm:$0xf0]  ;;  %v7044_v38 = vor.u32 %v9830_v27, %v7041_v29  ;;  %v7224_v50 = vor.u32 %v9879_v46, %v7223_v45  ;;  %v7447_v46 = vld [vmem:[#allocation2 + $0x240] sm:$0xf] }
  0xc8   :  { %1173 = vmatmul.bf16.vlgmr.msrb.gmra.mxu1 %v11236_v6  ;;  %v9911_v49 = vld [vmem:[#allocation2 + $0x18c] sm:$0xf0] }
  0xc9   :  { %1185 = vmatpush.bf16.msrb.mxu2 %v6912_v62  ;;  %v7073_v62 = vld [vmem:[%s12663_s3 + $0x358] sm:$0xf0]  ;;  %v9943_v27 = vld [vmem:[#allocation2 + $0x28c] sm:$0xf0] }
  0xca   :  { %1205 = vmatpush.bf16.msra.mxu0 %v6756_v57  ;;  %1198 = vmatpush.bf16.msrb.mxu3 %v7040_v3  ;;  %v9806_v57 = vld [vmem:[%s12663_s3 + $0x24c] sm:$0xf]  ;;  %v6785_v3 = vld [vmem:[%s12663_s3 + $0x118] sm:$0xf0] }
  0xcb   :  { %1218 = vmatpush.bf16.msra.mxu1 %v6884_v58  ;;  %v6945_v58 = vld [vmem:[%s12663_s3 + $0x258] sm:$0xf0]  ;;  %v6788_v14 = vor.u32 %v9766_v2, %v6785_v3  ;;  %v9863_v2 = vld [vmem:[#allocation2 + $0xc] sm:$0xf0]  ;;  %v9889_v3 = vld [vmem:[#allocation2 + $0xe4] sm:$0xf] }
  0xcc   :  { %1186 = vmatmul.bf16.vlgmr.msrb.gmra.mxu2 %v11270_v28 }
  0xcd   :  { %1230 = vmatpush.bf16.msra.mxu2 %v7028_v4  ;;  %1199 = vmatmul.bf16.vlgmr.msrb.gmra.mxu3 %v11281_v34  ;;  %v7271_v4 = vld [vmem:[#allocation2 + $0xe0] sm:$0xf] }
  0xce   :  { %1243 = vmatpush.bf16.msra.mxu3 %v7156_v5  ;;  %1206 = vmatpush.bf16.msra.mxu0 %v6740_v9  ;;  %v6948_v5 = vor.u32 %v9806_v57, %v6945_v58  ;;  %v9923_v9 = vld [vmem:[#allocation2 + $0x1ec] sm:$0xf0]  ;;  %v7336_v58 = vor.u32 %v9907_v54, %v7335_v53  ;;  %v7431_v53 = vld [vmem:[#allocation2 + $0x220] sm:$0xf] }
  0xcf   :  { %1219 = vmatpush.bf16.msra.mxu1 %v6868_v10  ;;  %v7076_v10 = vor.u32 %v9838_v59, %v7073_v62  ;;  %v7400_v19 = vor.u32 %v9923_v9, %v7399_v8  ;;  %v9871_v57 = vld [vmem:[#allocation2 + $0x4c] sm:$0xf0]  ;;  %v7319_v59 = vld [vmem:[#allocation2 + $0x140] sm:$0xf]  ;;  %v9885_v8 = vld [vmem:[#allocation2 + $0xc4] sm:$0xf] }
  0xd0   :  { %v9867_v62 = vld [vmem:[#allocation2 + $0x2c] sm:$0xf0]  ;;  %v7257_v9 = vld [vmem:[#allocation2 + $0xd0] sm:$0xf0] }
  0xd1   :  { %1231 = vmatpush.bf16.msra.mxu2 %v7012_v17  ;;  %v7272_v17 = vor.u32 %v9891_v7, %v7271_v4  ;;  %v7273_v4 = vld [vmem:[#allocation2 + $0xf0] sm:$0xf0]  ;;  %v9931_v54 = vld [vmem:[#allocation2 + $0x22c] sm:$0xf0] }
  0xd2   :  { %1244 = vmatpush.bf16.msra.mxu3 %v7140_v18  ;;  %1207 = vmatpush.bf16.msra.mxu0 %v6724_v21  ;;  %v7255_v18 = vld [vmem:[#allocation2 + $0xc0] sm:$0xf]  ;;  %v9887_v21 = vld [vmem:[#allocation2 + $0xcc] sm:$0xf0]  ;;  %v7276_v7 = vor.u32 %v9889_v3, %v7273_v4  ;;  %v7337_v3 = vld [vmem:[#allocation2 + $0x170] sm:$0xf0] }
  0xd3   :  { %1220 = vmatpush.bf16.msra.mxu1 %v6852_v22  ;;  %v7383_v22 = vld [vmem:[#allocation2 + $0x1c0] sm:$0xf]  ;;  %v7256_v32 = vor.u32 %v9887_v21, %v7255_v18  ;;  %v9947_v18 = vld [vmem:[#allocation2 + $0x2ac] sm:$0xf0] }
  0xd4   :  { %v7384_v33 = vor.u32 %v9919_v23, %v7383_v22  ;;  %v7496_v21 = vor.u32 %v9947_v18, %v7495_v16  ;;  %v7287_v23 = vld [vmem:[#allocation2 + $0x100] sm:$0xf] }
  0xd5   :  { %1232 = vmatpush.bf16.msra.mxu2 %v6996_v30  ;;  %v7527_v30 = vld [vmem:[#allocation2 + $0x2e0] sm:$0xf] }
  0xd6   :  { %1245 = vmatpush.bf16.msra.mxu3 %v7124_v31  ;;  %1208 = vmatpush.bf16.msra.mxu0 %v6708_v35  ;;  %v9955_v31 = vld [vmem:[#allocation2 + $0x2ec] sm:$0xf0]  ;;  %v6916_v35 = vor.u32 %v9798_v25, %v6913_v26  ;;  %v7479_v25 = vld [vmem:[#allocation2 + $0x280] sm:$0xf] }
  0xd7   :  { %1221 = vmatpush.bf16.msra.mxu1 %v6836_v36  ;;  %v7239_v36 = vld [vmem:[#allocation2 + $0xa0] sm:$0xf]  ;;  %v7528_v41 = vor.u32 %v9955_v31, %v7527_v30  ;;  %v7480_v29 = vor.u32 %v9943_v27, %v7479_v25  ;;  %v9873_v30 = vld [vmem:[#allocation2 + $0x64] sm:$0xf]  ;;  %v7209_v31 = vld [vmem:[#allocation2 + $0x70] sm:$0xf0] }
  0xd8   :  { %v7305_v25 = vld [vmem:[#allocation2 + $0x130] sm:$0xf0] }
  0xd9   :  { %1233 = vmatpush.bf16.msra.mxu2 %v6980_v43  ;;  %v9951_v43 = vld [vmem:[#allocation2 + $0x2cc] sm:$0xf0] }
  0xda   :  { %1246 = vmatpush.bf16.msra.mxu3 %v7108_v44  ;;  %1209 = vmatpush.bf16.msra.mxu0 %v6692_v47  ;;  %v7240_v44 = vor.u32 %v9883_v37, %v7239_v36  ;;  %v7368_v47 = vor.u32 %v9915_v40, %v7367_v39  ;;  %v7463_v36 = vld [vmem:[#allocation2 + $0x260] sm:$0xf]  ;;  %v9939_v37 = vld [vmem:[#allocation2 + $0x26c] sm:$0xf0]  ;;  %v9869_v40 = vld [vmem:[#allocation2 + $0x44] sm:$0xf] }
  0xdb   :  { %1222 = vmatpush.bf16.msra.mxu1 %v6820_v48  ;;  %v7351_v48 = vld [vmem:[#allocation2 + $0x180] sm:$0xf]  ;;  %v7464_v39 = vor.u32 %v9939_v37, %v7463_v36  ;;  %v9893_v37 = vld [vmem:[#allocation2 + $0x104] sm:$0xf] }
  0xdc   :  { %v7352_v52 = vor.u32 %v9911_v49, %v7351_v48  ;;  %v9865_v49 = vld [vmem:[#allocation2 + $0x24] sm:$0xf] }
  0xdd   :  { %1234 = vmatpush.bf16.msra.mxu2 %v6964_v55 }
  0xde   :  { %1247 = vmatpush.bf16.msra.mxu3 %v7092_v56  ;;  %1210 = vmatpush.bf16.msra.mxu0 %v6676_v60  ;;  %v7191_v56 = vld [vmem:[#allocation2 + $0x40] sm:$0xf]  ;;  %v9903_v60 = vld [vmem:[#allocation2 + $0x14c] sm:$0xf0] }
  0xdf   :  { %1223 = vmatpush.bf16.msra.mxu1 %v6804_v61  ;;  %v7175_v61 = vld [vmem:[#allocation2 + $0x20] sm:$0xf] }
  0xe0   :  { %v7176_v63 = vor.u32 %v9867_v62, %v7175_v61  ;;  %v7415_v61 = vld [vmem:[#allocation2 + $0x200] sm:$0xf]  ;;  %v9927_v62 = vld [vmem:[#allocation2 + $0x20c] sm:$0xf0] }
  0xe1   :  { %1235 = vmatpush.bf16.msra.mxu2 %v6948_v5  ;;  %v7160_v5 = vor.u32 %v9863_v2, %v7159_v0  ;;  %v9987_v0 = vld [vmem:[#allocation2 + $0x3ec] sm:$0xf0]  ;;  %v9905_v2 = vld [vmem:[#allocation2 + $0x164] sm:$0xf] }
  0xe2   :  { %1248 = vmatpush.bf16.msra.mxu3 %v7076_v10  ;;  %1211 = vmatpush.bf16.msra.mxu0 %v6660_v13  ;;  %v7260_v10 = vor.u32 %v9885_v8, %v7257_v9  ;;  %v7244_v13 = vor.u32 %v9881_v11, %v7241_v12  ;;  %v7529_v8 = vld [vmem:[#allocation2 + $0x2f0] sm:$0xf0]  ;;  %v9983_v11 = vld [vmem:[#allocation2 + $0x3cc] sm:$0xf0] }
  0xe3   :  { %1224 = vmatpush.bf16.msra.mxu1 %v6788_v14  ;;  %v7303_v14 = vld [vmem:[#allocation2 + $0x120] sm:$0xf] }
  0xe5   :  { %1236 = vmatpush.bf16.msra.mxu2 %v6932_v20  ;;  %1212 = vmatmul.bf16.vlgmr.msra.gmra.mxu0 %v11228_v1  ;;  %v7512_v1 = vor.u32 %v9951_v43, %v7511_v42  ;;  %v7225_v20 = vld [vmem:[#allocation2 + $0x90] sm:$0xf0]  ;;  %v9917_v42 = vld [vmem:[#allocation2 + $0x1c4] sm:$0xf] }
  0xe6   :  { %2042 = vmatpush.bf16.msrb.mxu0 %v7272_v17  ;;  %1249 = vmatpush.bf16.msra.mxu3 %v7060_v24  ;;  %v7304_v17 = vor.u32 %v9899_v15, %v7303_v14  ;;  %v9895_v24 = vld [vmem:[#allocation2 + $0x10c] sm:$0xf0]  ;;  %v7321_v14 = vld [vmem:[#allocation2 + $0x150] sm:$0xf0]  ;;  %v9949_v15 = vld [vmem:[#allocation2 + $0x2c4] sm:$0xf] }
  0xe7   :  { %2055 = vmatpush.bf16.msrb.mxu1 %v7400_v19  ;;  %v9877_v19 = vld [vmem:[#allocation2 + $0x84] sm:$0xf]  ;;  %v7288_v26 = vor.u32 %v9895_v24, %v7287_v23 }
  0xe8   :  { %1225 = vmatmul.bf16.vlgmr.msra.gmra.mxu1 %v11236_v6  ;;  %v7207_v6 = vld [vmem:[#allocation2 + $0x60] sm:$0xf]  ;;  %v7228_v22 = vor.u32 %v9877_v19, %v7225_v20  ;;  %v9897_v24 = vld [vmem:[#allocation2 + $0x124] sm:$0xf] }
  0xe9   :  { %1237 = vmatpush.bf16.msra.mxu2 %v6916_v35  ;;  %v7208_v55 = vor.u32 %v9875_v51, %v7207_v6  ;;  %v7401_v35 = vld [vmem:[#allocation2 + $0x1f0] sm:$0xf0]  ;;  %v11627_v19 = vld [vmem:[%s12664_s4] sm:$0xf] }
  0xea   :  { %2043 = vmatpush.bf16.msrb.mxu0 %v7256_v32  ;;  %1250 = vmatpush.bf16.msra.mxu3 %v7044_v38  ;;  %v9921_v32 = vld [vmem:[#allocation2 + $0x1e4] sm:$0xf]  ;;  %v7369_v51 = vld [vmem:[#allocation2 + $0x1b0] sm:$0xf0]  ;;  %v7623_v20 = vld [vmem:[#allocation2 + $0x3a0] sm:$0xf] }
  0xeb   :  { %2056 = vmatpush.bf16.msrb.mxu1 %v7384_v33  ;;  %v7212_v33 = vor.u32 %v9873_v30, %v7209_v31  ;;  %v7404_v38 = vor.u32 %v9921_v32, %v7401_v35  ;;  %v7497_v30 = vld [vmem:[#allocation2 + $0x2b0] sm:$0xf0]  ;;  %v400_v31 = vperm.slane %v11627_v19, 0  ;;  %v9975_v35 = vld [vmem:[#allocation2 + $0x38c] sm:$0xf0] }
  0xec   :  { %1238 = vmatmul.bf16.vlgmr.msra.gmra.mxu2 %v11270_v28  ;;  %v7192_v28 = vor.u32 %v9871_v57, %v7191_v56  ;;  %v9861_v56 = vld [vmem:[#allocation2 + $0x4] sm:$0xf]  ;;  %v7161_v57 = vld [vmem:[#allocation2 + $0x10] sm:$0xf0] }
  0xed   :  { %2068 = vmatpush.bf16.msrb.mxu2 %v7528_v41  ;;  %1251 = vmatmul.bf16.vlgmr.msra.gmra.mxu3 %v11281_v34  ;;  %v7320_v34 = vor.u32 %v9903_v60, %v7319_v59  ;;  %v7193_v41 = vld [vmem:[#allocation2 + $0x50] sm:$0xf0]  ;;  %v7164_v59 = vor.u32 %v9861_v56, %v7161_v57 }
  0xee   :  { %2044 = vmatpush.bf16.msrb.mxu0 %v7240_v44  ;;  %v7196_v43 = vor.u32 %v9869_v40, %v7193_v41  ;;  %v7385_v44 = vld [vmem:[#allocation2 + $0x1d0] sm:$0xf0] }
  0xef   :  { %2057 = vmatpush.bf16.msrb.mxu1 %v7368_v47  ;;  %v7388_v45 = vor.u32 %v9917_v42, %v7385_v44  ;;  %v9935_v47 = vld [vmem:[#allocation2 + $0x24c] sm:$0xf0]  ;;  %v7353_v60 = vld [vmem:[#allocation2 + $0x190] sm:$0xf0]  ;;  %v7591_v44 = vld [vmem:[#allocation2 + $0x360] sm:$0xf] }
  0xf0   :  { %v7448_v48 = vor.u32 %v9935_v47, %v7447_v46  ;;  %v7481_v41 = vld [vmem:[#allocation2 + $0x290] sm:$0xf0] }
  0xf1   :  { %2069 = vmatpush.bf16.msrb.mxu2 %v7512_v1  ;;  %v7177_v1 = vld [vmem:[#allocation2 + $0x30] sm:$0xf0] }
  0xf2   :  { %2045 = vmatpush.bf16.msrb.mxu0 %v7224_v50  ;;  %v9913_v50 = vld [vmem:[#allocation2 + $0x1a4] sm:$0xf]  ;;  %v7180_v6 = vor.u32 %v9865_v49, %v7177_v1  ;;  %v7465_v49 = vld [vmem:[#allocation2 + $0x270] sm:$0xf0] }
  0xf3   :  { %2058 = vmatpush.bf16.msrb.mxu1 %v7352_v52  ;;  %v7372_v52 = vor.u32 %v9913_v50, %v7369_v51  ;;  %v7575_v51 = vld [vmem:[#allocation2 + $0x340] sm:$0xf] }
  0xf5   :  { %2070 = vmatpush.bf16.msrb.mxu2 %v7496_v21  ;;  %v9979_v21 = vld [vmem:[#allocation2 + $0x3ac] sm:$0xf0] }
  0xf6   :  { %2046 = vmatpush.bf16.msrb.mxu0 %v7208_v55  ;;  %v7432_v55 = vor.u32 %v9931_v54, %v7431_v53  ;;  %v7624_v23 = vor.u32 %v9979_v21, %v7623_v20  ;;  %v9933_v54 = vld [vmem:[#allocation2 + $0x244] sm:$0xf] }
  0xf7   :  { %2059 = vmatpush.bf16.msrb.mxu1 %v7336_v58  ;;  %v9909_v58 = vld [vmem:[#allocation2 + $0x184] sm:$0xf] }
  0xf9   :  { %2071 = vmatpush.bf16.msrb.mxu2 %v7480_v29  ;;  %v7308_v29 = vor.u32 %v9897_v24, %v7305_v25 }
  0xfa   :  { %2047 = vmatpush.bf16.msrb.mxu0 %v7192_v28  ;;  %v7356_v28 = vor.u32 %v9909_v58, %v7353_v60  ;;  %v7279_v60 = vld [vmem:[#allocation2 + $0xe8] sm:$0xf] }
  0xfb   :  { %2060 = vmatpush.bf16.msrb.mxu1 %v7320_v34  ;;  %v7655_v34 = vld [vmem:[#allocation2 + $0x3e0] sm:$0xf] }
  0xfc   :  { %v7656_v4 = vor.u32 %v9987_v0, %v7655_v34 }
  0xfd   :  { %2072 = vmatpush.bf16.msrb.mxu2 %v7464_v39  ;;  %v9941_v39 = vld [vmem:[#allocation2 + $0x284] sm:$0xf] }
  0xfe   :  { %2048 = vmatpush.bf16.msrb.mxu0 %v7176_v63  ;;  %v7416_v63 = vor.u32 %v9927_v62, %v7415_v61  ;;  %2081 = vmatpush.bf16.msrb.mxu3 %v7656_v4  ;;  %v9963_v61 = vld [vmem:[#allocation2 + $0x32c] sm:$0xf0] }
  0xff   :  { %2061 = vmatpush.bf16.msrb.mxu1 %v7304_v17  ;;  %v7513_v17 = vld [vmem:[#allocation2 + $0x2d0] sm:$0xf0] }
 0x100   :  { %v7516_v18 = vor.u32 %v9949_v15, %v7513_v17  ;;  %v7417_v17 = vld [vmem:[#allocation2 + $0x210] sm:$0xf0] }
 0x101   :  { %2073 = vmatpush.bf16.msrb.mxu2 %v7448_v48  ;;  %v9937_v48 = vld [vmem:[#allocation2 + $0x264] sm:$0xf] }
 0x102   :  { %2049 = vmatpush.bf16.msrb.mxu0 %v7160_v5  ;;  %v7340_v5 = vor.u32 %v9905_v2, %v7337_v3  ;;  %v7468_v50 = vor.u32 %v9937_v48, %v7465_v49  ;;  %v9929_v2 = vld [vmem:[#allocation2 + $0x224] sm:$0xf]  ;;  %v7433_v3 = vld [vmem:[#allocation2 + $0x230] sm:$0xf0]  ;;  %v9876_v48 = vld [vmem:[#allocation2 + $0x74] sm:$0xf0] }
 0x103   :  { %2062 = vmatpush.bf16.msrb.mxu1 %v7288_v26  ;;  %v9945_v26 = vld [vmem:[#allocation2 + $0x2a4] sm:$0xf]  ;;  %v7407_v49 = vld [vmem:[#allocation2 + $0x1e8] sm:$0xf] }
 0x104   :  { %v7500_v32 = vor.u32 %v9945_v26, %v7497_v30  ;;  %v7247_v26 = vld [vmem:[#allocation2 + $0xa8] sm:$0xf]  ;;  %v9884_v30 = vld [vmem:[#allocation2 + $0xb4] sm:$0xf0] }
 0x105   :  { %2074 = vmatpush.bf16.msrb.mxu2 %v7432_v55  ;;  %v7449_v55 = vld [vmem:[#allocation2 + $0x250] sm:$0xf0] }
 0x106   :  { %2094 = vmatpush.bf16.msra.mxu0 %v7276_v7  ;;  %v9953_v7 = vld [vmem:[#allocation2 + $0x2e4] sm:$0xf]  ;;  %v7452_v57 = vor.u32 %v9933_v54, %v7449_v55 }
 0x107   :  { %2107 = vmatpush.bf16.msra.mxu1 %v7404_v38  ;;  %v7532_v9 = vor.u32 %v9953_v7, %v7529_v8  ;;  %v7289_v38 = vld [vmem:[#allocation2 + $0x110] sm:$0xf0]  ;;  %v401_v8 = vperm.slane %v11627_v19, 1 }
 0x108   :  { %v7292_v40 = vor.u32 %v9893_v37, %v7289_v38  ;;  %v7231_v37 = vld [vmem:[#allocation2 + $0x88] sm:$0xf] }
 0x109   :  { %2075 = vmatpush.bf16.msrb.mxu2 %v7416_v63  ;;  %v9892_v63 = vld [vmem:[#allocation2 + $0xf4] sm:$0xf0] }
 0x10a   :  { %2095 = vmatpush.bf16.msra.mxu0 %v7260_v10  ;;  %v7639_v10 = vld [vmem:[#allocation2 + $0x3c0] sm:$0xf] }
 0x10b   :  { %2108 = vmatpush.bf16.msra.mxu1 %v7388_v45  ;;  %v7640_v12 = vor.u32 %v9983_v11, %v7639_v10  ;;  %v9971_v45 = vld [vmem:[#allocation2 + $0x36c] sm:$0xf0]  ;;  %v7280_v10 = vor.u32 %v9892_v63, %v7279_v60  ;;  %v9888_v11 = vld [vmem:[#allocation2 + $0xd4] sm:$0xf0]  ;;  %v7391_v60 = vld [vmem:[#allocation2 + $0x1c8] sm:$0xf] }
 0x10c   :  { %v7592_v47 = vor.u32 %v9971_v45, %v7591_v44  ;;  %v402_v63 = vperm.slane %v11627_v19, 2 }
 0x10d   :  { %2120 = vmatpush.bf16.msra.mxu2 %v7532_v9  ;;  %2082 = vmatpush.bf16.msrb.mxu3 %v7640_v12  ;;  %v7263_v9 = vld [vmem:[#allocation2 + $0xc8] sm:$0xf]  ;;  %v7543_v12 = vld [vmem:[#allocation2 + $0x300] sm:$0xf] }
 0x10e   :  { %2096 = vmatpush.bf16.msra.mxu0 %v7244_v13  ;;  %v9901_v13 = vld [vmem:[#allocation2 + $0x144] sm:$0xf]  ;;  %v7264_v25 = vor.u32 %v9888_v11, %v7263_v9  ;;  %v7375_v9 = vld [vmem:[#allocation2 + $0x1a8] sm:$0xf] }
 0x10f   :  { %2109 = vmatpush.bf16.msra.mxu1 %v7372_v52  ;;  %v7324_v16 = vor.u32 %v9901_v13, %v7321_v14  ;;  %v9967_v52 = vld [vmem:[#allocation2 + $0x34c] sm:$0xf0]  ;;  %v9965_v11 = vld [vmem:[#allocation2 + $0x344] sm:$0xf] }
 0x110   :  { %v7576_v53 = vor.u32 %v9967_v52, %v7575_v51  ;;  %v9959_v13 = vld [vmem:[#allocation2 + $0x30c] sm:$0xf0]  ;;  %v7609_v51 = vld [vmem:[#allocation2 + $0x390] sm:$0xf0] }
 0x111   :  { %2121 = vmatpush.bf16.msra.mxu2 %v7516_v18  ;;  %2083 = vmatpush.bf16.msrb.mxu3 %v7624_v23  ;;  %v7544_v15 = vor.u32 %v9959_v13, %v7543_v12  ;;  %v9985_v18 = vld [vmem:[#allocation2 + $0x3e4] sm:$0xf]  ;;  %v7577_v12 = vld [vmem:[#allocation2 + $0x350] sm:$0xf0] }
 0x112   :  { %2097 = vmatpush.bf16.msra.mxu0 %v7228_v22 }
 0x113   :  { %2110 = vmatpush.bf16.msra.mxu1 %v7356_v28  ;;  %v7559_v28 = vld [vmem:[#allocation2 + $0x320] sm:$0xf] }
 0x114   :  { %v7560_v0 = vor.u32 %v9963_v61, %v7559_v28  ;;  %v9920_v61 = vld [vmem:[#allocation2 + $0x1d4] sm:$0xf0] }
 0x115   :  { %2122 = vmatpush.bf16.msra.mxu2 %v7500_v32  ;;  %v7641_v32 = vld [vmem:[#allocation2 + $0x3d0] sm:$0xf0] }
 0x116   :  { %2098 = vmatpush.bf16.msra.mxu0 %v7212_v33  ;;  %v7607_v33 = vld [vmem:[#allocation2 + $0x380] sm:$0xf] }
 0x117   :  { %2111 = vmatpush.bf16.msra.mxu1 %v7340_v5  ;;  %v7608_v36 = vor.u32 %v9975_v35, %v7607_v33  ;;  %v7436_v5 = vor.u32 %v9929_v2, %v7433_v3 }
 0x119   :  { %2084 = vmatpush.bf16.msrb.mxu3 %v7608_v36  ;;  %v7248_v36 = vor.u32 %v9884_v30, %v7247_v26  ;;  %v7561_v26 = vld [vmem:[#allocation2 + $0x330] sm:$0xf0]  ;;  %v7281_v30 = vld [vmem:[#allocation2 + $0xf8] sm:$0xf0] }
 0x11a   :  { %2099 = vmatpush.bf16.msra.mxu0 %v7196_v43  ;;  %v7484_v43 = vor.u32 %v9941_v39, %v7481_v41  ;;  %v9880_v39 = vld [vmem:[#allocation2 + $0x94] sm:$0xf0]  ;;  %v7625_v41 = vld [vmem:[#allocation2 + $0x3b0] sm:$0xf0] }
 0x11b   :  { %2112 = vmatpush.bf16.msra.mxu1 %v7324_v16  ;;  %v9925_v16 = vld [vmem:[#allocation2 + $0x204] sm:$0xf] }
 0x11c   :  { %2123 = vmatpush.bf16.msra.mxu2 %v7484_v43  ;;  %v7420_v21 = vor.u32 %v9925_v16, %v7417_v17  ;;  %v7580_v16 = vor.u32 %v9965_v11, %v7577_v12  ;;  %v7487_v11 = vld [vmem:[#allocation2 + $0x288] sm:$0xf]  ;;  %v9944_v12 = vld [vmem:[#allocation2 + $0x294] sm:$0xf0] }
 0x11d   :  { %2085 = vmatpush.bf16.msrb.mxu3 %v7592_v47  ;;  %v7215_v47 = vld [vmem:[#allocation2 + $0x68] sm:$0xf] }
 0x11e   :  { %2100 = vmatpush.bf16.msra.mxu0 %v7180_v6 }
 0x11f   :  { %2113 = vmatpush.bf16.msra.mxu1 %v7308_v29 }
 0x120   :  { %2124 = vmatpush.bf16.msra.mxu2 %v7468_v50  ;;  %v9924_v50 = vld [vmem:[#allocation2 + $0x1f4] sm:$0xf0] }
 0x121   :  { %v1057_v22 = vpop.f32.mrf.mxu0  ;;  %2086 = vmatpush.bf16.msrb.mxu3 %v7576_v53 }
 0x122   :  { %2101 = vmatpush.bf16.msra.mxu0 %v7164_v59  ;;  %v1070_v27 = vpop.f32.mrf.mxu1  ;;  %v1058_v42 = vadd.f32 %v1057_v22, %v400_v31  ;;  %v7657_v22 = vld [vmem:[#allocation2 + $0x3f0] sm:$0xf0]  ;;  %v9981_v31 = vld [vmem:[#allocation2 + $0x3c4] sm:$0xf] }
 0x123   :  { %2114 = vmatpush.bf16.msra.mxu1 %v7292_v40  ;;  %v7660_v24 = vor.u32 %v9985_v18, %v7657_v22  ;;  %v7644_v35 = vor.u32 %v9981_v31, %v7641_v32  ;;  %v9977_v40 = vld [vmem:[#allocation2 + $0x3a4] sm:$0xf]  ;;  %v9864_v22 = vld [vmem:[#allocation2 + $0x14] sm:$0xf0] }
 0x124   :  { %v1071_v6 = vadd.f32 %v1070_v27, %v1058_v42  ;;  %2125 = vmatpush.bf16.msra.mxu2 %v7452_v57  ;;  %v7628_v43 = vor.u32 %v9977_v40, %v7625_v41  ;;  %v7408_v57 = vor.u32 %v9924_v50, %v7407_v49  ;;  %v7535_v41 = vld [vmem:[#allocation2 + $0x2e8] sm:$0xf] }
 0x125   :  { %2087 = vmatpush.bf16.msrb.mxu3 %v7560_v0 }
 0x128   :  { %2126 = vmatpush.bf16.msra.mxu2 %v7436_v5  ;;  %v7392_v5 = vor.u32 %v9920_v61, %v7391_v60 }
 0x129   :  { %v1059_v46 = vpop.f32.mrf.mxu0  ;;  %2088 = vmatpush.bf16.msrb.mxu3 %v7544_v15 }
 0x12a   :  { %v1072_v1 = vpop.f32.mrf.mxu1  ;;  %v7232_v46 = vor.u32 %v9880_v39, %v7231_v37  ;;  %v9908_v39 = vld [vmem:[#allocation2 + $0x174] sm:$0xf0] }
 0x12c   :  { %2127 = vmatpush.bf16.msra.mxu2 %v7420_v21  ;;  %v7167_v21 = vld [vmem:[#allocation2 + $0x8] sm:$0xf] }
 0x12d   :  { %2133 = vmatpush.bf16.msra.mxu3 %v7660_v24  ;;  %v9912_v24 = vld [vmem:[#allocation2 + $0x194] sm:$0xf0] }
 0x12f   :  { %v1083_v56 = vpop.f32.mrf.mxu2 }
 0x130   :  { %v1084_v58 = vadd.f32 %v1083_v56, %v1071_v6  ;;  %v1096_v59 = vpop.f32.mrf.mxu3  ;;  %v9973_v6 = vld [vmem:[#allocation2 + $0x384] sm:$0xf]  ;;  %v7216_v56 = vor.u32 %v9876_v48, %v7215_v47  ;;  %v7265_v47 = vld [vmem:[#allocation2 + $0xd8] sm:$0xf0] }
 0x131   :  { %v1109_v34 = vpop.f32.mrf.mxu0  ;;  %2134 = vmatpush.bf16.msra.mxu3 %v7644_v35  ;;  %v7612_v53 = vor.u32 %v9973_v6, %v7609_v51  ;;  %v7327_v51 = vld [vmem:[#allocation2 + $0x148] sm:$0xf] }
 0x132   :  { %v1097_v62 = vadd.f32 %v1096_v59, %v1084_v58  ;;  %v1122_v4 = vpop.f32.mrf.mxu1  ;;  %v1110_v27 = vadd.f32 %v1109_v34, %v401_v8  ;;  %v7199_v58 = vld [vmem:[#allocation2 + $0x48] sm:$0xf]  ;;  %v9872_v59 = vld [vmem:[#allocation2 + $0x54] sm:$0xf0]  ;;  %v7593_v34 = vld [vmem:[#allocation2 + $0x370] sm:$0xf0] }
 0x133   :  { %v9868_v8 = vld [vmem:[#allocation2 + $0x34] sm:$0xf0] }
 0x134   :  { %v1256_v7 = vmax.f32 %v1097_v62, 0.0  ;;  %v1123_v38 = vadd.f32 %v1122_v4, %v1110_v27  ;;  %v9969_v62 = vld [vmem:[#allocation2 + $0x364] sm:$0xf]  ;;  %v7200_v4 = vor.u32 %v9872_v59, %v7199_v58 }
 0x135   :  { %2135 = vmatpush.bf16.msra.mxu3 %v7628_v43  ;;  %v7596_v2 = vor.u32 %v9969_v62, %v7593_v34  ;;  %v7545_v43 = vld [vmem:[#allocation2 + $0x310] sm:$0xf0]  ;;  %v7311_v34 = vld [vmem:[#allocation2 + $0x128] sm:$0xf] }
 0x136   :  { %v11631_v14 = vpack.c.bf16 %v1256_v7, %v1256_v7  ;;  %v7183_v7 = vld [vmem:[#allocation2 + $0x28] sm:$0xf] }
 0x137   :  { %v1085_v20 = vpop.f32.mrf.mxu2  ;;  %v7184_v18 = vor.u32 %v9868_v8, %v7183_v7 }
 0x138   :  { %v1098_v23 = vpop.f32.mrf.mxu3  ;;  %2050 = vmatmul.bf16.vlgmr.msrb.gmra.mxu0 %v11631_v14 }
 0x139   :  { %2146 = vmatpush.bf16.msrb.mxu0 %v7280_v10  ;;  %v1111_v29 = vpop.f32.mrf.mxu0  ;;  %2136 = vmatpush.bf16.msra.mxu3 %v7612_v53  ;;  %v9916_v10 = vld [vmem:[#allocation2 + $0x1b4] sm:$0xf0]  ;;  %v7359_v23 = vld [vmem:[#allocation2 + $0x188] sm:$0xf] }
 0x13a   :  { %v1124_v33 = vpop.f32.mrf.mxu1  ;;  %v7376_v20 = vor.u32 %v9916_v10, %v7375_v9  ;;  %v9890_v29 = vld [vmem:[#allocation2 + $0xec] sm:$0xf]  ;;  %v7360_v37 = vor.u32 %v9912_v24, %v7359_v23  ;;  %v7519_v53 = vld [vmem:[#allocation2 + $0x2c8] sm:$0xf]  ;;  %v9896_v10 = vld [vmem:[#allocation2 + $0x114] sm:$0xf0]  ;;  %v7488_v23 = vor.u32 %v9944_v12, %v7487_v11 }
 0x13b   :  { %v7284_v40 = vor.u32 %v9890_v29, %v7281_v30  ;;  %v7295_v9 = vld [vmem:[#allocation2 + $0x108] sm:$0xf]  ;;  %v9870_v29 = vld [vmem:[#allocation2 + $0x4c] sm:$0xf]  ;;  %v7201_v30 = vld [vmem:[#allocation2 + $0x58] sm:$0xf0] }
 0x13c   :  { %v7647_v12 = vld [vmem:[#allocation2 + $0x3c8] sm:$0xf] }
 0x13d   :  { %2147 = vmatpush.bf16.msrb.mxu0 %v7264_v25  ;;  %2137 = vmatpush.bf16.msra.mxu3 %v7596_v2  ;;  %v9961_v25 = vld [vmem:[#allocation2 + $0x324] sm:$0xf]  ;;  %v9948_v2 = vld [vmem:[#allocation2 + $0x2b4] sm:$0xf0] }
 0x13e   :  { %v7564_v31 = vor.u32 %v9961_v25, %v7561_v26  ;;  %v7471_v25 = vld [vmem:[#allocation2 + $0x268] sm:$0xf] }
 0x13f   :  { %v1135_v42 = vpop.f32.mrf.mxu2 }
 0x140   :  { %v1136_v44 = vadd.f32 %v1135_v42, %v1123_v38  ;;  %v1148_v45 = vpop.f32.mrf.mxu3  ;;  %v7343_v38 = vld [vmem:[#allocation2 + $0x168] sm:$0xf]  ;;  %v9957_v42 = vld [vmem:[#allocation2 + $0x304] sm:$0xf] }
 0x141   :  { %2148 = vmatpush.bf16.msrb.mxu0 %v7248_v36  ;;  %2138 = vmatpush.bf16.msra.mxu3 %v7580_v16  ;;  %v7168_v36 = vor.u32 %v9864_v22, %v7167_v21  ;;  %v7548_v48 = vor.u32 %v9957_v42, %v7545_v43  ;;  %v7296_v21 = vor.u32 %v9896_v10, %v7295_v9  ;;  %v403_v22 = vperm.slane %v11627_v19, 3  ;;  %v9914_v42 = vld [vmem:[#allocation2 + $0x1ac] sm:$0xf]  ;;  %v7377_v43 = vld [vmem:[#allocation2 + $0x1b8] sm:$0xf0] }
 0x142   :  { %v1149_v1 = vadd.f32 %v1148_v45, %v1136_v44  ;;  %v1161_v52 = vpop.f32.mrf.mxu0  ;;  %v9956_v45 = vld [vmem:[#allocation2 + $0x2f4] sm:$0xf0] }
 0x143   :  { %v1162_v13 = vadd.f32 %v1161_v52, %v402_v63  ;;  %v7536_v50 = vor.u32 %v9956_v45, %v7535_v41  ;;  %v9904_v52 = vld [vmem:[#allocation2 + $0x154] sm:$0xf0] }
 0x144   :  { %v1257_v54 = vmax.f32 %v1149_v1, 0.0  ;;  %v7344_v1 = vor.u32 %v9908_v39, %v7343_v38  ;;  %v7328_v60 = vor.u32 %v9904_v52, %v7327_v51  ;;  %v9900_v63 = vld [vmem:[#allocation2 + $0x134] sm:$0xf0]  ;;  %v9866_v39 = vld [vmem:[#allocation2 + $0x2c] sm:$0xf] }
 0x145   :  { %v1174_v55 = vpop.f32.mrf.mxu1  ;;  %2149 = vmatpush.bf16.msrb.mxu0 %v7232_v46  ;;  %2139 = vmatpush.bf16.msra.mxu3 %v7564_v31  ;;  %v9886_v46 = vld [vmem:[#allocation2 + $0xcc] sm:$0xf]  ;;  %v9936_v38 = vld [vmem:[#allocation2 + $0x254] sm:$0xf0] }
 0x146   :  { %v11634_v28 = vpack.c.bf16 %v1257_v54, %v1257_v54  ;;  %v1175_v27 = vadd.f32 %v1174_v55, %v1162_v13  ;;  %v7268_v6 = vor.u32 %v9886_v46, %v7265_v47  ;;  %v9952_v55 = vld [vmem:[#allocation2 + $0x2d4] sm:$0xf0]  ;;  %v9874_v13 = vld [vmem:[#allocation2 + $0x6c] sm:$0xf]  ;;  %v7439_v47 = vld [vmem:[#allocation2 + $0x228] sm:$0xf] }
 0x147   :  { %v1137_v0 = vpop.f32.mrf.mxu2  ;;  %v7520_v61 = vor.u32 %v9952_v55, %v7519_v53  ;;  %v9918_v31 = vld [vmem:[#allocation2 + $0x1cc] sm:$0xf]  ;;  %v7361_v53 = vld [vmem:[#allocation2 + $0x198] sm:$0xf0] }
 0x148   :  { %v1150_v3 = vpop.f32.mrf.mxu3  ;;  %2063 = vmatmul.bf16.vlgmr.msrb.gmra.mxu1 %v11634_v28  ;;  %2102 = vmatmul.bf16.vlgmr.msra.gmra.mxu0 %v11631_v14  ;;  %v7503_v0 = vld [vmem:[#allocation2 + $0x2a8] sm:$0xf]  ;;  %v9910_v52 = vld [vmem:[#allocation2 + $0x18c] sm:$0xf] }
 0x149   :  { %2150 = vmatpush.bf16.msrb.mxu0 %v7216_v56  ;;  %2159 = vmatpush.bf16.msrb.mxu1 %v7408_v57  ;;  %v9882_v56 = vld [vmem:[#allocation2 + $0xac] sm:$0xf]  ;;  %v7249_v57 = vld [vmem:[#allocation2 + $0xb8] sm:$0xf0]  ;;  %v7504_v7 = vor.u32 %v9948_v2, %v7503_v0 }
 0x14a   :  { %v1163_v15 = vpop.f32.mrf.mxu0  ;;  %2140 = vmatpush.bf16.msra.mxu3 %v7548_v48  ;;  %v7252_v62 = vor.u32 %v9882_v56, %v7249_v57  ;;  %v9878_v3 = vld [vmem:[#allocation2 + $0x8c] sm:$0xf]  ;;  %v7345_v2 = vld [vmem:[#allocation2 + $0x178] sm:$0xf0] }
 0x14b   :  { %v7217_v15 = vld [vmem:[#allocation2 + $0x78] sm:$0xf0]  ;;  %v9906_v0 = vld [vmem:[#allocation2 + $0x16c] sm:$0xf] }
 0x14c   :  { %v7220_v24 = vor.u32 %v9874_v13, %v7217_v15  ;;  %v7348_v10 = vor.u32 %v9906_v0, %v7345_v2  ;;  %v9984_v13 = vld [vmem:[#allocation2 + $0x3d4] sm:$0xf0]  ;;  %v9902_v15 = vld [vmem:[#allocation2 + $0x14c] sm:$0xf]  ;;  %v7665_v0 = vld [vmem:[#allocation2 + $0x3f8] sm:$0xf0] }
 0x14d   :  { %v1176_v17 = vpop.f32.mrf.mxu1  ;;  %2151 = vmatpush.bf16.msrb.mxu0 %v7200_v4  ;;  %2160 = vmatpush.bf16.msrb.mxu1 %v7392_v5  ;;  %v7233_v4 = vld [vmem:[#allocation2 + $0x98] sm:$0xf0]  ;;  %v7312_v5 = vor.u32 %v9900_v63, %v7311_v34  ;;  %v7663_v34 = vld [vmem:[#allocation2 + $0x3e8] sm:$0xf]  ;;  %v9988_v63 = vld [vmem:[#allocation2 + $0x3f4] sm:$0xf0] }
 0x14e   :  { %v7236_v8 = vor.u32 %v9878_v3, %v7233_v4  ;;  %v9922_v17 = vld [vmem:[#allocation2 + $0x1ec] sm:$0xf]  ;;  %v7537_v4 = vld [vmem:[#allocation2 + $0x2f8] sm:$0xf0] }
 0x14f   :  { %v1187_v32 = vpop.f32.mrf.mxu2  ;;  %v9954_v3 = vld [vmem:[#allocation2 + $0x2ec] sm:$0xf] }
 0x150   :  { %v1200_v33 = vpop.f32.mrf.mxu3  ;;  %v1188_v35 = vadd.f32 %v1187_v32, %v1175_v27  ;;  %v9940_v27 = vld [vmem:[#allocation2 + $0x274] sm:$0xf0]  ;;  %v7393_v32 = vld [vmem:[#allocation2 + $0x1d8] sm:$0xf0]  ;;  %v7540_v11 = vor.u32 %v9954_v3, %v7537_v4  ;;  %v9982_v4 = vld [vmem:[#allocation2 + $0x3cc] sm:$0xf] }
 0x151   :  { %2152 = vmatpush.bf16.msrb.mxu0 %v7184_v18  ;;  %2161 = vmatpush.bf16.msrb.mxu1 %v7376_v20  ;;  %v7409_v18 = vld [vmem:[#allocation2 + $0x1f8] sm:$0xf0]  ;;  %v7396_v19 = vor.u32 %v9918_v31, %v7393_v32 }
 0x152   :  { %v1201_v44 = vadd.f32 %v1200_v33, %v1188_v35  ;;  %v7412_v26 = vor.u32 %v9922_v17, %v7409_v18  ;;  %v7472_v33 = vor.u32 %v9940_v27, %v7471_v25  ;;  %v7204_v35 = vor.u32 %v9870_v29, %v7201_v30  ;;  %v7329_v17 = vld [vmem:[#allocation2 + $0x158] sm:$0xf0]  ;;  %v9950_v18 = vld [vmem:[#allocation2 + $0x2cc] sm:$0xf]  ;;  %v7631_v25 = vld [vmem:[#allocation2 + $0x3a8] sm:$0xf] }
 0x153   :  { %v9898_v27 = vld [vmem:[#allocation2 + $0x12c] sm:$0xf]  ;;  %v7313_v29 = vld [vmem:[#allocation2 + $0x138] sm:$0xf0] }
 0x154   :  { %v1258_v49 = vmax.f32 %v1201_v44, 0.0  ;;  %v9946_v30 = vld [vmem:[#allocation2 + $0x2ac] sm:$0xf]  ;;  %v7505_v31 = vld [vmem:[#allocation2 + $0x2b8] sm:$0xf0] }
 0x155   :  { %2153 = vmatpush.bf16.msrb.mxu0 %v7168_v36  ;;  %2162 = vmatpush.bf16.msrb.mxu1 %v7360_v37  ;;  %v7455_v36 = vld [vmem:[#allocation2 + $0x248] sm:$0xf] }
 0x156   :  { %v11639_v54 = vpack.c.bf16 %v1258_v49, %v1258_v49  ;;  %v7456_v45 = vor.u32 %v9936_v38, %v7455_v36  ;;  %v7380_v49 = vor.u32 %v9914_v42, %v7377_v43  ;;  %v9976_v36 = vld [vmem:[#allocation2 + $0x394] sm:$0xf0]  ;;  %v9942_v38 = vld [vmem:[#allocation2 + $0x28c] sm:$0xf]  ;;  %v7599_v43 = vld [vmem:[#allocation2 + $0x368] sm:$0xf] }
 0x157   :  { %v1189_v58 = vpop.f32.mrf.mxu2 }
 0x158   :  { %v1202_v59 = vpop.f32.mrf.mxu3  ;;  %2115 = vmatmul.bf16.vlgmr.msra.gmra.mxu1 %v11634_v28  ;;  %2154 = vmatmul.bf16.vlgmr.msrb.gmra.mxu0 %v11631_v14 }
 0x159   :  { %2198 = vmatpush.bf16.msra.mxu0 %v7284_v40  ;;  %2076 = vmatmul.bf16.vlgmr.msrb.gmra.mxu2 %v11639_v54  ;;  %v7185_v40 = vld [vmem:[#allocation2 + $0x38] sm:$0xf0]  ;;  %v7423_v59 = vld [vmem:[#allocation2 + $0x208] sm:$0xf] }
 0x15a   :  { %2163 = vmatpush.bf16.msrb.mxu1 %v7344_v1  ;;  %2172 = vmatpush.bf16.msrb.mxu2 %v7536_v50  ;;  %v7188_v46 = vor.u32 %v9866_v39, %v7185_v40  ;;  %v9932_v1 = vld [vmem:[#allocation2 + $0x234] sm:$0xf0]  ;;  %v9862_v50 = vld [vmem:[#allocation2 + $0xc] sm:$0xf]  ;;  %v7489_v39 = vld [vmem:[#allocation2 + $0x298] sm:$0xf0] }
 0x15b   :  { %v7440_v57 = vor.u32 %v9932_v1, %v7439_v47  ;;  %v7492_v42 = vor.u32 %v9942_v38, %v7489_v39  ;;  %v9968_v1 = vld [vmem:[#allocation2 + $0x354] sm:$0xf0]  ;;  %v10007_v38 = vld [vmem:[#allocation4 + $0x8c] sm:$0xf0]  ;;  %v7719_v39 = vld [vmem:[#allocation4 + $0x60] sm:$0xf] }
 0x15d   :  { %2199 = vmatpush.bf16.msra.mxu0 %v7268_v6  ;;  %v7169_v6 = vld [vmem:[#allocation2 + $0x18] sm:$0xf0] }
 0x15e   :  { %2164 = vmatpush.bf16.msrb.mxu1 %v7328_v60  ;;  %2173 = vmatpush.bf16.msrb.mxu2 %v7520_v61  ;;  %v7172_v58 = vor.u32 %v9862_v50, %v7169_v6  ;;  %v9928_v60 = vld [vmem:[#allocation2 + $0x214] sm:$0xf0]  ;;  %v9934_v50 = vld [vmem:[#allocation2 + $0x24c] sm:$0xf]  ;;  %v7457_v6 = vld [vmem:[#allocation2 + $0x258] sm:$0xf0] }
 0x161   :  { %2200 = vmatpush.bf16.msra.mxu0 %v7252_v62  ;;  %v7364_v62 = vor.u32 %v9910_v52, %v7361_v53  ;;  %v7460_v52 = vor.u32 %v9934_v50, %v7457_v6  ;;  %v7567_v53 = vld [vmem:[#allocation2 + $0x328] sm:$0xf]  ;;  %v10047_v50 = vld [vmem:[#allocation4 + $0x1cc] sm:$0xf0] }
 0x162   :  { %v1213_v16 = vpop.f32.mrf.mxu0  ;;  %2165 = vmatpush.bf16.msrb.mxu1 %v7312_v5  ;;  %2174 = vmatpush.bf16.msrb.mxu2 %v7504_v7  ;;  %v7424_v7 = vor.u32 %v9928_v60, %v7423_v59  ;;  %v7551_v60 = vld [vmem:[#allocation2 + $0x308] sm:$0xf] }
 0x163   :  { %v1214_v37 = vadd.f32 %v1213_v16, %v403_v22  ;;  %v7648_v22 = vor.u32 %v9984_v13, %v7647_v12  ;;  %v9974_v12 = vld [vmem:[#allocation2 + $0x38c] sm:$0xf]  ;;  %v7617_v13 = vld [vmem:[#allocation2 + $0x398] sm:$0xf0] }
 0x165   :  { %v1226_v20 = vpop.f32.mrf.mxu1  ;;  %2201 = vmatpush.bf16.msra.mxu0 %v7236_v8  ;;  %v7664_v8 = vor.u32 %v9988_v63, %v7663_v34  ;;  %v7425_v34 = vld [vmem:[#allocation2 + $0x218] sm:$0xf0]  ;;  %v9986_v63 = vld [vmem:[#allocation2 + $0x3ec] sm:$0xf] }
 0x166   :  { %2166 = vmatpush.bf16.msrb.mxu1 %v7296_v21  ;;  %2175 = vmatpush.bf16.msrb.mxu2 %v7488_v23  ;;  %v1227_v48 = vadd.f32 %v1226_v20, %v1214_v37  ;;  %v7521_v20 = vld [vmem:[#allocation2 + $0x2d8] sm:$0xf0]  ;;  %v7332_v23 = vor.u32 %v9902_v15, %v7329_v17  ;;  %v9894_v37 = vld [vmem:[#allocation2 + $0x10c] sm:$0xf]  ;;  %v7668_v3 = vor.u32 %v9986_v63, %v7665_v0  ;;  %v7785_v63 = vld [vmem:[#allocation4 + $0xf0] sm:$0xf0] }
 0x167   :  { %v7620_v15 = vor.u32 %v9974_v12, %v7617_v13  ;;  %v7601_v17 = vld [vmem:[#allocation2 + $0x378] sm:$0xf0] }
 0x169   :  { %2202 = vmatpush.bf16.msra.mxu0 %v7220_v24  ;;  %2167 = vmatmul.bf16.vlgmr.msrb.gmra.mxu1 %v11634_v28  ;;  %v7524_v24 = vor.u32 %v9950_v18, %v7521_v20  ;;  %v7783_v18 = vld [vmem:[#allocation4 + $0xe0] sm:$0xf]  ;;  %v10019_v20 = vld [vmem:[#allocation4 + $0xec] sm:$0xf0] }
 0x16a   :  { %2211 = vmatpush.bf16.msra.mxu1 %v7412_v26  ;;  %v1215_v41 = vpop.f32.mrf.mxu0  ;;  %2128 = vmatmul.bf16.vlgmr.msra.gmra.mxu2 %v11639_v54  ;;  %v9980_v26 = vld [vmem:[#allocation2 + $0x3b4] sm:$0xf0] }
 0x16b   :  { %2176 = vmatpush.bf16.msrb.mxu2 %v7472_v33  ;;  %v7632_v32 = vor.u32 %v9980_v26, %v7631_v25  ;;  %v7508_v33 = vor.u32 %v9946_v30, %v7505_v31  ;;  %v9962_v26 = vld [vmem:[#allocation2 + $0x32c] sm:$0xf] }
 0x16d   :  { %v1228_v44 = vpop.f32.mrf.mxu1  ;;  %2203 = vmatpush.bf16.msra.mxu0 %v7204_v35  ;;  %v7615_v35 = vld [vmem:[#allocation2 + $0x388] sm:$0xf] }
 0x16e   :  { %2212 = vmatpush.bf16.msra.mxu1 %v7396_v19  ;;  %v7297_v19 = vld [vmem:[#allocation2 + $0x118] sm:$0xf0]  ;;  %v7616_v40 = vor.u32 %v9976_v36, %v7615_v35  ;;  %v9972_v44 = vld [vmem:[#allocation2 + $0x374] sm:$0xf0] }
 0x16f   :  { %v1239_v51 = vpop.f32.mrf.mxu2  ;;  %2177 = vmatpush.bf16.msrb.mxu2 %v7456_v45  ;;  %v7300_v41 = vor.u32 %v9894_v37, %v7297_v19  ;;  %v9938_v45 = vld [vmem:[#allocation2 + $0x26c] sm:$0xf]  ;;  %v7600_v47 = vor.u32 %v9972_v44, %v7599_v43  ;;  %v7553_v35 = vld [vmem:[#allocation2 + $0x318] sm:$0xf0]  ;;  %v7735_v19 = vld [vmem:[#allocation4 + $0x80] sm:$0xf] }
 0x170   :  { %v1240_v55 = vadd.f32 %v1239_v51, %v1227_v48  ;;  %v1252_v56 = vpop.f32.mrf.mxu3  ;;  %v10051_v43 = vld [vmem:[#allocation4 + $0x1ec] sm:$0xf0] }
 0x171   :  { %2204 = vmatpush.bf16.msra.mxu0 %v7188_v46  ;;  %v7473_v46 = vld [vmem:[#allocation2 + $0x278] sm:$0xf0] }
 0x172   :  { %v1253_v61 = vadd.f32 %v1252_v56, %v1240_v55  ;;  %2213 = vmatpush.bf16.msra.mxu1 %v7380_v49  ;;  %v7476_v48 = vor.u32 %v9938_v45, %v7473_v46  ;;  %v7583_v49 = vld [vmem:[#allocation2 + $0x348] sm:$0xf]  ;;  %v9964_v55 = vld [vmem:[#allocation2 + $0x334] sm:$0xf0]  ;;  %v9930_v56 = vld [vmem:[#allocation2 + $0x22c] sm:$0xf] }
 0x173   :  { %2178 = vmatpush.bf16.msrb.mxu2 %v7440_v57  ;;  %v7584_v51 = vor.u32 %v9968_v1, %v7583_v49  ;;  %v7441_v57 = vld [vmem:[#allocation2 + $0x238] sm:$0xf0]  ;;  %v7895_v1 = vld [vmem:[#allocation4 + $0x1c0] sm:$0xf] }
 0x174   :  { %v1259_v5 = vmax.f32 %v1253_v61, 0.0  ;;  %v7444_v59 = vor.u32 %v9930_v56, %v7441_v57  ;;  %v9960_v61 = vld [vmem:[#allocation2 + $0x314] sm:$0xf0]  ;;  %v7896_v6 = vor.u32 %v10047_v50, %v7895_v1  ;;  %v10043_v56 = vld [vmem:[#allocation4 + $0x1ac] sm:$0xf0] }
 0x175   :  { %2205 = vmatpush.bf16.msra.mxu0 %v7172_v58  ;;  %v7568_v58 = vor.u32 %v9964_v55, %v7567_v53  ;;  %v7552_v2 = vor.u32 %v9960_v61, %v7551_v60  ;;  %v7879_v53 = vld [vmem:[#allocation4 + $0x1a0] sm:$0xf]  ;;  %v10067_v1 = vld [vmem:[#allocation4 + $0x26c] sm:$0xf0] }
 0x176   :  { %v11647_v9 = vpack.c.bf16 %v1259_v5, %v1259_v5  ;;  %2214 = vmatpush.bf16.msra.mxu1 %v7364_v62  ;;  %v9926_v62 = vld [vmem:[#allocation2 + $0x20c] sm:$0xf]  ;;  %v7649_v5 = vld [vmem:[#allocation2 + $0x3d8] sm:$0xf0]  ;;  %v7863_v60 = vld [vmem:[#allocation4 + $0x180] sm:$0xf] }
 0x177   :  { %v1241_v16 = vpop.f32.mrf.mxu2  ;;  %2179 = vmatpush.bf16.msrb.mxu2 %v7424_v7  ;;  %v7652_v7 = vor.u32 %v9982_v4, %v7649_v5  ;;  %v8039_v4 = vld [vmem:[#allocation4 + $0x2e0] sm:$0xf] }
 0x178   :  { %v1254_v21 = vpop.f32.mrf.mxu3  ;;  %2089 = vmatmul.bf16.vlgmr.msrb.gmra.mxu3 %v11647_v9  ;;  %2206 = vmatmul.bf16.vlgmr.msra.gmra.mxu0 %v11631_v14  ;;  %v7316_v14 = vor.u32 %v9898_v27, %v7313_v29  ;;  %v9970_v16 = vld [vmem:[#allocation2 + $0x36c] sm:$0xf]  ;;  %v7767_v27 = vld [vmem:[#allocation4 + $0xc0] sm:$0xf]  ;;  %v10015_v29 = vld [vmem:[#allocation4 + $0xcc] sm:$0xf0] }
 0x179   :  { %2185 = vmatpush.bf16.msrb.mxu3 %v7664_v8  ;;  %v9978_v8 = vld [vmem:[#allocation2 + $0x3ac] sm:$0xf]  ;;  %v7784_v21 = vor.u32 %v10019_v20, %v7783_v18  ;;  %v7768_v31 = vor.u32 %v10015_v29, %v7767_v27  ;;  %v8023_v18 = vld [vmem:[#allocation4 + $0x2c0] sm:$0xf] }
 0x17a   :  { %2215 = vmatpush.bf16.msra.mxu1 %v7348_v10  ;;  %2180 = vmatmul.bf16.vlgmr.msrb.gmra.mxu2 %v11639_v54  ;;  %v7633_v10 = vld [vmem:[#allocation2 + $0x3b8] sm:$0xf0]  ;;  %v8007_v27 = vld [vmem:[#allocation4 + $0x2a0] sm:$0xf] }
 0x17b   :  { %2224 = vmatpush.bf16.msra.mxu2 %v7540_v11  ;;  %v7636_v11 = vor.u32 %v9978_v8, %v7633_v10  ;;  %3036 = vmatpush.bf16.msrb.mxu0 %v7784_v21  ;;  %v10013_v8 = vld [vmem:[#allocation4 + $0xc4] sm:$0xf]  ;;  %v7769_v10 = vld [vmem:[#allocation4 + $0xd0] sm:$0xf0]  ;;  %v10079_v21 = vld [vmem:[#allocation4 + $0x2cc] sm:$0xf0] }
 0x17d   :  { %2186 = vmatpush.bf16.msrb.mxu3 %v7648_v22  ;;  %v7604_v22 = vor.u32 %v9970_v16, %v7601_v17  ;;  %v7831_v16 = vld [vmem:[#allocation4 + $0x140] sm:$0xf]  ;;  %v10031_v17 = vld [vmem:[#allocation4 + $0x14c] sm:$0xf0] }
 0x17e   :  { %2216 = vmatpush.bf16.msra.mxu1 %v7332_v23  ;;  %v9966_v23 = vld [vmem:[#allocation2 + $0x34c] sm:$0xf]  ;;  %v7832_v20 = vor.u32 %v10031_v17, %v7831_v16  ;;  %v7865_v17 = vld [vmem:[#allocation4 + $0x190] sm:$0xf0] }
 0x17f   :  { %2225 = vmatpush.bf16.msra.mxu2 %v7524_v24  ;;  %v7585_v24 = vld [vmem:[#allocation2 + $0x358] sm:$0xf0]  ;;  %3037 = vmatpush.bf16.msrb.mxu0 %v7768_v31  ;;  %v10005_v31 = vld [vmem:[#allocation4 + $0x84] sm:$0xf] }
 0x180   :  { %v7588_v25 = vor.u32 %v9966_v23, %v7585_v24  ;;  %v7753_v23 = vld [vmem:[#allocation4 + $0xb0] sm:$0xf0]  ;;  %v8024_v24 = vor.u32 %v10079_v21, %v8023_v18  ;;  %v10055_v21 = vld [vmem:[#allocation4 + $0x20c] sm:$0xf0] }
 0x181   :  { %2187 = vmatpush.bf16.msrb.mxu3 %v7632_v32  ;;  %v7751_v32 = vld [vmem:[#allocation4 + $0xa0] sm:$0xf] }
 0x182   :  { %2217 = vmatpush.bf16.msra.mxu1 %v7316_v14  ;;  %v10011_v14 = vld [vmem:[#allocation4 + $0xac] sm:$0xf0] }
 0x183   :  { %2226 = vmatpush.bf16.msra.mxu2 %v7508_v33  ;;  %v9958_v33 = vld [vmem:[#allocation2 + $0x30c] sm:$0xf]  ;;  %v7752_v36 = vor.u32 %v10011_v14, %v7751_v32  ;;  %v7737_v32 = vld [vmem:[#allocation4 + $0x90] sm:$0xf0] }
 0x184   :  { %v7556_v37 = vor.u32 %v9958_v33, %v7553_v35 }
 0x185   :  { %2188 = vmatpush.bf16.msrb.mxu3 %v7616_v40  ;;  %3038 = vmatpush.bf16.msrb.mxu0 %v7752_v36  ;;  %v7736_v40 = vor.u32 %v10007_v38, %v7735_v19  ;;  %v7740_v36 = vor.u32 %v10005_v31, %v7737_v32  ;;  %v10023_v19 = vld [vmem:[#allocation4 + $0x10c] sm:$0xf0]  ;;  %v7991_v38 = vld [vmem:[#allocation4 + $0x280] sm:$0xf] }
 0x186   :  { %2218 = vmatpush.bf16.msra.mxu1 %v7300_v41  ;;  %v10003_v41 = vld [vmem:[#allocation4 + $0x6c] sm:$0xf0]  ;;  %v8151_v32 = vld [vmem:[#allocation4 + $0x3c0] sm:$0xf] }
 0x187   :  { %2227 = vmatpush.bf16.msra.mxu2 %v7492_v42  ;;  %v7911_v42 = vld [vmem:[#allocation4 + $0x1e0] sm:$0xf]  ;;  %v7720_v45 = vor.u32 %v10003_v41, %v7719_v39  ;;  %v10071_v39 = vld [vmem:[#allocation4 + $0x28c] sm:$0xf0] }
 0x188   :  { %2141 = vmatmul.bf16.vlgmr.msra.gmra.mxu3 %v11647_v9  ;;  %v7912_v44 = vor.u32 %v10051_v43, %v7911_v42  ;;  %v7992_v41 = vor.u32 %v10071_v39, %v7991_v38  ;;  %v10001_v42 = vld [vmem:[#allocation4 + $0x64] sm:$0xf]  ;;  %v7721_v43 = vld [vmem:[#allocation4 + $0x70] sm:$0xf0] }
 0x189   :  { %2189 = vmatpush.bf16.msrb.mxu3 %v7600_v47  ;;  %2219 = vmatmul.bf16.vlgmr.msra.gmra.mxu1 %v11634_v28  ;;  %v7428_v28 = vor.u32 %v9926_v62, %v7425_v34  ;;  %v7703_v47 = vld [vmem:[#allocation4 + $0x40] sm:$0xf]  ;;  %v10039_v62 = vld [vmem:[#allocation4 + $0x18c] sm:$0xf0]  ;;  %v10017_v34 = vld [vmem:[#allocation4 + $0xe4] sm:$0xf] }
 0x18a   :  { %3039 = vmatpush.bf16.msrb.mxu0 %v7736_v40  ;;  %3049 = vmatpush.bf16.msrb.mxu1 %v7912_v44  ;;  %v7864_v0 = vor.u32 %v10039_v62, %v7863_v60  ;;  %v10049_v44 = vld [vmem:[#allocation4 + $0x1e4] sm:$0xf]  ;;  %v7689_v62 = vld [vmem:[#allocation4 + $0x30] sm:$0xf0] }
 0x18b   :  { %2228 = vmatpush.bf16.msra.mxu2 %v7476_v48  ;;  %v9999_v48 = vld [vmem:[#allocation4 + $0x4c] sm:$0xf0] }
 0x18c   :  { %v7704_v49 = vor.u32 %v9999_v48, %v7703_v47  ;;  %v7913_v47 = vld [vmem:[#allocation4 + $0x1f0] sm:$0xf0] }
 0x18d   :  { %2190 = vmatpush.bf16.msrb.mxu3 %v7584_v51  ;;  %v7687_v51 = vld [vmem:[#allocation4 + $0x20] sm:$0xf]  ;;  %v7916_v48 = vor.u32 %v10049_v44, %v7913_v47  ;;  %v7817_v47 = vld [vmem:[#allocation4 + $0x130] sm:$0xf0] }
 0x18e   :  { %3040 = vmatpush.bf16.msrb.mxu0 %v7720_v45  ;;  %3050 = vmatpush.bf16.msrb.mxu1 %v7896_v6  ;;  %v7724_v45 = vor.u32 %v10001_v42, %v7721_v43  ;;  %v9997_v6 = vld [vmem:[#allocation4 + $0x44] sm:$0xf]  ;;  %v8135_v42 = vld [vmem:[#allocation4 + $0x3a0] sm:$0xf]  ;;  %v10107_v43 = vld [vmem:[#allocation4 + $0x3ac] sm:$0xf0] }
 0x18f   :  { %2229 = vmatpush.bf16.msra.mxu2 %v7460_v52  ;;  %v9995_v52 = vld [vmem:[#allocation4 + $0x2c] sm:$0xf0]  ;;  %v8136_v44 = vor.u32 %v10107_v43, %v8135_v42  ;;  %v7775_v42 = vld [vmem:[#allocation4 + $0xc8] sm:$0xf]  ;;  %v10016_v43 = vld [vmem:[#allocation4 + $0xd4] sm:$0xf0] }
 0x190   :  { %v7688_v55 = vor.u32 %v9995_v52, %v7687_v51  ;;  %v7705_v51 = vld [vmem:[#allocation4 + $0x50] sm:$0xf0]  ;;  %v10045_v52 = vld [vmem:[#allocation4 + $0x1c4] sm:$0xf] }
 0x191   :  { %2191 = vmatpush.bf16.msrb.mxu3 %v7568_v58  ;;  %v7880_v58 = vor.u32 %v10043_v56, %v7879_v53  ;;  %v7708_v56 = vor.u32 %v9997_v6, %v7705_v51  ;;  %v11674_v6 = vld [vmem:[%s12666_s6] sm:$0xf] }
 0x192   :  { %3041 = vmatpush.bf16.msrb.mxu0 %v7704_v49  ;;  %v7975_v49 = vld [vmem:[#allocation4 + $0x260] sm:$0xf] }
 0x193   :  { %2230 = vmatpush.bf16.msra.mxu2 %v7444_v59  ;;  %v7671_v59 = vld [vmem:[#allocation4] sm:$0xf]  ;;  %3051 = vmatpush.bf16.msrb.mxu1 %v7880_v58  ;;  %v7976_v50 = vor.u32 %v10067_v1, %v7975_v49  ;;  %v8009_v1 = vld [vmem:[#allocation4 + $0x2b0] sm:$0xf0] }
 0x194   :  { %v8119_v51 = vld [vmem:[#allocation4 + $0x380] sm:$0xf] }
 0x195   :  { %2192 = vmatpush.bf16.msrb.mxu3 %v7552_v2  ;;  %v7788_v2 = vor.u32 %v10017_v34, %v7785_v63  ;;  %v10041_v34 = vld [vmem:[#allocation4 + $0x1a4] sm:$0xf] }
 0x196   :  { %3042 = vmatpush.bf16.msrb.mxu0 %v7688_v55 }
 0x197   :  { %2231 = vmatpush.bf16.msra.mxu2 %v7428_v28  ;;  %3052 = vmatpush.bf16.msrb.mxu1 %v7864_v0  ;;  %v7847_v28 = vld [vmem:[#allocation4 + $0x160] sm:$0xf]  ;;  %v7881_v0 = vld [vmem:[#allocation4 + $0x1b0] sm:$0xf0] }
 0x198   :  { %2193 = vmatmul.bf16.vlgmr.msrb.gmra.mxu3 %v11647_v9 }
 0x199   :  { %2237 = vmatpush.bf16.msra.mxu3 %v7668_v3  ;;  %v10035_v3 = vld [vmem:[#allocation4 + $0x16c] sm:$0xf0] }
 0x19a   :  { %2232 = vmatmul.bf16.vlgmr.msra.gmra.mxu2 %v11639_v54  ;;  %v7569_v54 = vld [vmem:[#allocation2 + $0x338] sm:$0xf0]  ;;  %v7848_v5 = vor.u32 %v10035_v3, %v7847_v28  ;;  %v7943_v28 = vld [vmem:[#allocation4 + $0x220] sm:$0xf]  ;;  %v10059_v3 = vld [vmem:[#allocation4 + $0x22c] sm:$0xf0] }
 0x19b   :  { %v7572_v30 = vor.u32 %v9962_v26, %v7569_v54  ;;  %v7815_v26 = vld [vmem:[#allocation4 + $0x120] sm:$0xf]  ;;  %v10027_v54 = vld [vmem:[#allocation4 + $0x12c] sm:$0xf0] }
 0x19c   :  { %3053 = vmatpush.bf16.msrb.mxu1 %v7848_v5  ;;  %v7816_v29 = vor.u32 %v10027_v54, %v7815_v26  ;;  %v7944_v5 = vor.u32 %v10059_v3, %v7943_v28  ;;  %v7849_v26 = vld [vmem:[#allocation4 + $0x170] sm:$0xf0]  ;;  %v10065_v3 = vld [vmem:[#allocation4 + $0x264] sm:$0xf] }
 0x19d   :  { %2238 = vmatpush.bf16.msra.mxu3 %v7652_v7  ;;  %v10083_v7 = vld [vmem:[#allocation4 + $0x2ec] sm:$0xf0] }
 0x19e   :  { %v8040_v13 = vor.u32 %v10083_v7, %v8039_v4  ;;  %v9989_v7 = vld [vmem:[#allocation4 + $0x4] sm:$0xf] }
 0x1a0   :  { %3062 = vmatpush.bf16.msrb.mxu2 %v8040_v13  ;;  %3054 = vmatpush.bf16.msrb.mxu1 %v7832_v20  ;;  %v7927_v20 = vld [vmem:[#allocation4 + $0x200] sm:$0xf] }
 0x1a1   :  { %2239 = vmatpush.bf16.msra.mxu3 %v7636_v11 }
 0x1a4   :  { %3063 = vmatpush.bf16.msrb.mxu2 %v8024_v24  ;;  %3055 = vmatpush.bf16.msrb.mxu1 %v7816_v29  ;;  %v10115_v24 = vld [vmem:[#allocation4 + $0x3ec] sm:$0xf0]  ;;  %v10081_v29 = vld [vmem:[#allocation4 + $0x2e4] sm:$0xf] }
 0x1a5   :  { %2240 = vmatpush.bf16.msra.mxu3 %v7620_v15  ;;  %v7772_v15 = vor.u32 %v10013_v8, %v7769_v10  ;;  %v7673_v8 = vld [vmem:[#allocation4 + $0x10] sm:$0xf0]  ;;  %v10037_v10 = vld [vmem:[#allocation4 + $0x184] sm:$0xf] }
 0x1a6   :  { %v7676_v16 = vor.u32 %v9989_v7, %v7673_v8  ;;  %v7868_v18 = vor.u32 %v10037_v10, %v7865_v17 }
 0x1a9   :  { %2241 = vmatpush.bf16.msra.mxu3 %v7604_v22  ;;  %v10009_v22 = vld [vmem:[#allocation4 + $0xa4] sm:$0xf] }
 0x1ad   :  { %2242 = vmatpush.bf16.msra.mxu3 %v7588_v25  ;;  %v7756_v25 = vor.u32 %v10009_v22, %v7753_v23  ;;  %v8167_v22 = vld [vmem:[#allocation4 + $0x3e0] sm:$0xf]  ;;  %v7928_v23 = vor.u32 %v10055_v21, %v7927_v20  ;;  %v7961_v20 = vld [vmem:[#allocation4 + $0x250] sm:$0xf0] }
 0x1ae   :  { %v8168_v54 = vor.u32 %v10115_v24, %v8167_v22  ;;  %v8071_v24 = vld [vmem:[#allocation4 + $0x320] sm:$0xf] }
 0x1b1   :  { %2243 = vmatpush.bf16.msra.mxu3 %v7572_v30  ;;  %v10075_v30 = vld [vmem:[#allocation4 + $0x2ac] sm:$0xf0] }
 0x1b2   :  { %v8008_v35 = vor.u32 %v10075_v30, %v8007_v27  ;;  %v8041_v30 = vld [vmem:[#allocation4 + $0x2f0] sm:$0xf0] }
 0x1b3   :  { %v8044_v31 = vor.u32 %v10081_v29, %v8041_v30  ;;  %v7791_v30 = vld [vmem:[#allocation4 + $0xe8] sm:$0xf] }
 0x1b4   :  { %3064 = vmatpush.bf16.msrb.mxu2 %v8008_v35 }
 0x1b5   :  { %2244 = vmatpush.bf16.msra.mxu3 %v7556_v37  ;;  %v11657_v46 = vpop.f32.mrf.mxu0  ;;  %v7799_v37 = vld [vmem:[#allocation4 + $0x100] sm:$0xf] }
 0x1b6   :  { %v7800_v40 = vor.u32 %v10023_v19, %v7799_v37  ;;  %v7833_v37 = vld [vmem:[#allocation4 + $0x150] sm:$0xf0]  ;;  %v10077_v19 = vld [vmem:[#allocation4 + $0x2c4] sm:$0xf] }
 0x1b8   :  { %2245 = vmatmul.bf16.vlgmr.msra.gmra.mxu3 %v11647_v9  ;;  %v9991_v9 = vld [vmem:[#allocation4 + $0xc] sm:$0xf0]  ;;  %3056 = vmatpush.bf16.msrb.mxu1 %v7800_v40  ;;  %v8025_v40 = vld [vmem:[#allocation4 + $0x2d0] sm:$0xf0] }
 0x1b9   :  { %v7672_v61 = vor.u32 %v9991_v9, %v7671_v59  ;;  %3065 = vmatpush.bf16.msrb.mxu2 %v7992_v41  ;;  %v7959_v59 = vld [vmem:[#allocation4 + $0x240] sm:$0xf]  ;;  %v10063_v9 = vld [vmem:[#allocation4 + $0x24c] sm:$0xf0]  ;;  %3075 = vmatpush.bf16.msrb.mxu3 %v8168_v54  ;;  %v8028_v41 = vor.u32 %v10077_v19, %v8025_v40  ;;  %v10053_v19 = vld [vmem:[#allocation4 + $0x204] sm:$0xf] }
 0x1ba   :  { %v7960_v60 = vor.u32 %v10063_v9, %v7959_v59  ;;  %v7801_v59 = vld [vmem:[#allocation4 + $0x110] sm:$0xf0]  ;;  %v10069_v9 = vld [vmem:[#allocation4 + $0x284] sm:$0xf] }
 0x1bb   :  { %3043 = vmatpush.bf16.msrb.mxu0 %v7672_v61  ;;  %v9993_v61 = vld [vmem:[#allocation4 + $0x24] sm:$0xf] }
 0x1bc   :  { %3101 = vmatpush.bf16.msra.mxu1 %v7916_v48  ;;  %v7692_v63 = vor.u32 %v9993_v61, %v7689_v62  ;;  %v10073_v48 = vld [vmem:[#allocation4 + $0x2a4] sm:$0xf]  ;;  %v7993_v62 = vld [vmem:[#allocation4 + $0x290] sm:$0xf0] }
 0x1bd   :  { %v2053_v57 = vpop.f32.mrf.mxu0  ;;  %3066 = vmatpush.bf16.msrb.mxu2 %v7976_v50  ;;  %v8012_v50 = vor.u32 %v10073_v48, %v8009_v1  ;;  %v10113_v40 = vld [vmem:[#allocation4 + $0x3e4] sm:$0xf]  ;;  %v1395_v48 = vperm.slane %v11674_v6, 1  ;;  %v7776_v1 = vor.u32 %v10016_v43, %v7775_v42 }
 0x1be   :  { %v7897_v57 = vld [vmem:[#allocation4 + $0x1d0] sm:$0xf0] }
 0x1bf   :  { %3088 = vmatpush.bf16.msra.mxu0 %v7788_v2  ;;  %v7900_v58 = vor.u32 %v10045_v52, %v7897_v57  ;;  %v7884_v2 = vor.u32 %v10041_v34, %v7881_v0  ;;  %v10103_v52 = vld [vmem:[#allocation4 + $0x38c] sm:$0xf0]  ;;  %v7996_v34 = vor.u32 %v10069_v9, %v7993_v62  ;;  %v8103_v0 = vld [vmem:[#allocation4 + $0x360] sm:$0xf]  ;;  %v7743_v62 = vld [vmem:[#allocation4 + $0x88] sm:$0xf] }
 0x1c0   :  { %v8120_v57 = vor.u32 %v10103_v52, %v8119_v51  ;;  %v10012_v51 = vld [vmem:[#allocation4 + $0xb4] sm:$0xf0]  ;;  %v10109_v52 = vld [vmem:[#allocation4 + $0x3c4] sm:$0xf] }
 0x1c1   :  { %3102 = vmatpush.bf16.msra.mxu1 %v7900_v58  ;;  %3067 = vmatpush.bf16.msrb.mxu2 %v7960_v60  ;;  %v10021_v58 = vld [vmem:[#allocation4 + $0x104] sm:$0xf] }
 0x1c2   :  { %v7804_v61 = vor.u32 %v10021_v58, %v7801_v59 }
 0x1c3   :  { %3089 = vmatpush.bf16.msra.mxu0 %v7772_v15 }
 0x1c5   :  { %v11659_v11 = vpop.f32.mrf.mxu1  ;;  %v11661_v12 = vpop.f32.mrf.mxu0  ;;  %3103 = vmatpush.bf16.msra.mxu1 %v7884_v2  ;;  %3068 = vmatpush.bf16.msrb.mxu2 %v7944_v5  ;;  %v10099_v2 = vld [vmem:[#allocation4 + $0x36c] sm:$0xf0]  ;;  %v7977_v5 = vld [vmem:[#allocation4 + $0x270] sm:$0xf0] }
 0x1c6   :  { %v8104_v28 = vor.u32 %v10099_v2, %v8103_v0  ;;  %v7980_v7 = vor.u32 %v10065_v3, %v7977_v5  ;;  %v2104_v59 = vadd.f32 %v11661_v12, %v1395_v48  ;;  %v10105_v0 = vld [vmem:[#allocation4 + $0x3a4] sm:$0xf]  ;;  %v8137_v2 = vld [vmem:[#allocation4 + $0x3b0] sm:$0xf0]  ;;  %v10004_v12 = vld [vmem:[#allocation4 + $0x74] sm:$0xf0] }
 0x1c7   :  { %3090 = vmatpush.bf16.msra.mxu0 %v7756_v25  ;;  %v10033_v25 = vld [vmem:[#allocation4 + $0x164] sm:$0xf] }
 0x1c8   :  { %v7852_v27 = vor.u32 %v10033_v25, %v7849_v26  ;;  %v10091_v25 = vld [vmem:[#allocation4 + $0x32c] sm:$0xf0] }
 0x1c9   :  { %3104 = vmatpush.bf16.msra.mxu1 %v7868_v18  ;;  %3069 = vmatpush.bf16.msrb.mxu2 %v7928_v23  ;;  %v10061_v18 = vld [vmem:[#allocation4 + $0x244] sm:$0xf]  ;;  %v8072_v54 = vor.u32 %v10091_v25, %v8071_v24  ;;  %v7711_v24 = vld [vmem:[#allocation4 + $0x48] sm:$0xf]  ;;  %v10000_v25 = vld [vmem:[#allocation4 + $0x54] sm:$0xf0] }
 0x1ca   :  { %v7964_v22 = vor.u32 %v10061_v18, %v7961_v20  ;;  %v8121_v18 = vld [vmem:[#allocation4 + $0x390] sm:$0xf0] }
 0x1cb   :  { %3091 = vmatpush.bf16.msra.mxu0 %v7740_v36  ;;  %v10029_v36 = vld [vmem:[#allocation4 + $0x144] sm:$0xf] }
 0x1cc   :  { %v7836_v39 = vor.u32 %v10029_v36, %v7833_v37 }
 0x1cd   :  { %v2066_v14 = vpop.f32.mrf.mxu1  ;;  %v2105_v33 = vpop.f32.mrf.mxu0  ;;  %3105 = vmatpush.bf16.msra.mxu1 %v7852_v27  ;;  %3114 = vmatpush.bf16.msra.mxu2 %v8044_v31  ;;  %v7945_v27 = vld [vmem:[#allocation4 + $0x230] sm:$0xf0]  ;;  %v10020_v31 = vld [vmem:[#allocation4 + $0xf4] sm:$0xf0] }
 0x1ce   :  { %v10111_v14 = vld [vmem:[#allocation4 + $0x3cc] sm:$0xf0] }
 0x1cf   :  { %3092 = vmatpush.bf16.msra.mxu0 %v7724_v45  ;;  %v8152_v35 = vor.u32 %v10111_v14, %v8151_v32  ;;  %v10025_v45 = vld [vmem:[#allocation4 + $0x124] sm:$0xf] }
 0x1d0   :  { %v7820_v49 = vor.u32 %v10025_v45, %v7817_v47  ;;  %v8169_v45 = vld [vmem:[#allocation4 + $0x3f0] sm:$0xf0] }
 0x1d1   :  { %3076 = vmatpush.bf16.msrb.mxu3 %v8152_v35  ;;  %3106 = vmatpush.bf16.msra.mxu1 %v7836_v39  ;;  %v8055_v35 = vld [vmem:[#allocation4 + $0x300] sm:$0xf]  ;;  %v7929_v39 = vld [vmem:[#allocation4 + $0x210] sm:$0xf0]  ;;  %v8172_v47 = vor.u32 %v10113_v40, %v8169_v45  ;;  %v9992_v45 = vld [vmem:[#allocation4 + $0x14] sm:$0xf0] }
 0x1d2   :  { %3115 = vmatpush.bf16.msra.mxu2 %v8028_v41 }
 0x1d3   :  { %3093 = vmatpush.bf16.msra.mxu0 %v7708_v56 }
 0x1d5   :  { %v11663_v53 = vpop.f32.mrf.mxu1  ;;  %v11665_v55 = vpop.f32.mrf.mxu0  ;;  %3077 = vmatpush.bf16.msrb.mxu3 %v8136_v44  ;;  %3107 = vmatpush.bf16.msra.mxu1 %v7820_v49  ;;  %v7932_v44 = vor.u32 %v10053_v19, %v7929_v39  ;;  %v8089_v19 = vld [vmem:[#allocation4 + $0x350] sm:$0xf0] }
 0x1d6   :  { %3116 = vmatpush.bf16.msra.mxu2 %v8012_v50  ;;  %v7759_v50 = vld [vmem:[#allocation4 + $0xa8] sm:$0xf] }
 0x1d7   :  { %3094 = vmatpush.bf16.msra.mxu0 %v7692_v63  ;;  %v1394_v63 = vperm.slane %v11674_v6, 0 }
 0x1d9   :  { %3078 = vmatpush.bf16.msrb.mxu3 %v8120_v57  ;;  %3108 = vmatpush.bf16.msra.mxu1 %v7804_v61  ;;  %v2052_v10 = vadd.f32 %v11657_v46, %v1394_v63  ;;  %v10057_v46 = vld [vmem:[#allocation4 + $0x224] sm:$0xf]  ;;  %v8153_v57 = vld [vmem:[#allocation4 + $0x3d0] sm:$0xf0]  ;;  %v7760_v61 = vor.u32 %v10012_v51, %v7759_v50  ;;  %v10008_v63 = vld [vmem:[#allocation4 + $0x94] sm:$0xf0] }
 0x1da   :  { %3117 = vmatpush.bf16.msra.mxu2 %v7996_v34  ;;  %v7948_v32 = vor.u32 %v10057_v46, %v7945_v27  ;;  %v8156_v58 = vor.u32 %v10109_v52, %v8153_v57  ;;  %v2117_v34 = vadd.f32 %v11663_v53, %v2104_v59  ;;  %v10097_v46 = vld [vmem:[#allocation4 + $0x364] sm:$0xf]  ;;  %v8105_v27 = vld [vmem:[#allocation4 + $0x370] sm:$0xf0]  ;;  %v10018_v51 = vld [vmem:[#allocation4 + $0xec] sm:$0xf] }
 0x1db   :  { %3095 = vmatpush.bf16.msra.mxu0 %v7676_v16  ;;  %v2065_v21 = vadd.f32 %v11659_v11, %v2052_v10  ;;  %v10087_v11 = vld [vmem:[#allocation4 + $0x30c] sm:$0xf0]  ;;  %v7727_v10 = vld [vmem:[#allocation4 + $0x68] sm:$0xf]  ;;  %v8073_v50 = vld [vmem:[#allocation4 + $0x330] sm:$0xf0] }
 0x1dc   :  { %v11667_v4 = vpop.f32.mrf.mxu2  ;;  %v8056_v37 = vor.u32 %v10087_v11, %v8055_v35  ;;  %v9996_v35 = vld [vmem:[#allocation4 + $0x34] sm:$0xf0]  ;;  %v7887_v11 = vld [vmem:[#allocation4 + $0x1a8] sm:$0xf]  ;;  %v7793_v52 = vld [vmem:[#allocation4 + $0xf8] sm:$0xf0] }
 0x1dd   :  { %v2118_v13 = vpop.f32.mrf.mxu1  ;;  %v2157_v15 = vpop.f32.mrf.mxu0  ;;  %3079 = vmatpush.bf16.msrb.mxu3 %v8104_v28  ;;  %v2078_v23 = vadd.f32 %v11667_v4, %v2065_v21  ;;  %v7792_v4 = vor.u32 %v10020_v31, %v7791_v30  ;;  %v8140_v28 = vor.u32 %v10105_v0, %v8137_v2  ;;  %v1396_v30 = vperm.slane %v11674_v6, 2  ;;  %v8047_v0 = vld [vmem:[#allocation4 + $0x2e8] sm:$0xf]  ;;  %v10085_v2 = vld [vmem:[#allocation4 + $0x304] sm:$0xf] }
 0x1de   :  { %v8087_v13 = vld [vmem:[#allocation4 + $0x340] sm:$0xf]  ;;  %v10095_v15 = vld [vmem:[#allocation4 + $0x34c] sm:$0xf0]  ;;  %3118 = vmatpush.bf16.msra.mxu2 %v7980_v7  ;;  %v7744_v7 = vor.u32 %v10008_v63, %v7743_v62  ;;  %v10036_v62 = vld [vmem:[#allocation4 + $0x174] sm:$0xf0] }
 0x1df   :  { %v8088_v17 = vor.u32 %v10095_v15, %v8087_v13  ;;  %v7919_v13 = vld [vmem:[#allocation4 + $0x1e8] sm:$0xf]  ;;  %v2156_v40 = vadd.f32 %v11665_v55, %v1396_v30  ;;  %v10076_v30 = vld [vmem:[#allocation4 + $0x2b4] sm:$0xf0] }
 0x1e1   :  { %3080 = vmatpush.bf16.msrb.mxu3 %v8088_v17  ;;  %v10101_v17 = vld [vmem:[#allocation4 + $0x384] sm:$0xf] }
 0x1e2   :  { %3119 = vmatpush.bf16.msra.mxu2 %v7964_v22  ;;  %v8124_v20 = vor.u32 %v10101_v17, %v8121_v18  ;;  %v7728_v22 = vor.u32 %v10004_v12, %v7727_v10  ;;  %v7839_v17 = vld [vmem:[#allocation4 + $0x148] sm:$0xf]  ;;  %v10032_v18 = vld [vmem:[#allocation4 + $0x154] sm:$0xf0] }
 0x1e4   :  { %v2079_v33 = vpop.f32.mrf.mxu2 }
 0x1e5   :  { %3081 = vmatpush.bf16.msrb.mxu3 %v8072_v54  ;;  %v10048_v54 = vld [vmem:[#allocation4 + $0x1d4] sm:$0xf0] }
 0x1e6   :  { %v11669_v38 = vpop.f32.mrf.mxu1  ;;  %3120 = vmatpush.bf16.msra.mxu2 %v7948_v32  ;;  %v7712_v32 = vor.u32 %v10000_v25, %v7711_v24  ;;  %v7840_v24 = vor.u32 %v10032_v18, %v7839_v17  ;;  %v7873_v17 = vld [vmem:[#allocation4 + $0x198] sm:$0xf0] }
 0x1e7   :  { %v2169_v48 = vadd.f32 %v11669_v38, %v2156_v40  ;;  %v7796_v38 = vor.u32 %v10018_v51, %v7793_v52  ;;  %v7729_v40 = vld [vmem:[#allocation4 + $0x78] sm:$0xf0]  ;;  %v10046_v52 = vld [vmem:[#allocation4 + $0x1cc] sm:$0xf] }
 0x1e8   :  { %v7713_v51 = vld [vmem:[#allocation4 + $0x58] sm:$0xf0] }
 0x1e9   :  { %3082 = vmatpush.bf16.msrb.mxu3 %v8056_v37  ;;  %v10093_v37 = vld [vmem:[#allocation4 + $0x344] sm:$0xf] }
 0x1ea   :  { %3121 = vmatpush.bf16.msra.mxu2 %v7932_v44  ;;  %v8092_v39 = vor.u32 %v10093_v37, %v8089_v19  ;;  %v7679_v44 = vld [vmem:[#allocation4 + $0x8] sm:$0xf]  ;;  %v10072_v19 = vld [vmem:[#allocation4 + $0x294] sm:$0xf0] }
 0x1eb   :  { %v7680_v59 = vor.u32 %v9992_v45, %v7679_v44  ;;  %v7999_v37 = vld [vmem:[#allocation4 + $0x288] sm:$0xf] }
 0x1ec   :  { %v8000_v45 = vor.u32 %v10072_v19, %v7999_v37  ;;  %v10078_v37 = vld [vmem:[#allocation4 + $0x2cc] sm:$0xf]  ;;  %v8033_v19 = vld [vmem:[#allocation4 + $0x2d8] sm:$0xf0] }
 0x1ed   :  { %v11676_v56 = vpop.f32.mrf.mxu2  ;;  %3127 = vmatpush.bf16.msra.mxu3 %v8172_v47  ;;  %v7871_v47 = vld [vmem:[#allocation4 + $0x188] sm:$0xf] }
 0x1ee   :  { %v2170_v60 = vpop.f32.mrf.mxu1  ;;  %v2130_v3 = vadd.f32 %v11676_v56, %v2117_v34  ;;  %v7903_v56 = vld [vmem:[#allocation4 + $0x1c8] sm:$0xf] }
 0x1f1   :  { %3128 = vmatpush.bf16.msra.mxu3 %v8156_v58 }
 0x1f5   :  { %v11679_v8 = vpop.f32.mrf.mxu0  ;;  %v2131_v16 = vpop.f32.mrf.mxu2  ;;  %3129 = vmatpush.bf16.msra.mxu3 %v8140_v28  ;;  %v8057_v28 = vld [vmem:[#allocation4 + $0x310] sm:$0xf0] }
 0x1f6   :  { %v10052_v16 = vld [vmem:[#allocation4 + $0x1f4] sm:$0xf0]  ;;  %v8060_v10 = vor.u32 %v10085_v2, %v8057_v28  ;;  %v7889_v2 = vld [vmem:[#allocation4 + $0x1b8] sm:$0xf0] }
 0x1f9   :  { %3130 = vmatpush.bf16.msra.mxu3 %v8124_v20  ;;  %v8031_v20 = vld [vmem:[#allocation4 + $0x2c8] sm:$0xf] }
 0x1fb   :  { %v2090_v26 = vpop.f32.mrf.mxu3 }
 0x1fc   :  { %v2091_v29 = vadd.f32 %v2090_v26, %v2078_v23  ;;  %v7920_v23 = vor.u32 %v10052_v16, %v7919_v13 }
 0x1fd   :  { %v2209_v14 = vpop.f32.mrf.mxu0  ;;  %v11684_v36 = vpop.f32.mrf.mxu2 }
 0x1fe   :  { %v2250_v33 = vmax.f32 %v2091_v29, 0.0  ;;  %v8108_v29 = vor.u32 %v10097_v46, %v8105_v27  ;;  %v7904_v14 = vor.u32 %v10048_v54, %v7903_v56  ;;  %v2182_v58 = vadd.f32 %v11684_v36, %v2169_v48  ;;  %v7823_v46 = vld [vmem:[#allocation4 + $0x128] sm:$0xf]  ;;  %v10028_v27 = vld [vmem:[#allocation4 + $0x134] sm:$0xf0] }
 0x1ff   :  { %v7983_v48 = vld [vmem:[#allocation4 + $0x268] sm:$0xf] }
 0x200   :  { %v11686_v41 = vpack.c.bf16 %v2250_v33, %v2250_v33  ;;  %v7695_v33 = vld [vmem:[#allocation4 + $0x28] sm:$0xf]  ;;  %3131 = vmatpush.bf16.msra.mxu3 %v8108_v29 }
 0x201   :  { %v7696_v42 = vor.u32 %v9996_v35, %v7695_v33  ;;  %v8015_v29 = vld [vmem:[#allocation4 + $0x2a8] sm:$0xf] }
 0x202   :  { %3044 = vmatmul.bf16.vlgmr.msrb.gmra.mxu0 %v11686_v41  ;;  %v8016_v33 = vor.u32 %v10076_v30, %v8015_v29 }
 0x203   :  { %3140 = vmatpush.bf16.msrb.mxu0 %v7792_v4  ;;  %v2092_v49 = vpop.f32.mrf.mxu3  ;;  %v10044_v4 = vld [vmem:[#allocation4 + $0x1b4] sm:$0xf0] }
 0x204   :  { %v7888_v43 = vor.u32 %v10044_v4, %v7887_v11  ;;  %v10040_v49 = vld [vmem:[#allocation4 + $0x194] sm:$0xf0]  ;;  %3132 = vmatpush.bf16.msra.mxu3 %v8092_v39  ;;  %v7807_v11 = vld [vmem:[#allocation4 + $0x108] sm:$0xf]  ;;  %v10002_v39 = vld [vmem:[#allocation4 + $0x6c] sm:$0xf] }
 0x205   :  { %v2183_v60 = vpop.f32.mrf.mxu2  ;;  %v10024_v4 = vld [vmem:[#allocation4 + $0x114] sm:$0xf0] }
 0x206   :  { %v11691_v9 = vpop.f32.mrf.mxu1  ;;  %v7872_v60 = vor.u32 %v10040_v49, %v7871_v47  ;;  %v7808_v44 = vor.u32 %v10024_v4, %v7807_v11  ;;  %v7732_v47 = vor.u32 %v10002_v39, %v7729_v40  ;;  %v10030_v11 = vld [vmem:[#allocation4 + $0x14c] sm:$0xf]  ;;  %v7841_v4 = vld [vmem:[#allocation4 + $0x158] sm:$0xf0] }
 0x207   :  { %3141 = vmatpush.bf16.msrb.mxu0 %v7776_v1  ;;  %v10089_v1 = vld [vmem:[#allocation4 + $0x324] sm:$0xf] }
 0x208   :  { %v8076_v57 = vor.u32 %v10089_v1, %v8073_v50  ;;  %v10068_v1 = vld [vmem:[#allocation4 + $0x274] sm:$0xf0]  ;;  %v9998_v50 = vld [vmem:[#allocation4 + $0x4c] sm:$0xf] }
 0x20a   :  { %3133 = vmatpush.bf16.msra.mxu3 %v8076_v57  ;;  %v7905_v57 = vld [vmem:[#allocation4 + $0x1d8] sm:$0xf0] }
 0x20b   :  { %3142 = vmatpush.bf16.msrb.mxu0 %v7760_v61  ;;  %v2142_v5 = vpop.f32.mrf.mxu3  ;;  %v7855_v61 = vld [vmem:[#allocation4 + $0x168] sm:$0xf] }
 0x20c   :  { %v2143_v15 = vadd.f32 %v2142_v5, %v2130_v3  ;;  %v10084_v3 = vld [vmem:[#allocation4 + $0x2f4] sm:$0xf0]  ;;  %v10014_v5 = vld [vmem:[#allocation4 + $0xcc] sm:$0xf]  ;;  %v7856_v12 = vor.u32 %v10036_v62, %v7855_v61  ;;  %v7908_v61 = vor.u32 %v10046_v52, %v7905_v57  ;;  %v8127_v52 = vld [vmem:[#allocation4 + $0x388] sm:$0xf] }
 0x20d   :  { %v10064_v62 = vld [vmem:[#allocation4 + $0x254] sm:$0xf0] }
 0x20e   :  { %v2251_v53 = vmax.f32 %v2143_v15, 0.0  ;;  %v2222_v21 = vpop.f32.mrf.mxu1  ;;  %v8048_v15 = vor.u32 %v10084_v3, %v8047_v0  ;;  %3134 = vmatpush.bf16.msra.mxu3 %v8060_v10  ;;  %v10042_v0 = vld [vmem:[#allocation4 + $0x1ac] sm:$0xf]  ;;  %v10104_v57 = vld [vmem:[#allocation4 + $0x394] sm:$0xf0] }
 0x20f   :  { %3143 = vmatpush.bf16.msrb.mxu0 %v7744_v7  ;;  %v7777_v7 = vld [vmem:[#allocation4 + $0xd8] sm:$0xf0]  ;;  %v10010_v21 = vld [vmem:[#allocation4 + $0xac] sm:$0xf]  ;;  %v7892_v10 = vor.u32 %v10042_v0, %v7889_v2  ;;  %v10100_v0 = vld [vmem:[#allocation4 + $0x374] sm:$0xf0] }
 0x210   :  { %v11695_v26 = vpack.c.bf16 %v2251_v53, %v2251_v53  ;;  %v7780_v16 = vor.u32 %v10014_v5, %v7777_v7  ;;  %v10080_v53 = vld [vmem:[#allocation4 + $0x2d4] sm:$0xf0]  ;;  %v7951_v5 = vld [vmem:[#allocation4 + $0x228] sm:$0xf]  ;;  %v10066_v2 = vld [vmem:[#allocation4 + $0x26c] sm:$0xf] }
 0x211   :  { %v8032_v56 = vor.u32 %v10080_v53, %v8031_v20 }
 0x212   :  { %3057 = vmatmul.bf16.vlgmr.msrb.gmra.mxu1 %v11695_v26  ;;  %3096 = vmatmul.bf16.vlgmr.msra.gmra.mxu0 %v11686_v41 }
 0x213   :  { %3144 = vmatpush.bf16.msrb.mxu0 %v7728_v22  ;;  %3153 = vmatpush.bf16.msrb.mxu1 %v7920_v23  ;;  %v2144_v31 = vpop.f32.mrf.mxu3  ;;  %v7761_v22 = vld [vmem:[#allocation4 + $0xb8] sm:$0xf0] }
 0x214   :  { %v7764_v54 = vor.u32 %v10010_v21, %v7761_v22  ;;  %v10006_v31 = vld [vmem:[#allocation4 + $0x8c] sm:$0xf]  ;;  %v7935_v21 = vld [vmem:[#allocation4 + $0x208] sm:$0xf]  ;;  %v10056_v22 = vld [vmem:[#allocation4 + $0x214] sm:$0xf0] }
 0x217   :  { %3145 = vmatpush.bf16.msrb.mxu0 %v7712_v32  ;;  %3154 = vmatpush.bf16.msrb.mxu1 %v7904_v14  ;;  %v7745_v32 = vld [vmem:[#allocation4 + $0x98] sm:$0xf0]  ;;  %v7824_v14 = vor.u32 %v10028_v27, %v7823_v46  ;;  %v10082_v46 = vld [vmem:[#allocation4 + $0x2ec] sm:$0xf] }
 0x218   :  { %v7748_v35 = vor.u32 %v10006_v31, %v7745_v32  ;;  %v8049_v27 = vld [vmem:[#allocation4 + $0x2f8] sm:$0xf0] }
 0x21b   :  { %3146 = vmatpush.bf16.msrb.mxu0 %v7696_v42  ;;  %3155 = vmatpush.bf16.msrb.mxu1 %v7888_v43  ;;  %v2194_v55 = vpop.f32.mrf.mxu3  ;;  %v10050_v42 = vld [vmem:[#allocation4 + $0x1ec] sm:$0xf]  ;;  %v7921_v43 = vld [vmem:[#allocation4 + $0x1f8] sm:$0xf0] }
 0x21c   :  { %v2195_v34 = vadd.f32 %v2194_v55, %v2182_v58  ;;  %v7924_v49 = vor.u32 %v10050_v42, %v7921_v43  ;;  %v1397_v58 = vperm.slane %v11674_v6, 3  ;;  %v7984_v55 = vor.u32 %v10068_v1, %v7983_v48  ;;  %v7825_v48 = vld [vmem:[#allocation4 + $0x138] sm:$0xf0] }
 0x21d   :  { %v11703_v63 = vpop.f32.mrf.mxu2  ;;  %v7844_v42 = vor.u32 %v10030_v11, %v7841_v4  ;;  %v8036_v43 = vor.u32 %v10078_v37, %v8033_v19  ;;  %v8017_v1 = vld [vmem:[#allocation4 + $0x2b8] sm:$0xf0]  ;;  %v10098_v11 = vld [vmem:[#allocation4 + $0x36c] sm:$0xf]  ;;  %v8407_v37 = vld [vmem:[#allocation6 + $0x1c0] sm:$0xf] }
 0x21e   :  { %v2252_v36 = vmax.f32 %v2195_v34, 0.0  ;;  %v9994_v34 = vld [vmem:[#allocation4 + $0x2c] sm:$0xf]  ;;  %v2208_v28 = vadd.f32 %v11679_v8, %v1397_v58  ;;  %v8113_v4 = vld [vmem:[#allocation4 + $0x378] sm:$0xf0] }
 0x21f   :  { %3147 = vmatpush.bf16.msrb.mxu0 %v7680_v59  ;;  %3156 = vmatpush.bf16.msrb.mxu1 %v7872_v60  ;;  %v7716_v59 = vor.u32 %v9998_v50, %v7713_v51  ;;  %v7967_v60 = vld [vmem:[#allocation4 + $0x248] sm:$0xf]  ;;  %v10022_v58 = vld [vmem:[#allocation4 + $0x10c] sm:$0xf]  ;;  %v10177_v19 = vld [vmem:[#allocation6 + $0x1dc] sm:$0xf0] }
 0x220   :  { %v11705_v13 = vpack.c.bf16 %v2252_v36, %v2252_v36  ;;  %v7968_v6 = vor.u32 %v10064_v62, %v7967_v60  ;;  %v2221_v7 = vadd.f32 %v11691_v9, %v2208_v28  ;;  %v10060_v36 = vld [vmem:[#allocation4 + $0x234] sm:$0xf0]  ;;  %v8175_v9 = vld [vmem:[#allocation4 + $0x3e8] sm:$0xf]  ;;  %v8001_v60 = vld [vmem:[#allocation4 + $0x298] sm:$0xf0] }
 0x221   :  { %v7952_v8 = vor.u32 %v10060_v36, %v7951_v5  ;;  %v7985_v28 = vld [vmem:[#allocation4 + $0x278] sm:$0xf0]  ;;  %v8095_v5 = vld [vmem:[#allocation4 + $0x348] sm:$0xf] }
 0x222   :  { %3070 = vmatmul.bf16.vlgmr.msrb.gmra.mxu2 %v11705_v13  ;;  %3109 = vmatmul.bf16.vlgmr.msra.gmra.mxu1 %v11695_v26  ;;  %v2234_v18 = vadd.f32 %v11703_v63, %v2221_v7  ;;  %v7936_v63 = vor.u32 %v10056_v22, %v7935_v21  ;;  %v10096_v7 = vld [vmem:[#allocation4 + $0x354] sm:$0xf0]  ;;  %v7969_v36 = vld [vmem:[#allocation4 + $0x258] sm:$0xf0]  ;;  %v8063_v21 = vld [vmem:[#allocation4 + $0x308] sm:$0xf] }
 0x223   :  { %3192 = vmatpush.bf16.msra.mxu0 %v7796_v38  ;;  %3157 = vmatpush.bf16.msrb.mxu1 %v7856_v12  ;;  %v2196_v23 = vpop.f32.mrf.mxu3  ;;  %v7697_v38 = vld [vmem:[#allocation4 + $0x38] sm:$0xf0]  ;;  %v9990_v12 = vld [vmem:[#allocation4 + $0xc] sm:$0xf]  ;;  %v10088_v22 = vld [vmem:[#allocation4 + $0x314] sm:$0xf0] }
 0x224   :  { %3148 = vmatmul.bf16.vlgmr.msrb.gmra.mxu0 %v11686_v41  ;;  %3166 = vmatpush.bf16.msrb.mxu2 %v8048_v15  ;;  %v7700_v3 = vor.u32 %v9994_v34, %v7697_v38  ;;  %v7681_v15 = vld [vmem:[#allocation4 + $0x18] sm:$0xf0]  ;;  %v8111_v38 = vld [vmem:[#allocation4 + $0x368] sm:$0xf] }
 0x225   :  { %v2235_v25 = vpop.f32.mrf.mxu2  ;;  %v7684_v53 = vor.u32 %v9990_v12, %v7681_v15  ;;  %v8096_v12 = vor.u32 %v10096_v7, %v8095_v5  ;;  %v8631_v5 = vld [vmem:[#allocation6 + $0x380] sm:$0xf] }
 0x226   :  { %v10116_v25 = vld [vmem:[#allocation4 + $0x3f4] sm:$0xf0] }
 0x227   :  { %3193 = vmatpush.bf16.msra.mxu0 %v7780_v16  ;;  %3158 = vmatpush.bf16.msrb.mxu1 %v7840_v24  ;;  %v10038_v16 = vld [vmem:[#allocation4 + $0x18c] sm:$0xf]  ;;  %v8176_v30 = vor.u32 %v10116_v25, %v8175_v9  ;;  %v8177_v25 = vld [vmem:[#allocation4 + $0x3f8] sm:$0xf0] }
 0x228   :  { %3167 = vmatpush.bf16.msrb.mxu2 %v8032_v56  ;;  %v7876_v24 = vor.u32 %v10038_v16, %v7873_v17  ;;  %v10034_v56 = vld [vmem:[#allocation4 + $0x16c] sm:$0xf]  ;;  %v8079_v16 = vld [vmem:[#allocation4 + $0x328] sm:$0xf]  ;;  %v10092_v17 = vld [vmem:[#allocation4 + $0x334] sm:$0xf0] }
 0x229   :  { %v10114_v9 = vld [vmem:[#allocation4 + $0x3ec] sm:$0xf] }
 0x22b   :  { %3194 = vmatpush.bf16.msra.mxu0 %v7764_v54  ;;  %3159 = vmatpush.bf16.msrb.mxu1 %v7824_v14  ;;  %v7857_v54 = vld [vmem:[#allocation4 + $0x178] sm:$0xf0]  ;;  %v8052_v14 = vor.u32 %v10082_v46, %v8049_v27  ;;  %v10110_v46 = vld [vmem:[#allocation4 + $0x3cc] sm:$0xf] }
 0x22c   :  { %3168 = vmatpush.bf16.msrb.mxu2 %v8016_v33  ;;  %v7860_v32 = vor.u32 %v10034_v56, %v7857_v54  ;;  %v8159_v33 = vld [vmem:[#allocation4 + $0x3c8] sm:$0xf]  ;;  %v8064_v56 = vor.u32 %v10088_v22, %v8063_v21  ;;  %v8180_v54 = vor.u32 %v10114_v9, %v8177_v25  ;;  %v8161_v27 = vld [vmem:[#allocation4 + $0x3d8] sm:$0xf0]  ;;  %v8567_v21 = vld [vmem:[#allocation6 + $0x300] sm:$0xf] }
 0x22d   :  { %v8409_v9 = vld [vmem:[#allocation6 + $0x1e0] sm:$0xf0] }
 0x22f   :  { %3195 = vmatpush.bf16.msra.mxu0 %v7748_v35  ;;  %3160 = vmatpush.bf16.msrb.mxu1 %v7808_v44  ;;  %v10112_v35 = vld [vmem:[#allocation4 + $0x3d4] sm:$0xf0]  ;;  %v8143_v44 = vld [vmem:[#allocation4 + $0x3a8] sm:$0xf] }
 0x230   :  { %3169 = vmatpush.bf16.msrb.mxu2 %v8000_v45  ;;  %v8160_v40 = vor.u32 %v10112_v35, %v8159_v33  ;;  %v10108_v45 = vld [vmem:[#allocation4 + $0x3b4] sm:$0xf0]  ;;  %v8129_v33 = vld [vmem:[#allocation4 + $0x398] sm:$0xf0] }
 0x231   :  { %v8144_v50 = vor.u32 %v10108_v45, %v8143_v44  ;;  %v10090_v45 = vld [vmem:[#allocation4 + $0x32c] sm:$0xf] }
 0x232   :  { %3122 = vmatmul.bf16.vlgmr.msra.gmra.mxu2 %v11705_v13  ;;  %3161 = vmatmul.bf16.vlgmr.msrb.gmra.mxu1 %v11695_v26 }
 0x233   :  { %3196 = vmatpush.bf16.msra.mxu0 %v7732_v47  ;;  %3205 = vmatpush.bf16.msra.mxu1 %v7924_v49  ;;  %v10026_v47 = vld [vmem:[#allocation4 + $0x12c] sm:$0xf] }
 0x234   :  { %3170 = vmatpush.bf16.msrb.mxu2 %v7984_v55  ;;  %v10074_v49 = vld [vmem:[#allocation4 + $0x2ac] sm:$0xf]  ;;  %v7809_v55 = vld [vmem:[#allocation4 + $0x118] sm:$0xf0] }
 0x235   :  { %v8020_v51 = vor.u32 %v10074_v49, %v8017_v1  ;;  %v7812_v62 = vor.u32 %v10022_v58, %v7809_v55  ;;  %v8311_v55 = vld [vmem:[#allocation6 + $0x100] sm:$0xf] }
 0x237   :  { %3197 = vmatpush.bf16.msra.mxu0 %v7716_v59  ;;  %3206 = vmatpush.bf16.msra.mxu1 %v7908_v61  ;;  %v10070_v59 = vld [vmem:[#allocation4 + $0x28c] sm:$0xf]  ;;  %v8128_v61 = vor.u32 %v10104_v57, %v8127_v52  ;;  %v8065_v52 = vld [vmem:[#allocation4 + $0x318] sm:$0xf0] }
 0x238   :  { %3171 = vmatpush.bf16.msrb.mxu2 %v7968_v6  ;;  %v8004_v34 = vor.u32 %v10070_v59, %v8001_v60  ;;  %v8112_v6 = vor.u32 %v10100_v0, %v8111_v38  ;;  %v10153_v59 = vld [vmem:[#allocation6 + $0x11c] sm:$0xf0] }
 0x239   :  { %v8279_v60 = vld [vmem:[#allocation6 + $0xc0] sm:$0xf] }
 0x23a   :  { %v10241_v38 = vld [vmem:[#allocation6 + $0x3dc] sm:$0xf0] }
 0x23b   :  { %v2246_v20 = vpop.f32.mrf.mxu3  ;;  %3198 = vmatpush.bf16.msra.mxu0 %v7700_v3  ;;  %3207 = vmatpush.bf16.msra.mxu1 %v7892_v10  ;;  %v7988_v3 = vor.u32 %v10066_v2, %v7985_v28  ;;  %v10062_v10 = vld [vmem:[#allocation4 + $0x24c] sm:$0xf] }
 0x23c   :  { %v2247_v23 = vadd.f32 %v2246_v20, %v2234_v18  ;;  %3172 = vmatpush.bf16.msrb.mxu2 %v7952_v8  ;;  %v7972_v15 = vor.u32 %v10062_v10, %v7969_v36  ;;  %v10058_v18 = vld [vmem:[#allocation4 + $0x22c] sm:$0xf]  ;;  %v7953_v20 = vld [vmem:[#allocation4 + $0x238] sm:$0xf0]  ;;  %v8080_v8 = vor.u32 %v10092_v17, %v8079_v16  ;;  %v10233_v10 = vld [vmem:[#allocation6 + $0x39c] sm:$0xf0] }
 0x23d   :  { %v8632_v36 = vor.u32 %v10233_v10, %v8631_v5  ;;  %v8599_v16 = vld [vmem:[#allocation6 + $0x340] sm:$0xf]  ;;  %v10133_v10 = vld [vmem:[#allocation6 + $0x84] sm:$0xf] }
 0x23e   :  { %v2253_v29 = vmax.f32 %v2247_v23, 0.0  ;;  %v10054_v23 = vld [vmem:[#allocation4 + $0x20c] sm:$0xf]  ;;  %v8791_v5 = vld [vmem:[#allocation6 + $0x4c0] sm:$0xf] }
 0x23f   :  { %3199 = vmatpush.bf16.msra.mxu0 %v7684_v53  ;;  %3208 = vmatpush.bf16.msra.mxu1 %v7876_v24  ;;  %v7956_v53 = vor.u32 %v10058_v18, %v7953_v20  ;;  %v7937_v24 = vld [vmem:[#allocation4 + $0x218] sm:$0xf0]  ;;  %v10225_v18 = vld [vmem:[#allocation6 + $0x35c] sm:$0xf0] }
 0x240   :  { %v11716_v31 = vpack.c.bf16 %v2253_v29, %v2253_v29  ;;  %3173 = vmatpush.bf16.msrb.mxu2 %v7936_v63  ;;  %v8164_v29 = vor.u32 %v10110_v46, %v8161_v27  ;;  %v10106_v63 = vld [vmem:[#allocation4 + $0x3ac] sm:$0xf]  ;;  %v8919_v46 = vld [vmem:[#allocation6 + $0x5c0] sm:$0xf] }
 0x242   :  { %3083 = vmatmul.bf16.vlgmr.msrb.gmra.mxu3 %v11716_v31  ;;  %3200 = vmatmul.bf16.vlgmr.msra.gmra.mxu0 %v11686_v41  ;;  %v7828_v41 = vor.u32 %v10026_v47, %v7825_v48  ;;  %v8375_v47 = vld [vmem:[#allocation6 + $0x180] sm:$0xf] }
 0x243   :  { %3179 = vmatpush.bf16.msrb.mxu3 %v8176_v30  ;;  %v2248_v39 = vpop.f32.mrf.mxu3  ;;  %3209 = vmatpush.bf16.msra.mxu1 %v7860_v32  ;;  %v8145_v30 = vld [vmem:[#allocation4 + $0x3b8] sm:$0xf0]  ;;  %v10169_v48 = vld [vmem:[#allocation6 + $0x19c] sm:$0xf0] }
 0x244   :  { %3218 = vmatpush.bf16.msra.mxu2 %v8052_v14  ;;  %v8148_v32 = vor.u32 %v10106_v63, %v8145_v30  ;;  %v10102_v14 = vld [vmem:[#allocation4 + $0x38c] sm:$0xf]  ;;  %v8408_v39 = vor.u32 %v10177_v19, %v8407_v37  ;;  %v8376_v1 = vor.u32 %v10169_v48, %v8375_v47  ;;  %v10165_v63 = vld [vmem:[#allocation6 + $0x184] sm:$0xf]  ;;  %v8887_v37 = vld [vmem:[#allocation6 + $0x580] sm:$0xf] }
 0x245   :  { %3174 = vmatmul.bf16.vlgmr.msrb.gmra.mxu2 %v11705_v13  ;;  %v8132_v35 = vor.u32 %v10102_v14, %v8129_v33  ;;  %v8377_v30 = vld [vmem:[#allocation6 + $0x1a0] sm:$0xf0]  ;;  %v8855_v47 = vld [vmem:[#allocation6 + $0x540] sm:$0xf] }
 0x246   :  { %4806 = vmatpush.bf16.msrb.mxu0 %v8408_v39  ;;  %v10297_v39 = vld [vmem:[#allocation6 + $0x59c] sm:$0xf0] }
 0x247   :  { %3180 = vmatpush.bf16.msrb.mxu3 %v8160_v40  ;;  %3210 = vmatpush.bf16.msra.mxu1 %v7844_v42  ;;  %v8116_v40 = vor.u32 %v10098_v11, %v8113_v4  ;;  %v10094_v42 = vld [vmem:[#allocation4 + $0x34c] sm:$0xf]  ;;  %v8503_v11 = vld [vmem:[#allocation6 + $0x280] sm:$0xf] }
 0x248   :  { %3219 = vmatpush.bf16.msra.mxu2 %v8036_v43  ;;  %v8097_v43 = vld [vmem:[#allocation4 + $0x358] sm:$0xf0]  ;;  %v10201_v4 = vld [vmem:[#allocation6 + $0x29c] sm:$0xf0] }
 0x249   :  { %v8100_v44 = vor.u32 %v10094_v42, %v8097_v43  ;;  %v8504_v19 = vor.u32 %v10201_v4, %v8503_v11  ;;  %v8345_v42 = vld [vmem:[#allocation6 + $0x160] sm:$0xf0]  ;;  %v8888_v43 = vor.u32 %v10297_v39, %v8887_v37  ;;  %v10249_v39 = vld [vmem:[#allocation6 + $0x41c] sm:$0xf0] }
 0x24a   :  { %4807 = vmatpush.bf16.msrb.mxu0 %v8376_v1  ;;  %v10149_v1 = vld [vmem:[#allocation6 + $0x104] sm:$0xf] }
 0x24b   :  { %3181 = vmatpush.bf16.msrb.mxu3 %v8144_v50  ;;  %3211 = vmatpush.bf16.msra.mxu1 %v7828_v41  ;;  %v8343_v50 = vld [vmem:[#allocation6 + $0x140] sm:$0xf]  ;;  %v8569_v11 = vld [vmem:[#allocation6 + $0x320] sm:$0xf0] }
 0x24c   :  { %3220 = vmatpush.bf16.msra.mxu2 %v8020_v51  ;;  %v10161_v41 = vld [vmem:[#allocation6 + $0x15c] sm:$0xf0]  ;;  %v10086_v51 = vld [vmem:[#allocation4 + $0x30c] sm:$0xf] }
 0x24d   :  { %v8344_v57 = vor.u32 %v10161_v41, %v8343_v50  ;;  %v8068_v58 = vor.u32 %v10086_v51, %v8065_v52  ;;  %v8313_v50 = vld [vmem:[#allocation6 + $0x120] sm:$0xf0] }
 0x24f   :  { %3182 = vmatpush.bf16.msrb.mxu3 %v8128_v61  ;;  %3212 = vmatpush.bf16.msra.mxu1 %v7812_v62  ;;  %v8312_v61 = vor.u32 %v10153_v59, %v8311_v55  ;;  %v10145_v62 = vld [vmem:[#allocation6 + $0xdc] sm:$0xf0] }
 0x250   :  { %3221 = vmatpush.bf16.msra.mxu2 %v8004_v34  ;;  %4808 = vmatpush.bf16.msrb.mxu0 %v8344_v57  ;;  %v8663_v34 = vld [vmem:[#allocation6 + $0x3c0] sm:$0xf]  ;;  %v8280_v2 = vor.u32 %v10145_v62, %v8279_v60  ;;  %v8316_v57 = vor.u32 %v10149_v1, %v8313_v50 }
 0x251   :  { %v8664_v0 = vor.u32 %v10241_v38, %v8663_v34  ;;  %v10185_v55 = vld [vmem:[#allocation6 + $0x21c] sm:$0xf0]  ;;  %v10141_v34 = vld [vmem:[#allocation6 + $0xc4] sm:$0xf] }
 0x252   :  { %3135 = vmatmul.bf16.vlgmr.msra.gmra.mxu3 %v11716_v31  ;;  %3213 = vmatmul.bf16.vlgmr.msra.gmra.mxu1 %v11695_v26  ;;  %v7940_v26 = vor.u32 %v10054_v23, %v7937_v24  ;;  %v10217_v23 = vld [vmem:[#allocation6 + $0x31c] sm:$0xf0]  ;;  %v10173_v24 = vld [vmem:[#allocation6 + $0x1c4] sm:$0xf] }
 0x253   :  { %3183 = vmatpush.bf16.msrb.mxu3 %v8112_v6  ;;  %4819 = vmatpush.bf16.msrb.mxu1 %v8664_v0  ;;  %v8247_v6 = vld [vmem:[#allocation6 + $0x80] sm:$0xf]  ;;  %v8568_v25 = vor.u32 %v10217_v23, %v8567_v21  ;;  %v8281_v38 = vld [vmem:[#allocation6 + $0xe0] sm:$0xf0] }
 0x254   :  { %3222 = vmatpush.bf16.msra.mxu2 %v7988_v3  ;;  %4809 = vmatpush.bf16.msrb.mxu0 %v8312_v61  ;;  %v10137_v3 = vld [vmem:[#allocation6 + $0x9c] sm:$0xf0]  ;;  %v10237_v0 = vld [vmem:[#allocation6 + $0x3c4] sm:$0xf] }
 0x255   :  { %v8248_v7 = vor.u32 %v10137_v3, %v8247_v6  ;;  %v8823_v59 = vld [vmem:[#allocation6 + $0x500] sm:$0xf]  ;;  %v8665_v6 = vld [vmem:[#allocation6 + $0x3e0] sm:$0xf0] }
 0x256   :  { %v10281_v60 = vld [vmem:[#allocation6 + $0x51c] sm:$0xf0]  ;;  %v8668_v3 = vor.u32 %v10237_v0, %v8665_v6  ;;  %v8217_v23 = vld [vmem:[#allocation6 + $0x60] sm:$0xf0] }
 0x257   :  { %3184 = vmatpush.bf16.msrb.mxu3 %v8096_v12  ;;  %4820 = vmatpush.bf16.msrb.mxu1 %v8632_v36  ;;  %v8215_v12 = vld [vmem:[#allocation6 + $0x40] sm:$0xf]  ;;  %v8824_v62 = vor.u32 %v10281_v60, %v8823_v59  ;;  %v8473_v6 = vld [vmem:[#allocation6 + $0x260] sm:$0xf0] }
 0x258   :  { %3223 = vmatpush.bf16.msra.mxu2 %v7972_v15  ;;  %4810 = vmatpush.bf16.msrb.mxu0 %v8280_v2  ;;  %v10129_v15 = vld [vmem:[#allocation6 + $0x5c] sm:$0xf0]  ;;  %v8284_v2 = vor.u32 %v10141_v34, %v8281_v38 }
 0x259   :  { %v8216_v17 = vor.u32 %v10129_v15, %v8215_v12  ;;  %v8249_v12 = vld [vmem:[#allocation6 + $0xa0] sm:$0xf0]  ;;  %v9111_v34 = vld [vmem:[#allocation6 + $0x740] sm:$0xf] }
 0x25a   :  { %v10229_v15 = vld [vmem:[#allocation6 + $0x384] sm:$0xf]  ;;  %v10353_v38 = vld [vmem:[#allocation6 + $0x75c] sm:$0xf0] }
 0x25b   :  { %3185 = vmatpush.bf16.msrb.mxu3 %v8080_v8  ;;  %v8600_v8 = vor.u32 %v10225_v18, %v8599_v16  ;;  %v8633_v16 = vld [vmem:[#allocation6 + $0x3a0] sm:$0xf0]  ;;  %v8252_v18 = vor.u32 %v10133_v10, %v8249_v12  ;;  %v9112_v0 = vor.u32 %v10353_v38, %v9111_v34  ;;  %v8383_v34 = vld [vmem:[#allocation6 + $0x188] sm:$0xf] }
 0x25c   :  { %3224 = vmatpush.bf16.msra.mxu2 %v7956_v53  ;;  %4811 = vmatpush.bf16.msrb.mxu0 %v8248_v7  ;;  %v10121_v53 = vld [vmem:[#allocation6 + $0x1c] sm:$0xf0]  ;;  %v10170_v38 = vld [vmem:[#allocation6 + $0x1a4] sm:$0xf0] }
 0x25d   :  { %4821 = vmatpush.bf16.msrb.mxu1 %v8600_v8  ;;  %v10273_v7 = vld [vmem:[#allocation6 + $0x4dc] sm:$0xf0] }
 0x25e   :  { %v8792_v36 = vor.u32 %v10273_v7, %v8791_v5  ;;  %v8857_v7 = vld [vmem:[#allocation6 + $0x560] sm:$0xf0] }
 0x25f   :  { %3186 = vmatpush.bf16.msrb.mxu3 %v8064_v56  ;;  %v8412_v56 = vor.u32 %v10173_v24, %v8409_v9  ;;  %v10221_v24 = vld [vmem:[#allocation6 + $0x344] sm:$0xf] }
 0x260   :  { %3225 = vmatpush.bf16.msra.mxu2 %v7940_v26  ;;  %4812 = vmatpush.bf16.msrb.mxu0 %v8216_v17  ;;  %v8535_v26 = vld [vmem:[#allocation6 + $0x2c0] sm:$0xf] }
 0x261   :  { %4822 = vmatpush.bf16.msrb.mxu1 %v8568_v25  ;;  %v8601_v25 = vld [vmem:[#allocation6 + $0x360] sm:$0xf0] }
 0x262   :  { %3187 = vmatmul.bf16.vlgmr.msrb.gmra.mxu3 %v11716_v31 }
 0x263   :  { %3231 = vmatpush.bf16.msra.mxu3 %v8180_v54  ;;  %3226 = vmatmul.bf16.vlgmr.msra.gmra.mxu2 %v11705_v13  ;;  %v8081_v13 = vld [vmem:[#allocation4 + $0x338] sm:$0xf0]  ;;  %v10209_v54 = vld [vmem:[#allocation6 + $0x2dc] sm:$0xf0] }
 0x264   :  { %v8084_v49 = vor.u32 %v10090_v45, %v8081_v13  ;;  %v8536_v27 = vor.u32 %v10209_v54, %v8535_v26  ;;  %v8471_v45 = vld [vmem:[#allocation6 + $0x240] sm:$0xf] }
 0x265   :  { %v10193_v13 = vld [vmem:[#allocation6 + $0x25c] sm:$0xf0] }
 0x266   :  { %4823 = vmatpush.bf16.msrb.mxu1 %v8536_v27  ;;  %v8472_v48 = vor.u32 %v10193_v13, %v8471_v45  ;;  %v8727_v54 = vld [vmem:[#allocation6 + $0x440] sm:$0xf]  ;;  %v8537_v45 = vld [vmem:[#allocation6 + $0x2e0] sm:$0xf0] }
 0x267   :  { %3232 = vmatpush.bf16.msra.mxu3 %v8164_v29  ;;  %v10305_v29 = vld [vmem:[#allocation6 + $0x5dc] sm:$0xf0] }
 0x268   :  { %v8920_v33 = vor.u32 %v10305_v29, %v8919_v46  ;;  %v10257_v46 = vld [vmem:[#allocation6 + $0x45c] sm:$0xf0]  ;;  %v10117_v29 = vld [vmem:[#allocation6 + $0x4] sm:$0xf] }
 0x269   :  { %v8728_v27 = vor.u32 %v10257_v46, %v8727_v54  ;;  %v10269_v46 = vld [vmem:[#allocation6 + $0x4c4] sm:$0xf] }
 0x26a   :  { %4832 = vmatpush.bf16.msrb.mxu2 %v8920_v33  ;;  %4824 = vmatpush.bf16.msrb.mxu1 %v8504_v19  ;;  %v8695_v19 = vld [vmem:[#allocation6 + $0x400] sm:$0xf] }
 0x26b   :  { %3233 = vmatpush.bf16.msra.mxu3 %v8148_v32 }
 0x26e   :  { %4833 = vmatpush.bf16.msrb.mxu2 %v8888_v43  ;;  %4825 = vmatpush.bf16.msrb.mxu1 %v8472_v48  ;;  %v10369_v43 = vld [vmem:[#allocation6 + $0x7dc] sm:$0xf0]  ;;  %v10301_v48 = vld [vmem:[#allocation6 + $0x5c4] sm:$0xf] }
 0x26f   :  { %3234 = vmatpush.bf16.msra.mxu3 %v8132_v35  ;;  %v8380_v35 = vor.u32 %v10165_v63, %v8377_v30  ;;  %v8185_v63 = vld [vmem:[#allocation6 + $0x20] sm:$0xf0] }
 0x270   :  { %v10213_v30 = vld [vmem:[#allocation6 + $0x304] sm:$0xf] }
 0x271   :  { %v8572_v37 = vor.u32 %v10213_v30, %v8569_v11  ;;  %v10329_v11 = vld [vmem:[#allocation6 + $0x69c] sm:$0xf0] }
 0x273   :  { %3235 = vmatpush.bf16.msra.mxu3 %v8116_v40  ;;  %v10157_v40 = vld [vmem:[#allocation6 + $0x144] sm:$0xf] }
 0x277   :  { %3236 = vmatpush.bf16.msra.mxu3 %v8100_v44  ;;  %v8348_v44 = vor.u32 %v10157_v40, %v8345_v42  ;;  %v9175_v40 = vld [vmem:[#allocation6 + $0x7c0] sm:$0xf]  ;;  %v8696_v42 = vor.u32 %v10249_v39, %v8695_v19  ;;  %v8761_v19 = vld [vmem:[#allocation6 + $0x4a0] sm:$0xf0] }
 0x278   :  { %v9176_v13 = vor.u32 %v10369_v43, %v9175_v40  ;;  %v8983_v43 = vld [vmem:[#allocation6 + $0x640] sm:$0xf] }
 0x27b   :  { %3237 = vmatpush.bf16.msra.mxu3 %v8084_v49  ;;  %v10289_v49 = vld [vmem:[#allocation6 + $0x55c] sm:$0xf0] }
 0x27c   :  { %v8856_v52 = vor.u32 %v10289_v49, %v8855_v47  ;;  %v8921_v49 = vld [vmem:[#allocation6 + $0x5e0] sm:$0xf0] }
 0x27d   :  { %v8924_v1 = vor.u32 %v10301_v48, %v8921_v49  ;;  %v8415_v49 = vld [vmem:[#allocation6 + $0x1c8] sm:$0xf] }
 0x27e   :  { %4834 = vmatpush.bf16.msrb.mxu2 %v8856_v52 }
 0x27f   :  { %3238 = vmatpush.bf16.msra.mxu3 %v8068_v58  ;;  %v11726_v28 = vpop.f32.mrf.mxu0  ;;  %v8439_v58 = vld [vmem:[#allocation6 + $0x200] sm:$0xf] }
 0x280   :  { %v8440_v61 = vor.u32 %v10185_v55, %v8439_v58  ;;  %v8505_v58 = vld [vmem:[#allocation6 + $0x2a0] sm:$0xf0] }
 0x281   :  { %v10293_v55 = vld [vmem:[#allocation6 + $0x584] sm:$0xf] }
 0x282   :  { %3239 = vmatmul.bf16.vlgmr.msra.gmra.mxu3 %v11716_v31  ;;  %v8183_v31 = vld [vmem:[#allocation6] sm:$0xf]  ;;  %4826 = vmatpush.bf16.msrb.mxu1 %v8440_v61  ;;  %v8889_v61 = vld [vmem:[#allocation6 + $0x5a0] sm:$0xf0] }
 0x283   :  { %v8184_v22 = vor.u32 %v10121_v53, %v8183_v31  ;;  %4835 = vmatpush.bf16.msrb.mxu2 %v8824_v62  ;;  %v8759_v31 = vld [vmem:[#allocation6 + $0x480] sm:$0xf]  ;;  %4845 = vmatpush.bf16.msrb.mxu3 %v9176_v13  ;;  %v8892_v62 = vor.u32 %v10293_v55, %v8889_v61  ;;  %v10245_v55 = vld [vmem:[#allocation6 + $0x404] sm:$0xf] }
 0x284   :  { %v10265_v53 = vld [vmem:[#allocation6 + $0x49c] sm:$0xf0]  ;;  %v10365_v61 = vld [vmem:[#allocation6 + $0x7c4] sm:$0xf] }
 0x285   :  { %4813 = vmatpush.bf16.msrb.mxu0 %v8184_v22  ;;  %v8760_v21 = vor.u32 %v10265_v53, %v8759_v31  ;;  %v10125_v22 = vld [vmem:[#allocation6 + $0x44] sm:$0xf] }
 0x286   :  { %4871 = vmatpush.bf16.msra.mxu1 %v8668_v3  ;;  %v8220_v9 = vor.u32 %v10125_v22, %v8217_v23  ;;  %v10285_v3 = vld [vmem:[#allocation6 + $0x544] sm:$0xf] }
 0x287   :  { %v3047_v20 = vpop.f32.mrf.mxu0  ;;  %4836 = vmatpush.bf16.msrb.mxu2 %v8792_v36  ;;  %v8860_v10 = vor.u32 %v10285_v3, %v8857_v7  ;;  %v11743_v36 = vld [vmem:[%s12668_s8] sm:$0xf]  ;;  %v8441_v31 = vld [vmem:[#allocation6 + $0x220] sm:$0xf0]  ;;  %v8384_v7 = vor.u32 %v10170_v38, %v8383_v34  ;;  %s10627_s8 = smov 77  }
 0x288   :  { %v8636_v20 = vor.u32 %v10229_v15, %v8633_v16  ;;  %v9079_v15 = vld [vmem:[#allocation6 + $0x700] sm:$0xf]  ;;  %v10277_v53 = vld [vmem:[#allocation6 + $0x504] sm:$0xf]  ;;  %v2389_v3 = vperm.slane %v11743_v36, 1 }
 0x289   :  { %4858 = vmatpush.bf16.msra.mxu0 %v8412_v56  ;;  %v8604_v56 = vor.u32 %v10221_v24, %v8601_v25  ;;  %v10345_v16 = vld [vmem:[#allocation6 + $0x71c] sm:$0xf0]  ;;  %v8825_v23 = vld [vmem:[#allocation6 + $0x520] sm:$0xf0] }
 0x28a   :  { %4872 = vmatpush.bf16.msra.mxu1 %v8636_v20  ;;  %v10181_v20 = vld [vmem:[#allocation6 + $0x204] sm:$0xf]  ;;  %v8828_v24 = vor.u32 %v10277_v53, %v8825_v23  ;;  %v9047_v25 = vld [vmem:[#allocation6 + $0x6c0] sm:$0xf]  ;;  %v8319_v23 = vld [vmem:[#allocation6 + $0x108] sm:$0xf] }
 0x28b   :  { %4837 = vmatpush.bf16.msrb.mxu2 %v8760_v21  ;;  %v8444_v22 = vor.u32 %v10181_v20, %v8441_v31 }
 0x28d   :  { %4859 = vmatpush.bf16.msra.mxu0 %v8380_v35  ;;  %v8188_v35 = vor.u32 %v10117_v29, %v8185_v63 }
 0x28e   :  { %4873 = vmatpush.bf16.msra.mxu1 %v8604_v56  ;;  %v10337_v56 = vld [vmem:[#allocation6 + $0x6dc] sm:$0xf0] }
 0x28f   :  { %v11728_v32 = vpop.f32.mrf.mxu1  ;;  %v11730_v14 = vpop.f32.mrf.mxu0  ;;  %4838 = vmatpush.bf16.msrb.mxu2 %v8728_v27  ;;  %v9048_v54 = vor.u32 %v10337_v56, %v9047_v25  ;;  %v8793_v27 = vld [vmem:[#allocation6 + $0x4e0] sm:$0xf0] }
 0x290   :  { %v8796_v29 = vor.u32 %v10269_v46, %v8793_v27  ;;  %v3098_v31 = vadd.f32 %v11730_v14, %v2389_v3  ;;  %v10349_v25 = vld [vmem:[#allocation6 + $0x744] sm:$0xf]  ;;  %v10146_v14 = vld [vmem:[#allocation6 + $0xe4] sm:$0xf0] }
 0x291   :  { %4860 = vmatpush.bf16.msra.mxu0 %v8348_v44  ;;  %v10205_v44 = vld [vmem:[#allocation6 + $0x2c4] sm:$0xf] }
 0x292   :  { %4874 = vmatpush.bf16.msra.mxu1 %v8572_v37  ;;  %v8540_v47 = vor.u32 %v10205_v44, %v8537_v45  ;;  %v10261_v37 = vld [vmem:[#allocation6 + $0x484] sm:$0xf]  ;;  %v10321_v44 = vld [vmem:[#allocation6 + $0x65c] sm:$0xf0] }
 0x293   :  { %4839 = vmatpush.bf16.msrb.mxu2 %v8696_v42  ;;  %v8764_v40 = vor.u32 %v10261_v37, %v8761_v19  ;;  %v8984_v13 = vor.u32 %v10321_v44, %v8983_v43  ;;  %v9113_v56 = vld [vmem:[#allocation6 + $0x760] sm:$0xf0]  ;;  %v8255_v43 = vld [vmem:[#allocation6 + $0x88] sm:$0xf] }
 0x294   :  { %v9081_v37 = vld [vmem:[#allocation6 + $0x720] sm:$0xf0]  ;;  %v10138_v44 = vld [vmem:[#allocation6 + $0xa4] sm:$0xf0] }
 0x295   :  { %4861 = vmatpush.bf16.msra.mxu0 %v8316_v57  ;;  %v10197_v57 = vld [vmem:[#allocation6 + $0x284] sm:$0xf] }
 0x296   :  { %4875 = vmatpush.bf16.msra.mxu1 %v8540_v47  ;;  %v8508_v60 = vor.u32 %v10197_v57, %v8505_v58  ;;  %v8729_v47 = vld [vmem:[#allocation6 + $0x460] sm:$0xf0] }
 0x297   :  { %v3060_v41 = vpop.f32.mrf.mxu1  ;;  %v3099_v51 = vpop.f32.mrf.mxu0  ;;  %4884 = vmatpush.bf16.msra.mxu2 %v8924_v1  ;;  %v10178_v1 = vld [vmem:[#allocation6 + $0x1e4] sm:$0xf0] }
 0x298   :  { %v9143_v41 = vld [vmem:[#allocation6 + $0x780] sm:$0xf] }
 0x299   :  { %4862 = vmatpush.bf16.msra.mxu0 %v8284_v2  ;;  %v10361_v51 = vld [vmem:[#allocation6 + $0x79c] sm:$0xf0]  ;;  %v10189_v2 = vld [vmem:[#allocation6 + $0x244] sm:$0xf] }
 0x29a   :  { %v9144_v52 = vor.u32 %v10361_v51, %v9143_v41  ;;  %4876 = vmatpush.bf16.msra.mxu1 %v8508_v60  ;;  %v8476_v5 = vor.u32 %v10189_v2, %v8473_v6  ;;  %v8697_v60 = vld [vmem:[#allocation6 + $0x420] sm:$0xf0] }
 0x29b   :  { %4885 = vmatpush.bf16.msra.mxu2 %v8892_v62  ;;  %v9177_v2 = vld [vmem:[#allocation6 + $0x7e0] sm:$0xf0] }
 0x29c   :  { %4846 = vmatpush.bf16.msrb.mxu3 %v9144_v52  ;;  %v8951_v52 = vld [vmem:[#allocation6 + $0x600] sm:$0xf]  ;;  %v9180_v6 = vor.u32 %v10365_v61, %v9177_v2  ;;  %v10122_v2 = vld [vmem:[#allocation6 + $0x24] sm:$0xf0] }
 0x29d   :  { %4863 = vmatpush.bf16.msra.mxu0 %v8252_v18  ;;  %v9080_v18 = vor.u32 %v10345_v16, %v9079_v15  ;;  %v10162_v15 = vld [vmem:[#allocation6 + $0x164] sm:$0xf0]  ;;  %v10357_v16 = vld [vmem:[#allocation6 + $0x784] sm:$0xf] }
 0x29e   :  { %4877 = vmatpush.bf16.msra.mxu1 %v8476_v5 }
 0x29f   :  { %v11732_v17 = vpop.f32.mrf.mxu1  ;;  %4886 = vmatpush.bf16.msra.mxu2 %v8860_v10  ;;  %v8351_v10 = vld [vmem:[#allocation6 + $0x148] sm:$0xf] }
 0x2a0   :  { %4847 = vmatpush.bf16.msrb.mxu3 %v9112_v0  ;;  %v8700_v0 = vor.u32 %v10245_v55, %v8697_v60  ;;  %v9017_v55 = vld [vmem:[#allocation6 + $0x6a0] sm:$0xf0] }
 0x2a1   :  { %v11734_v8 = vpop.f32.mrf.mxu0  ;;  %4864 = vmatpush.bf16.msra.mxu0 %v8220_v9  ;;  %v2388_v9 = vperm.slane %v11743_v36, 0 }
 0x2a2   :  { %4878 = vmatpush.bf16.msra.mxu1 %v8444_v22  ;;  %v8352_v22 = vor.u32 %v10162_v15, %v8351_v10  ;;  %v8985_v10 = vld [vmem:[#allocation6 + $0x660] sm:$0xf0]  ;;  %v10174_v15 = vld [vmem:[#allocation6 + $0x1cc] sm:$0xf] }
 0x2a3   :  { %4887 = vmatpush.bf16.msra.mxu2 %v8828_v24  ;;  %v3046_v30 = vadd.f32 %v11726_v28, %v2388_v9  ;;  %v10253_v28 = vld [vmem:[#allocation6 + $0x444] sm:$0xf]  ;;  %v3111_v24 = vadd.f32 %v11732_v17, %v3098_v31  ;;  %v10154_v9 = vld [vmem:[#allocation6 + $0x124] sm:$0xf0] }
 0x2a4   :  { %4848 = vmatpush.bf16.msrb.mxu3 %v9080_v18  ;;  %v9145_v18 = vld [vmem:[#allocation6 + $0x7a0] sm:$0xf0] }
 0x2a5   :  { %v11736_v26 = vpop.f32.mrf.mxu2  ;;  %4865 = vmatpush.bf16.msra.mxu0 %v8188_v35  ;;  %v9015_v35 = vld [vmem:[#allocation6 + $0x680] sm:$0xf]  ;;  %v3059_v39 = vadd.f32 %v11728_v32, %v3046_v30  ;;  %v9148_v20 = vor.u32 %v10357_v16, %v9145_v18  ;;  %v8287_v30 = vld [vmem:[#allocation6 + $0xc8] sm:$0xf]  ;;  %v8417_v16 = vld [vmem:[#allocation6 + $0x1e8] sm:$0xf0] }
 0x2a6   :  { %v10313_v32 = vld [vmem:[#allocation6 + $0x61c] sm:$0xf0] }
 0x2a7   :  { %v3112_v33 = vpop.f32.mrf.mxu1  ;;  %4888 = vmatpush.bf16.msra.mxu2 %v8796_v29  ;;  %v3072_v42 = vadd.f32 %v11736_v26, %v3059_v39  ;;  %v8416_v26 = vor.u32 %v10178_v1, %v8415_v49  ;;  %v8952_v58 = vor.u32 %v10313_v32, %v8951_v52  ;;  %v8320_v29 = vor.u32 %v10154_v9, %v8319_v23  ;;  %v10130_v52 = vld [vmem:[#allocation6 + $0x64] sm:$0xf0] }
 0x2a8   :  { %4849 = vmatpush.bf16.msrb.mxu3 %v9048_v54  ;;  %v9116_v54 = vor.u32 %v10349_v25, %v9113_v56  ;;  %v2390_v49 = vperm.slane %v11743_v36, 2  ;;  %v8607_v32 = vld [vmem:[#allocation6 + $0x348] sm:$0xf]  ;;  %v10309_v56 = vld [vmem:[#allocation6 + $0x604] sm:$0xf] }
 0x2a9   :  { %v3151_v4 = vpop.f32.mrf.mxu0  ;;  %v10210_v23 = vld [vmem:[#allocation6 + $0x2e4] sm:$0xf0] }
 0x2aa   :  { %v9016_v4 = vor.u32 %v10329_v11, %v9015_v35  ;;  %v10242_v11 = vld [vmem:[#allocation6 + $0x3e4] sm:$0xf0]  ;;  %v3150_v61 = vadd.f32 %v11734_v8, %v2390_v49 }
 0x2ab   :  { %4889 = vmatpush.bf16.msra.mxu2 %v8764_v40  ;;  %v8288_v40 = vor.u32 %v10146_v14, %v8287_v30  ;;  %v8927_v25 = vld [vmem:[#allocation6 + $0x5c8] sm:$0xf] }
 0x2ac   :  { %4850 = vmatpush.bf16.msrb.mxu3 %v9016_v4  ;;  %v10341_v4 = vld [vmem:[#allocation6 + $0x704] sm:$0xf]  ;;  %v10290_v49 = vld [vmem:[#allocation6 + $0x564] sm:$0xf0] }
 0x2ad   :  { %v3073_v50 = vpop.f32.mrf.mxu2  ;;  %v9084_v19 = vor.u32 %v10341_v4, %v9081_v37  ;;  %v8511_v4 = vld [vmem:[#allocation6 + $0x288] sm:$0xf] }
 0x2ae   :  { %v8732_v50 = vor.u32 %v10253_v28, %v8729_v47  ;;  %v10333_v28 = vld [vmem:[#allocation6 + $0x6c4] sm:$0xf]  ;;  %v10202_v37 = vld [vmem:[#allocation6 + $0x2a4] sm:$0xf0] }
 0x2af   :  { %v11738_v59 = vpop.f32.mrf.mxu1  ;;  %v9049_v47 = vld [vmem:[#allocation6 + $0x6e0] sm:$0xf0] }
 0x2b0   :  { %4851 = vmatpush.bf16.msrb.mxu3 %v8984_v13  ;;  %4890 = vmatpush.bf16.msra.mxu2 %v8732_v50  ;;  %v10234_v13 = vld [vmem:[#allocation6 + $0x3a4] sm:$0xf0]  ;;  %v8256_v50 = vor.u32 %v10138_v44, %v8255_v43  ;;  %v3163_v3 = vadd.f32 %v11738_v59, %v3150_v61  ;;  %v8420_v59 = vor.u32 %v10174_v15, %v8417_v16  ;;  %v8289_v61 = vld [vmem:[#allocation6 + $0xe8] sm:$0xf0] }
 0x2b1   :  { %v8512_v43 = vor.u32 %v10202_v37, %v8511_v4  ;;  %v8257_v15 = vld [vmem:[#allocation6 + $0xa8] sm:$0xf0]  ;;  %v8423_v37 = vld [vmem:[#allocation6 + $0x1d0] sm:$0xf] }
 0x2b2   :  { %v10230_v16 = vld [vmem:[#allocation6 + $0x38c] sm:$0xf] }
 0x2b3   :  { %v8577_v4 = vld [vmem:[#allocation6 + $0x328] sm:$0xf0] }
 0x2b4   :  { %4852 = vmatpush.bf16.msrb.mxu3 %v8952_v58  ;;  %4891 = vmatpush.bf16.msra.mxu2 %v8700_v0  ;;  %v10325_v58 = vld [vmem:[#allocation6 + $0x684] sm:$0xf]  ;;  %v8191_v0 = vld [vmem:[#allocation6 + $0x8] sm:$0xf] }
 0x2b5   :  { %v11745_v12 = vpop.f32.mrf.mxu2  ;;  %v9020_v60 = vor.u32 %v10325_v58, %v9017_v55  ;;  %v8192_v31 = vor.u32 %v10122_v2, %v8191_v0  ;;  %v8831_v58 = vld [vmem:[#allocation6 + $0x508] sm:$0xf] }
 0x2b6   :  { %v3124_v46 = vadd.f32 %v11745_v12, %v3111_v24  ;;  %v8639_v12 = vld [vmem:[#allocation6 + $0x388] sm:$0xf] }
 0x2b7   :  { %v3164_v21 = vpop.f32.mrf.mxu1  ;;  %v10282_v55 = vld [vmem:[#allocation6 + $0x524] sm:$0xf0] }
 0x2b8   :  { %4897 = vmatpush.bf16.msra.mxu3 %v9180_v6  ;;  %v8575_v6 = vld [vmem:[#allocation6 + $0x308] sm:$0xf]  ;;  %v8832_v2 = vor.u32 %v10282_v55, %v8831_v58 }
 0x2b9   :  { %v9151_v55 = vld [vmem:[#allocation6 + $0x788] sm:$0xf] }
 0x2bc   :  { %4898 = vmatpush.bf16.msra.mxu3 %v9148_v20 }
 0x2bd   :  { %v3125_v33 = vpop.f32.mrf.mxu2 }
 0x2be   :  { %v8671_v33 = vld [vmem:[#allocation6 + $0x3c8] sm:$0xf] }
 0x2bf   :  { %v11748_v63 = vpop.f32.mrf.mxu0 }
 0x2c0   :  { %4899 = vmatpush.bf16.msra.mxu3 %v9116_v54  ;;  %v8953_v54 = vld [vmem:[#allocation6 + $0x620] sm:$0xf0] }
 0x2c1   :  { %v8956_v30 = vor.u32 %v10309_v56, %v8953_v54  ;;  %v8609_v56 = vld [vmem:[#allocation6 + $0x368] sm:$0xf0] }
 0x2c4   :  { %4900 = vmatpush.bf16.msra.mxu3 %v9084_v19  ;;  %v8895_v19 = vld [vmem:[#allocation6 + $0x588] sm:$0xf] }
 0x2c5   :  { %v3084_v45 = vpop.f32.mrf.mxu3 }
 0x2c6   :  { %v3085_v48 = vadd.f32 %v3084_v45, %v3072_v42  ;;  %v8672_v42 = vor.u32 %v10242_v11, %v8671_v33 }
 0x2c7   :  { %v3203_v41 = vpop.f32.mrf.mxu0 }
 0x2c8   :  { %v3244_v51 = vmax.f32 %v3085_v48, 0.0  ;;  %v11753_v57 = vpop.f32.mrf.mxu2  ;;  %v9052_v48 = vor.u32 %v10333_v28, %v9049_v47  ;;  %v8640_v41 = vor.u32 %v10234_v13, %v8639_v12  ;;  %v8479_v28 = vld [vmem:[#allocation6 + $0x248] sm:$0xf] }
 0x2c9   :  { %v3176_v20 = vadd.f32 %v11753_v57, %v3163_v3  ;;  %v10194_v47 = vld [vmem:[#allocation6 + $0x264] sm:$0xf0] }
 0x2ca   :  { %v11755_v62 = vpack.c.bf16 %v3244_v51, %v3244_v51  ;;  %v8223_v51 = vld [vmem:[#allocation6 + $0x48] sm:$0xf]  ;;  %4901 = vmatpush.bf16.msra.mxu3 %v9052_v48 }
 0x2cb   :  { %v8224_v34 = vor.u32 %v10130_v52, %v8223_v51  ;;  %v8863_v48 = vld [vmem:[#allocation6 + $0x548] sm:$0xf] }
 0x2cc   :  { %4814 = vmatmul.bf16.vlgmr.msrb.gmra.mxu0 %v11755_v62  ;;  %v8864_v51 = vor.u32 %v10290_v49, %v8863_v48  ;;  %v8799_v3 = vld [vmem:[#allocation6 + $0x4c8] sm:$0xf]  ;;  %v8545_v48 = vld [vmem:[#allocation6 + $0x2e8] sm:$0xf0] }
 0x2cd   :  { %4910 = vmatpush.bf16.msrb.mxu0 %v8416_v26  ;;  %v3086_v5 = vpop.f32.mrf.mxu3  ;;  %v10226_v26 = vld [vmem:[#allocation6 + $0x364] sm:$0xf0]  ;;  %v10302_v49 = vld [vmem:[#allocation6 + $0x5cc] sm:$0xf] }
 0x2ce   :  { %v8608_v38 = vor.u32 %v10226_v26, %v8607_v32  ;;  %v10218_v5 = vld [vmem:[#allocation6 + $0x324] sm:$0xf0]  ;;  %4902 = vmatpush.bf16.msra.mxu3 %v9020_v60  ;;  %v10142_v60 = vld [vmem:[#allocation6 + $0xcc] sm:$0xf] }
 0x2cf   :  { %v11760_v53 = vpop.f32.mrf.mxu1  ;;  %v8447_v32 = vld [vmem:[#allocation6 + $0x208] sm:$0xf] }
 0x2d0   :  { %v3177_v21 = vpop.f32.mrf.mxu2  ;;  %v10186_v26 = vld [vmem:[#allocation6 + $0x224] sm:$0xf0] }
 0x2d1   :  { %4911 = vmatpush.bf16.msrb.mxu0 %v8384_v7  ;;  %v10317_v7 = vld [vmem:[#allocation6 + $0x644] sm:$0xf]  ;;  %v8576_v21 = vor.u32 %v10218_v5, %v8575_v6  ;;  %v8448_v0 = vor.u32 %v10186_v26, %v8447_v32  ;;  %v8292_v6 = vor.u32 %v10142_v60, %v8289_v61  ;;  %v10362_v60 = vld [vmem:[#allocation6 + $0x7a4] sm:$0xf0]  ;;  %v10198_v61 = vld [vmem:[#allocation6 + $0x28c] sm:$0xf] }
 0x2d2   :  { %v8988_v18 = vor.u32 %v10317_v7, %v8985_v10  ;;  %v10274_v7 = vld [vmem:[#allocation6 + $0x4e4] sm:$0xf0]  ;;  %v10134_v10 = vld [vmem:[#allocation6 + $0x8c] sm:$0xf] }
 0x2d4   :  { %4903 = vmatpush.bf16.msra.mxu3 %v8988_v18  ;;  %v8641_v18 = vld [vmem:[#allocation6 + $0x3a8] sm:$0xf0] }
 0x2d5   :  { %4912 = vmatpush.bf16.msrb.mxu0 %v8352_v22  ;;  %v3136_v27 = vpop.f32.mrf.mxu3  ;;  %v8543_v22 = vld [vmem:[#allocation6 + $0x2c8] sm:$0xf] }
 0x2d6   :  { %v3137_v35 = vadd.f32 %v3136_v27, %v3124_v46  ;;  %v10306_v46 = vld [vmem:[#allocation6 + $0x5e4] sm:$0xf0]  ;;  %v10166_v27 = vld [vmem:[#allocation6 + $0x18c] sm:$0xf]  ;;  %v8544_v14 = vor.u32 %v10210_v23, %v8543_v22  ;;  %v8644_v22 = vor.u32 %v10230_v16, %v8641_v18 }
 0x2d7   :  { %v3216_v39 = vpop.f32.mrf.mxu1  ;;  %v10266_v23 = vld [vmem:[#allocation6 + $0x4a4] sm:$0xf0] }
 0x2d8   :  { %v3245_v17 = vmax.f32 %v3137_v35, 0.0  ;;  %v8928_v35 = vor.u32 %v10306_v46, %v8927_v25  ;;  %4904 = vmatpush.bf16.msra.mxu3 %v8956_v30  ;;  %v10158_v39 = vld [vmem:[#allocation6 + $0x14c] sm:$0xf]  ;;  %v9119_v16 = vld [vmem:[#allocation6 + $0x748] sm:$0xf] }
 0x2d9   :  { %4913 = vmatpush.bf16.msrb.mxu0 %v8320_v29  ;;  %v8385_v29 = vld [vmem:[#allocation6 + $0x1a8] sm:$0xf0]  ;;  %v10354_v18 = vld [vmem:[#allocation6 + $0x764] sm:$0xf0] }
 0x2da   :  { %v11764_v45 = vpack.c.bf16 %v3245_v17, %v3245_v17  ;;  %v8388_v11 = vor.u32 %v10166_v27, %v8385_v29  ;;  %v10298_v17 = vld [vmem:[#allocation6 + $0x5a4] sm:$0xf0]  ;;  %v10222_v25 = vld [vmem:[#allocation6 + $0x34c] sm:$0xf] }
 0x2db   :  { %v8896_v12 = vor.u32 %v10298_v17, %v8895_v19  ;;  %v8735_v27 = vld [vmem:[#allocation6 + $0x448] sm:$0xf]  ;;  %v10179_v19 = vld [vmem:[#allocation6 + $0x1ec] sm:$0xf0] }
 0x2dc   :  { %4827 = vmatmul.bf16.vlgmr.msrb.gmra.mxu1 %v11764_v45  ;;  %4866 = vmatmul.bf16.vlgmr.msra.gmra.mxu0 %v11755_v62  ;;  %v10258_v29 = vld [vmem:[#allocation6 + $0x464] sm:$0xf0] }
 0x2dd   :  { %4914 = vmatpush.bf16.msrb.mxu0 %v8288_v40  ;;  %4923 = vmatpush.bf16.msrb.mxu1 %v8672_v42  ;;  %v3138_v1 = vpop.f32.mrf.mxu3  ;;  %v8353_v40 = vld [vmem:[#allocation6 + $0x168] sm:$0xf0] }
 0x2de   :  { %v8356_v13 = vor.u32 %v10158_v39, %v8353_v40  ;;  %v10150_v1 = vld [vmem:[#allocation6 + $0x10c] sm:$0xf]  ;;  %v8736_v39 = vor.u32 %v10258_v29, %v8735_v27 }
 0x2df   :  { %v8449_v27 = vld [vmem:[#allocation6 + $0x228] sm:$0xf0] }
 0x2e1   :  { %4915 = vmatpush.bf16.msrb.mxu0 %v8256_v50  ;;  %4924 = vmatpush.bf16.msrb.mxu1 %v8640_v41  ;;  %v8321_v50 = vld [vmem:[#allocation6 + $0x128] sm:$0xf0]  ;;  %v8480_v41 = vor.u32 %v10194_v47, %v8479_v28  ;;  %v10370_v28 = vld [vmem:[#allocation6 + $0x7e4] sm:$0xf0] }
 0x2e2   :  { %v8324_v52 = vor.u32 %v10150_v1, %v8321_v50  ;;  %v10206_v47 = vld [vmem:[#allocation6 + $0x2cc] sm:$0xf] }
 0x2e3   :  { %v8929_v1 = vld [vmem:[#allocation6 + $0x5e8] sm:$0xf0]  ;;  %v8548_v26 = vor.u32 %v10206_v47, %v8545_v48 }
 0x2e4   :  { %v8932_v58 = vor.u32 %v10302_v49, %v8929_v1  ;;  %v9023_v49 = vld [vmem:[#allocation6 + $0x688] sm:$0xf] }
 0x2e5   :  { %4916 = vmatpush.bf16.msrb.mxu0 %v8224_v34  ;;  %4925 = vmatpush.bf16.msrb.mxu1 %v8608_v38  ;;  %v3188_v8 = vpop.f32.mrf.mxu3  ;;  %v10238_v34 = vld [vmem:[#allocation6 + $0x3cc] sm:$0xf]  ;;  %v10330_v1 = vld [vmem:[#allocation6 + $0x6a4] sm:$0xf0] }
 0x2e6   :  { %v3189_v24 = vadd.f32 %v3188_v8, %v3176_v20  ;;  %v11772_v9 = vpop.f32.mrf.mxu2  ;;  %v8673_v38 = vld [vmem:[#allocation6 + $0x3e8] sm:$0xf0]  ;;  %v2391_v20 = vperm.slane %v11743_v36, 3  ;;  %v8800_v8 = vor.u32 %v10274_v7, %v8799_v3  ;;  %v10163_v3 = vld [vmem:[#allocation6 + $0x16c] sm:$0xf0]  ;;  %v9152_v7 = vor.u32 %v10362_v60, %v9151_v55 }
 0x2e7   :  { %v8676_v5 = vor.u32 %v10238_v34, %v8673_v38  ;;  %v8513_v38 = vld [vmem:[#allocation6 + $0x2a8] sm:$0xf0]  ;;  %v10227_v55 = vld [vmem:[#allocation6 + $0x36c] sm:$0xf0]  ;;  %v9024_v60 = vor.u32 %v10330_v1, %v9023_v49 }
 0x2e8   :  { %v3246_v57 = vmax.f32 %v3189_v24, 0.0  ;;  %v10126_v24 = vld [vmem:[#allocation6 + $0x4c] sm:$0xf]  ;;  %v3202_v54 = vadd.f32 %v11748_v63, %v2391_v20  ;;  %v8487_v1 = vld [vmem:[#allocation6 + $0x250] sm:$0xf] }
 0x2e9   :  { %4917 = vmatpush.bf16.msrb.mxu0 %v8192_v31  ;;  %4926 = vmatpush.bf16.msrb.mxu1 %v8576_v21  ;;  %v8260_v31 = vor.u32 %v10134_v10, %v8257_v15  ;;  %v8767_v21 = vld [vmem:[#allocation6 + $0x488] sm:$0xf]  ;;  %v8516_v10 = vor.u32 %v10198_v61, %v8513_v38  ;;  %v10190_v20 = vld [vmem:[#allocation6 + $0x24c] sm:$0xf] }
 0x2ea   :  { %v11774_v33 = vpack.c.bf16 %v3246_v57, %v3246_v57  ;;  %v8768_v36 = vor.u32 %v10266_v23, %v8767_v21  ;;  %v3215_v30 = vadd.f32 %v11760_v53, %v3202_v54  ;;  %v8612_v57 = vor.u32 %v10222_v25, %v8609_v56  ;;  %v10286_v21 = vld [vmem:[#allocation6 + $0x54c] sm:$0xf]  ;;  %v8327_v23 = vld [vmem:[#allocation6 + $0x110] sm:$0xf]  ;;  %v9087_v25 = vld [vmem:[#allocation6 + $0x708] sm:$0xf] }
 0x2eb   :  { %v10322_v38 = vld [vmem:[#allocation6 + $0x664] sm:$0xf0] }
 0x2ec   :  { %4840 = vmatmul.bf16.vlgmr.msrb.gmra.mxu2 %v11774_v33  ;;  %4879 = vmatmul.bf16.vlgmr.msra.gmra.mxu1 %v11764_v45  ;;  %v3228_v17 = vadd.f32 %v11772_v9, %v3215_v30  ;;  %v10171_v9 = vld [vmem:[#allocation6 + $0x1ac] sm:$0xf0]  ;;  %v10278_v30 = vld [vmem:[#allocation6 + $0x50c] sm:$0xf] }
 0x2ed   :  { %4962 = vmatpush.bf16.msra.mxu0 %v8420_v59  ;;  %4927 = vmatpush.bf16.msrb.mxu1 %v8544_v14  ;;  %v3190_v42 = vpop.f32.mrf.mxu3  ;;  %v8225_v59 = vld [vmem:[#allocation6 + $0x68] sm:$0xf0] }
 0x2ee   :  { %4918 = vmatmul.bf16.vlgmr.msrb.gmra.mxu0 %v11755_v62  ;;  %4936 = vmatpush.bf16.msrb.mxu2 %v8928_v35  ;;  %v3229_v44 = vpop.f32.mrf.mxu2  ;;  %v8228_v46 = vor.u32 %v10126_v24, %v8225_v59  ;;  %v10118_v14 = vld [vmem:[#allocation6 + $0xc] sm:$0xf]  ;;  %v8703_v42 = vld [vmem:[#allocation6 + $0x408] sm:$0xf]  ;;  %v10155_v24 = vld [vmem:[#allocation6 + $0x12c] sm:$0xf0]  ;;  %v9120_v59 = vor.u32 %v10354_v18, %v9119_v16 }
 0x2ef   :  { %v8193_v35 = vld [vmem:[#allocation6 + $0x28] sm:$0xf0]  ;;  %v8328_v29 = vor.u32 %v10155_v24, %v8327_v23  ;;  %v10175_v18 = vld [vmem:[#allocation6 + $0x1d4] sm:$0xf] }
 0x2f0   :  { %v8196_v40 = vor.u32 %v10118_v14, %v8193_v35  ;;  %v8295_v14 = vld [vmem:[#allocation6 + $0xd0] sm:$0xf] }
 0x2f1   :  { %4963 = vmatpush.bf16.msra.mxu0 %v8388_v11  ;;  %4928 = vmatpush.bf16.msrb.mxu1 %v8512_v43  ;;  %v10214_v11 = vld [vmem:[#allocation6 + $0x30c] sm:$0xf]  ;;  %v10250_v43 = vld [vmem:[#allocation6 + $0x424] sm:$0xf0]  ;;  %v10147_v35 = vld [vmem:[#allocation6 + $0xec] sm:$0xf0] }
 0x2f2   :  { %4937 = vmatpush.bf16.msrb.mxu2 %v8896_v12  ;;  %v8580_v53 = vor.u32 %v10214_v11, %v8577_v4  ;;  %v8424_v12 = vor.u32 %v10179_v19, %v8423_v37  ;;  %v8679_v11 = vld [vmem:[#allocation6 + $0x3d0] sm:$0xf] }
 0x2f3   :  { %v10243_v4 = vld [vmem:[#allocation6 + $0x3ec] sm:$0xf0] }
 0x2f5   :  { %4964 = vmatpush.bf16.msra.mxu0 %v8356_v13  ;;  %4929 = vmatpush.bf16.msrb.mxu1 %v8480_v41  ;;  %v9183_v13 = vld [vmem:[#allocation6 + $0x7c8] sm:$0xf]  ;;  %v8391_v41 = vld [vmem:[#allocation6 + $0x190] sm:$0xf] }
 0x2f6   :  { %4938 = vmatpush.bf16.msrb.mxu2 %v8864_v51  ;;  %v8704_v51 = vor.u32 %v10250_v43, %v8703_v42  ;;  %v8392_v34 = vor.u32 %v10171_v9, %v8391_v41  ;;  %v8680_v42 = vor.u32 %v10243_v4, %v8679_v11  ;;  %v10270_v43 = vld [vmem:[#allocation6 + $0x4cc] sm:$0xf] }
 0x2f7   :  { %v10262_v9 = vld [vmem:[#allocation6 + $0x48c] sm:$0xf] }
 0x2f9   :  { %4965 = vmatpush.bf16.msra.mxu0 %v8324_v52  ;;  %4930 = vmatpush.bf16.msrb.mxu1 %v8448_v0  ;;  %v9184_v52 = vor.u32 %v10370_v28, %v9183_v13  ;;  %v10294_v0 = vld [vmem:[#allocation6 + $0x58c] sm:$0xf]  ;;  %v8647_v13 = vld [vmem:[#allocation6 + $0x390] sm:$0xf] }
 0x2fa   :  { %4939 = vmatpush.bf16.msrb.mxu2 %v8832_v2  ;;  %v8897_v2 = vld [vmem:[#allocation6 + $0x5a8] sm:$0xf0]  ;;  %v10235_v28 = vld [vmem:[#allocation6 + $0x3ac] sm:$0xf0] }
 0x2fb   :  { %v8900_v15 = vor.u32 %v10294_v0, %v8897_v2  ;;  %v8648_v41 = vor.u32 %v10235_v28, %v8647_v13  ;;  %v10350_v28 = vld [vmem:[#allocation6 + $0x74c] sm:$0xf] }
 0x2fc   :  { %4892 = vmatmul.bf16.vlgmr.msra.gmra.mxu2 %v11774_v33  ;;  %4931 = vmatmul.bf16.vlgmr.msrb.gmra.mxu1 %v11764_v45 }
 0x2fd   :  { %4966 = vmatpush.bf16.msra.mxu0 %v8292_v6  ;;  %4975 = vmatpush.bf16.msra.mxu1 %v8676_v5  ;;  %v8359_v6 = vld [vmem:[#allocation6 + $0x150] sm:$0xf] }
 0x2fe   :  { %4940 = vmatpush.bf16.msrb.mxu2 %v8800_v8  ;;  %v8360_v8 = vor.u32 %v10163_v3, %v8359_v6  ;;  %v10254_v6 = vld [vmem:[#allocation6 + $0x44c] sm:$0xf] }
 0x2ff   :  { %v8737_v3 = vld [vmem:[#allocation6 + $0x468] sm:$0xf0] }
 0x301   :  { %4967 = vmatpush.bf16.msra.mxu0 %v8260_v31  ;;  %4976 = vmatpush.bf16.msra.mxu1 %v8644_v22  ;;  %v8481_v31 = vld [vmem:[#allocation6 + $0x268] sm:$0xf0] }
 0x302   :  { %4941 = vmatpush.bf16.msrb.mxu2 %v8768_v36  ;;  %v8865_v22 = vld [vmem:[#allocation6 + $0x568] sm:$0xf0]  ;;  %v8484_v56 = vor.u32 %v10190_v20, %v8481_v31  ;;  %v10346_v36 = vld [vmem:[#allocation6 + $0x724] sm:$0xf0]  ;;  %v8425_v20 = vld [vmem:[#allocation6 + $0x1f0] sm:$0xf0] }
 0x303   :  { %v8868_v54 = vor.u32 %v10286_v21, %v8865_v22  ;;  %v9088_v37 = vor.u32 %v10346_v36, %v9087_v25  ;;  %v8959_v31 = vld [vmem:[#allocation6 + $0x608] sm:$0xf]  ;;  %v10246_v22 = vld [vmem:[#allocation6 + $0x40c] sm:$0xf]  ;;  %v8551_v36 = vld [vmem:[#allocation6 + $0x2d0] sm:$0xf] }
 0x304   :  { %v10314_v21 = vld [vmem:[#allocation6 + $0x624] sm:$0xf0]  ;;  %v10366_v25 = vld [vmem:[#allocation6 + $0x7cc] sm:$0xf] }
 0x305   :  { %v3240_v63 = vpop.f32.mrf.mxu3  ;;  %4968 = vmatpush.bf16.msra.mxu0 %v8228_v46  ;;  %4977 = vmatpush.bf16.msra.mxu1 %v8612_v57  ;;  %v10182_v46 = vld [vmem:[#allocation6 + $0x20c] sm:$0xf] }
 0x306   :  { %v3241_v44 = vadd.f32 %v3240_v63, %v3228_v17  ;;  %4942 = vmatpush.bf16.msrb.mxu2 %v8736_v39  ;;  %v8833_v57 = vld [vmem:[#allocation6 + $0x528] sm:$0xf0]  ;;  %v8452_v19 = vor.u32 %v10182_v46, %v8449_v27  ;;  %v9055_v63 = vld [vmem:[#allocation6 + $0x6c8] sm:$0xf]  ;;  %v10211_v46 = vld [vmem:[#allocation6 + $0x2ec] sm:$0xf0] }
 0x307   :  { %v8836_v17 = vor.u32 %v10278_v30, %v8833_v57  ;;  %v10338_v39 = vld [vmem:[#allocation6 + $0x6e4] sm:$0xf0]  ;;  %v8935_v27 = vld [vmem:[#allocation6 + $0x5d0] sm:$0xf]  ;;  %v10167_v57 = vld [vmem:[#allocation6 + $0x194] sm:$0xf]  ;;  %v8552_v4 = vor.u32 %v10211_v46, %v8551_v36 }
 0x308   :  { %v3247_v50 = vmax.f32 %v3241_v44, 0.0  ;;  %v8801_v44 = vld [vmem:[#allocation6 + $0x4e8] sm:$0xf0]  ;;  %v9056_v47 = vor.u32 %v10338_v39, %v9055_v63  ;;  %v10307_v30 = vld [vmem:[#allocation6 + $0x5ec] sm:$0xf0] }
 0x309   :  { %4969 = vmatpush.bf16.msra.mxu0 %v8196_v40  ;;  %4978 = vmatpush.bf16.msra.mxu1 %v8580_v53  ;;  %v8296_v40 = vor.u32 %v10147_v35, %v8295_v14  ;;  %v8263_v53 = vld [vmem:[#allocation6 + $0x90] sm:$0xf]  ;;  %v8804_v48 = vor.u32 %v10270_v43, %v8801_v44  ;;  %v8393_v14 = vld [vmem:[#allocation6 + $0x1b0] sm:$0xf0]  ;;  %v10326_v36 = vld [vmem:[#allocation6 + $0x68c] sm:$0xf] }
 0x30a   :  { %v11785_v32 = vpack.c.bf16 %v3247_v50, %v3247_v50  ;;  %4943 = vmatpush.bf16.msrb.mxu2 %v8704_v51  ;;  %v8769_v51 = vld [vmem:[#allocation6 + $0x4a8] sm:$0xf0]  ;;  %v8396_v63 = vor.u32 %v10167_v57, %v8393_v14  ;;  %v8519_v39 = vld [vmem:[#allocation6 + $0x290] sm:$0xf]  ;;  %v10159_v44 = vld [vmem:[#allocation6 + $0x154] sm:$0xf] }
 0x30b   :  { %v8772_v61 = vor.u32 %v10262_v9, %v8769_v51  ;;  %v10299_v43 = vld [vmem:[#allocation6 + $0x5ac] sm:$0xf0]  ;;  %v10151_v51 = vld [vmem:[#allocation6 + $0x114] sm:$0xf]  ;;  %v9025_v46 = vld [vmem:[#allocation6 + $0x6a8] sm:$0xf0] }
 0x30c   :  { %4853 = vmatmul.bf16.vlgmr.msrb.gmra.mxu3 %v11785_v32  ;;  %4970 = vmatmul.bf16.vlgmr.msra.gmra.mxu0 %v11755_v62  ;;  %v10291_v9 = vld [vmem:[#allocation6 + $0x56c] sm:$0xf0] }
 0x30d   :  { %5014 = vmatpush.bf16.msrb.mxu0 %v8424_v12  ;;  %4949 = vmatpush.bf16.msrb.mxu3 %v9184_v52  ;;  %v3242_v5 = vpop.f32.mrf.mxu3  ;;  %v10139_v12 = vld [vmem:[#allocation6 + $0xac] sm:$0xf0] }
 0x30e   :  { %4979 = vmatpush.bf16.msra.mxu1 %v8548_v26  ;;  %4988 = vmatpush.bf16.msra.mxu2 %v8932_v58  ;;  %v8264_v50 = vor.u32 %v10139_v12, %v8263_v53  ;;  %v8231_v52 = vld [vmem:[#allocation6 + $0x50] sm:$0xf]  ;;  %v8361_v53 = vld [vmem:[#allocation6 + $0x170] sm:$0xf0] }
 0x30f   :  { %4944 = vmatmul.bf16.vlgmr.msrb.gmra.mxu2 %v11774_v33  ;;  %v10131_v26 = vld [vmem:[#allocation6 + $0x6c] sm:$0xf0]  ;;  %v8364_v49 = vor.u32 %v10159_v44, %v8361_v53  ;;  %v10119_v53 = vld [vmem:[#allocation6 + $0x14] sm:$0xf] }
 0x310   :  { %v8615_v58 = vld [vmem:[#allocation6 + $0x350] sm:$0xf]  ;;  %v8232_v0 = vor.u32 %v10131_v26, %v8231_v52  ;;  %v8329_v52 = vld [vmem:[#allocation6 + $0x130] sm:$0xf0] }
 0x311   :  { %5015 = vmatpush.bf16.msrb.mxu0 %v8392_v34  ;;  %4950 = vmatpush.bf16.msrb.mxu3 %v9152_v7  ;;  %v8991_v34 = vld [vmem:[#allocation6 + $0x648] sm:$0xf]  ;;  %v8616_v2 = vor.u32 %v10227_v55, %v8615_v58  ;;  %v8199_v5 = vld [vmem:[#allocation6 + $0x10] sm:$0xf]  ;;  %v10342_v55 = vld [vmem:[#allocation6 + $0x70c] sm:$0xf] }
 0x312   :  { %4980 = vmatpush.bf16.msra.mxu1 %v8516_v10  ;;  %4989 = vmatpush.bf16.msra.mxu2 %v8900_v15  ;;  %v10123_v7 = vld [vmem:[#allocation6 + $0x2c] sm:$0xf0]  ;;  %v8992_v16 = vor.u32 %v10322_v38, %v8991_v34  ;;  %v8332_v34 = vor.u32 %v10151_v51, %v8329_v52 }
 0x313   :  { %v8583_v10 = vld [vmem:[#allocation6 + $0x310] sm:$0xf]  ;;  %v8200_v23 = vor.u32 %v10123_v7, %v8199_v5  ;;  %v8297_v5 = vld [vmem:[#allocation6 + $0xf0] sm:$0xf0] }
 0x314   :  { %v10219_v15 = vld [vmem:[#allocation6 + $0x32c] sm:$0xf0] }
 0x315   :  { %5016 = vmatpush.bf16.msrb.mxu0 %v8360_v8  ;;  %4951 = vmatpush.bf16.msrb.mxu3 %v9120_v59  ;;  %v8740_v8 = vor.u32 %v10254_v6, %v8737_v3  ;;  %v8584_v24 = vor.u32 %v10219_v15, %v8583_v10  ;;  %v8705_v59 = vld [vmem:[#allocation6 + $0x428] sm:$0xf0]  ;;  %v8455_v38 = vld [vmem:[#allocation6 + $0x210] sm:$0xf]  ;;  %v10143_v3 = vld [vmem:[#allocation6 + $0xd4] sm:$0xf] }
 0x316   :  { %4981 = vmatpush.bf16.msra.mxu1 %v8484_v56  ;;  %4990 = vmatpush.bf16.msra.mxu2 %v8868_v54  ;;  %v9185_v56 = vld [vmem:[#allocation6 + $0x7e8] sm:$0xf0]  ;;  %v8428_v54 = vor.u32 %v10175_v18, %v8425_v20  ;;  %v8708_v35 = vor.u32 %v10246_v22, %v8705_v59  ;;  %v10283_v6 = vld [vmem:[#allocation6 + $0x52c] sm:$0xf0]  ;;  %v10239_v10 = vld [vmem:[#allocation6 + $0x3d4] sm:$0xf] }
 0x317   :  { %v9188_v11 = vor.u32 %v10366_v25, %v9185_v56  ;;  %v8681_v15 = vld [vmem:[#allocation6 + $0x3f0] sm:$0xf0]  ;;  %v10334_v18 = vld [vmem:[#allocation6 + $0x6cc] sm:$0xf]  ;;  %v10267_v14 = vld [vmem:[#allocation6 + $0x4ac] sm:$0xf0] }
 0x318   :  { %v9057_v20 = vld [vmem:[#allocation6 + $0x6e8] sm:$0xf0]  ;;  %v8684_v22 = vor.u32 %v10239_v10, %v8681_v15  ;;  %v8265_v59 = vld [vmem:[#allocation6 + $0xb0] sm:$0xf0]  ;;  %v9191_v51 = vld [vmem:[#allocation6 + $0x7d0] sm:$0xf] }
 0x319   :  { %5017 = vmatpush.bf16.msrb.mxu0 %v8328_v29  ;;  %4952 = vmatpush.bf16.msrb.mxu3 %v9088_v37  ;;  %v8960_v29 = vor.u32 %v10314_v21, %v8959_v31  ;;  %v10358_v37 = vld [vmem:[#allocation6 + $0x78c] sm:$0xf]  ;;  %v8300_v31 = vor.u32 %v10143_v3, %v8297_v5  ;;  %v8807_v21 = vld [vmem:[#allocation6 + $0x4d0] sm:$0xf]  ;;  %v9060_v25 = vor.u32 %v10334_v18, %v9057_v20  ;;  %v10231_v56 = vld [vmem:[#allocation6 + $0x394] sm:$0xf] }
 0x31a   :  { %4982 = vmatpush.bf16.msra.mxu1 %v8452_v19  ;;  %4991 = vmatpush.bf16.msra.mxu2 %v8836_v17  ;;  %v9153_v19 = vld [vmem:[#allocation6 + $0x7a8] sm:$0xf0]  ;;  %v8936_v17 = vor.u32 %v10307_v30, %v8935_v27  ;;  %v8775_v30 = vld [vmem:[#allocation6 + $0x490] sm:$0xf]  ;;  %v8399_v3 = vld [vmem:[#allocation6 + $0x198] sm:$0xf] }
 0x31b   :  { %v9156_v12 = vor.u32 %v10358_v37, %v9153_v19  ;;  %v10223_v37 = vld [vmem:[#allocation6 + $0x354] sm:$0xf]  ;;  %v10371_v52 = vld [vmem:[#allocation6 + $0x7ec] sm:$0xf0]  ;;  %v10172_v5 = vld [vmem:[#allocation6 + $0x1b4] sm:$0xf0] }
 0x31c   :  { %4905 = vmatmul.bf16.vlgmr.msra.gmra.mxu3 %v11785_v32  ;;  %v8617_v19 = vld [vmem:[#allocation6 + $0x370] sm:$0xf0]  ;;  %v9159_v10 = vld [vmem:[#allocation6 + $0x790] sm:$0xf] }
 0x31d   :  { %5018 = vmatpush.bf16.msrb.mxu0 %v8296_v40  ;;  %4953 = vmatpush.bf16.msrb.mxu3 %v9056_v47  ;;  %v10203_v40 = vld [vmem:[#allocation6 + $0x2ac] sm:$0xf0]  ;;  %v9121_v47 = vld [vmem:[#allocation6 + $0x768] sm:$0xf0]  ;;  %v8620_v44 = vor.u32 %v10223_v37, %v8617_v19  ;;  %v10199_v20 = vld [vmem:[#allocation6 + $0x294] sm:$0xf] }
 0x31e   :  { %5027 = vmatpush.bf16.msrb.mxu1 %v8680_v42  ;;  %4992 = vmatpush.bf16.msra.mxu2 %v8804_v48  ;;  %v8903_v42 = vld [vmem:[#allocation6 + $0x590] sm:$0xf]  ;;  %v8520_v13 = vor.u32 %v10203_v40, %v8519_v39  ;;  %v9124_v26 = vor.u32 %v10350_v28, %v9121_v47  ;;  %v8776_v39 = vor.u32 %v10267_v14, %v8775_v30  ;;  %v8585_v47 = vld [vmem:[#allocation6 + $0x330] sm:$0xf0] }
 0x31f   :  { %4983 = vmatmul.bf16.vlgmr.msra.gmra.mxu1 %v11764_v45  ;;  %v8904_v48 = vor.u32 %v10299_v43, %v8903_v42  ;;  %v8743_v42 = vld [vmem:[#allocation6 + $0x450] sm:$0xf]  ;;  %v10287_v30 = vld [vmem:[#allocation6 + $0x554] sm:$0xf] }
 0x320   :  { %v10259_v43 = vld [vmem:[#allocation6 + $0x46c] sm:$0xf0] }
 0x321   :  { %5019 = vmatpush.bf16.msrb.mxu0 %v8264_v50  ;;  %4954 = vmatpush.bf16.msrb.mxu3 %v9024_v60  ;;  %v10195_v50 = vld [vmem:[#allocation6 + $0x26c] sm:$0xf0]  ;;  %v9089_v60 = vld [vmem:[#allocation6 + $0x728] sm:$0xf0] }
 0x322   :  { %5028 = vmatpush.bf16.msrb.mxu1 %v8648_v41  ;;  %4993 = vmatpush.bf16.msra.mxu2 %v8772_v61  ;;  %v8871_v41 = vld [vmem:[#allocation6 + $0x550] sm:$0xf]  ;;  %v8488_v58 = vor.u32 %v10195_v50, %v8487_v1  ;;  %v9092_v7 = vor.u32 %v10342_v55, %v9089_v60  ;;  %v10310_v1 = vld [vmem:[#allocation6 + $0x60c] sm:$0xf] }
 0x323   :  { %v8872_v61 = vor.u32 %v10291_v9, %v8871_v41  ;;  %v8961_v50 = vld [vmem:[#allocation6 + $0x628] sm:$0xf0]  ;;  %v8744_v41 = vor.u32 %v10259_v43, %v8743_v42  ;;  %v8711_v55 = vld [vmem:[#allocation6 + $0x410] sm:$0xf]  ;;  %v10279_v43 = vld [vmem:[#allocation6 + $0x514] sm:$0xf] }
 0x324   :  { %v10251_v60 = vld [vmem:[#allocation6 + $0x42c] sm:$0xf0] }
 0x325   :  { %5020 = vmatpush.bf16.msrb.mxu0 %v8232_v0  ;;  %4955 = vmatpush.bf16.msrb.mxu3 %v8992_v16  ;;  %v10187_v0 = vld [vmem:[#allocation6 + $0x22c] sm:$0xf0] }
 0x326   :  { %5029 = vmatpush.bf16.msrb.mxu1 %v8616_v2  ;;  %4994 = vmatpush.bf16.msra.mxu2 %v8740_v8  ;;  %v8839_v2 = vld [vmem:[#allocation6 + $0x510] sm:$0xf]  ;;  %v8456_v16 = vor.u32 %v10187_v0, %v8455_v38  ;;  %v8553_v38 = vld [vmem:[#allocation6 + $0x2f0] sm:$0xf0] }
 0x327   :  { %v8840_v8 = vor.u32 %v10283_v6, %v8839_v2  ;;  %v10303_v0 = vld [vmem:[#allocation6 + $0x5d4] sm:$0xf]  ;;  %v9192_v6 = vor.u32 %v10371_v52, %v9191_v51  ;;  %v10363_v15 = vld [vmem:[#allocation6 + $0x7ac] sm:$0xf0] }
 0x328   :  { %v8937_v2 = vld [vmem:[#allocation6 + $0x5f0] sm:$0xf0]  ;;  %v9095_v37 = vld [vmem:[#allocation6 + $0x710] sm:$0xf] }
 0x329   :  { %5021 = vmatpush.bf16.msrb.mxu0 %v8200_v23  ;;  %4956 = vmatpush.bf16.msrb.mxu3 %v8960_v29  ;;  %v10275_v23 = vld [vmem:[#allocation6 + $0x4ec] sm:$0xf0]  ;;  %v8940_v18 = vor.u32 %v10303_v0, %v8937_v2  ;;  %v10271_v51 = vld [vmem:[#allocation6 + $0x4d4] sm:$0xf] }
 0x32a   :  { %5030 = vmatpush.bf16.msrb.mxu1 %v8584_v24  ;;  %4995 = vmatpush.bf16.msra.mxu2 %v8708_v35  ;;  %v10135_v24 = vld [vmem:[#allocation6 + $0x94] sm:$0xf]  ;;  %v8808_v27 = vor.u32 %v10275_v23, %v8807_v21  ;;  %v9160_v23 = vor.u32 %v10363_v15, %v9159_v10  ;;  %v10347_v19 = vld [vmem:[#allocation6 + $0x72c] sm:$0xf0]  ;;  %v8239_v10 = vld [vmem:[#allocation6 + $0x58] sm:$0xf] }
 0x32b   :  { %v8268_v29 = vor.u32 %v10135_v24, %v8265_v59  ;;  %v10127_v35 = vld [vmem:[#allocation6 + $0x54] sm:$0xf]  ;;  %v8367_v24 = vld [vmem:[#allocation6 + $0x158] sm:$0xf]  ;;  %v10331_v0 = vld [vmem:[#allocation6 + $0x6ac] sm:$0xf0] }
 0x32c   :  { %5022 = vmatmul.bf16.vlgmr.msrb.gmra.mxu0 %v11755_v62  ;;  %4957 = vmatmul.bf16.vlgmr.msrb.gmra.mxu3 %v11785_v32  ;;  %v10295_v21 = vld [vmem:[#allocation6 + $0x594] sm:$0xf]  ;;  %v10164_v59 = vld [vmem:[#allocation6 + $0x174] sm:$0xf0] }
 0x32d   :  { %5066 = vmatpush.bf16.msra.mxu0 %v8428_v54  ;;  %5001 = vmatpush.bf16.msra.mxu3 %v9188_v11  ;;  %v8649_v54 = vld [vmem:[#allocation6 + $0x3b0] sm:$0xf0] }
 0x32e   :  { %5031 = vmatpush.bf16.msrb.mxu1 %v8552_v4  ;;  %5040 = vmatpush.bf16.msrb.mxu2 %v8936_v17  ;;  %v8652_v57 = vor.u32 %v10231_v56, %v8649_v54  ;;  %v8233_v11 = vld [vmem:[#allocation6 + $0x70] sm:$0xf0]  ;;  %v9028_v4 = vor.u32 %v10326_v36, %v9025_v46  ;;  %v10318_v17 = vld [vmem:[#allocation6 + $0x64c] sm:$0xf]  ;;  %v10355_v56 = vld [vmem:[#allocation6 + $0x76c] sm:$0xf0] }
 0x32f   :  { %4996 = vmatmul.bf16.vlgmr.msra.gmra.mxu2 %v11774_v33  ;;  %v8236_v40 = vor.u32 %v10127_v35, %v8233_v11  ;;  %v10191_v46 = vld [vmem:[#allocation6 + $0x254] sm:$0xf]  ;;  %v8335_v35 = vld [vmem:[#allocation6 + $0x118] sm:$0xf] }
 0x330   :  { %v10156_v11 = vld [vmem:[#allocation6 + $0x134] sm:$0xf0]  ;;  %v8809_v52 = vld [vmem:[#allocation6 + $0x4f0] sm:$0xf0] }
 0x331   :  { %5067 = vmatpush.bf16.msra.mxu0 %v8396_v63  ;;  %5002 = vmatpush.bf16.msra.mxu3 %v9156_v12  ;;  %v8993_v63 = vld [vmem:[#allocation6 + $0x668] sm:$0xf0]  ;;  %v8201_v12 = vld [vmem:[#allocation6 + $0x30] sm:$0xf0]  ;;  %v8336_v42 = vor.u32 %v10156_v11, %v8335_v35  ;;  %v8812_v2 = vor.u32 %v10271_v51, %v8809_v52  ;;  %v10315_v35 = vld [vmem:[#allocation6 + $0x62c] sm:$0xf0] }
 0x332   :  { %5032 = vmatpush.bf16.msrb.mxu1 %v8520_v13  ;;  %5041 = vmatpush.bf16.msrb.mxu2 %v8904_v48  ;;  %v10215_v13 = vld [vmem:[#allocation6 + $0x314] sm:$0xf]  ;;  %v8996_v28 = vor.u32 %v10318_v17, %v8993_v63  ;;  %v8431_v48 = vld [vmem:[#allocation6 + $0x1d8] sm:$0xf]  ;;  %v8204_v9 = vor.u32 %v10119_v53, %v8201_v12  ;;  %v9096_v12 = vor.u32 %v10347_v19, %v9095_v37 }
 0x333   :  { %v8303_v53 = vld [vmem:[#allocation6 + $0xd8] sm:$0xf]  ;;  %v10367_v37 = vld [vmem:[#allocation6 + $0x7d4] sm:$0xf] }
 0x334   :  { %v9193_v19 = vld [vmem:[#allocation6 + $0x7f0] sm:$0xf0]  ;;  %v8527_v51 = vld [vmem:[#allocation6 + $0x298] sm:$0xf] }
 0x335   :  { %5068 = vmatpush.bf16.msra.mxu0 %v8364_v49  ;;  %5003 = vmatpush.bf16.msra.mxu3 %v9124_v26  ;;  %v10180_v49 = vld [vmem:[#allocation6 + $0x1f4] sm:$0xf0]  ;;  %v8588_v26 = vor.u32 %v10215_v13, %v8585_v47 }
 0x336   :  { %5033 = vmatpush.bf16.msrb.mxu1 %v8488_v58  ;;  %5042 = vmatpush.bf16.msrb.mxu2 %v8872_v61  ;;  %v8432_v58 = vor.u32 %v10180_v49, %v8431_v48  ;;  %v10207_v61 = vld [vmem:[#allocation6 + $0x2d4] sm:$0xf]  ;;  %v10148_v13 = vld [vmem:[#allocation6 + $0xf4] sm:$0xf0]  ;;  %v9063_v48 = vld [vmem:[#allocation6 + $0x6d0] sm:$0xf] }
 0x337   :  { %v10244_v47 = vld [vmem:[#allocation6 + $0x3f4] sm:$0xf0]  ;;  %v10339_v49 = vld [vmem:[#allocation6 + $0x6ec] sm:$0xf0] }
 0x339   :  { %5069 = vmatpush.bf16.msra.mxu0 %v8332_v34  ;;  %5004 = vmatpush.bf16.msra.mxu3 %v9092_v7  ;;  %v8964_v34 = vor.u32 %v10310_v1, %v8961_v50  ;;  %v8712_v7 = vor.u32 %v10251_v60, %v8711_v55  ;;  %v10140_v55 = vld [vmem:[#allocation6 + $0xb4] sm:$0xf0] }
 0x33a   :  { %5034 = vmatpush.bf16.msrb.mxu1 %v8456_v16  ;;  %5043 = vmatpush.bf16.msrb.mxu2 %v8840_v8  ;;  %v8556_v16 = vor.u32 %v10207_v61, %v8553_v38  ;;  %v8400_v8 = vor.u32 %v10172_v5, %v8399_v3  ;;  %v8655_v60 = vld [vmem:[#allocation6 + $0x398] sm:$0xf]  ;;  %v9031_v38 = vld [vmem:[#allocation6 + $0x690] sm:$0xf]  ;;  %v10263_v5 = vld [vmem:[#allocation6 + $0x494] sm:$0xf] }
 0x33b   :  { %v10236_v61 = vld [vmem:[#allocation6 + $0x3b4] sm:$0xf0]  ;;  %v9032_v15 = vor.u32 %v10331_v0, %v9031_v38  ;;  %v10160_v38 = vld [vmem:[#allocation6 + $0x15c] sm:$0xf] }
 0x33c   :  { %v8656_v3 = vor.u32 %v10236_v61, %v8655_v60  ;;  %v8369_v0 = vld [vmem:[#allocation6 + $0x178] sm:$0xf0] }
 0x33d   :  { %5070 = vmatpush.bf16.msra.mxu0 %v8300_v31  ;;  %5005 = vmatpush.bf16.msra.mxu3 %v9060_v25  ;;  %v8521_v31 = vld [vmem:[#allocation6 + $0x2b0] sm:$0xf0]  ;;  %v9127_v25 = vld [vmem:[#allocation6 + $0x750] sm:$0xf] }
 0x33e   :  { %5079 = vmatpush.bf16.msra.mxu1 %v8684_v22  ;;  %5044 = vmatpush.bf16.msrb.mxu2 %v8808_v27  ;;  %v8905_v22 = vld [vmem:[#allocation6 + $0x5b0] sm:$0xf0]  ;;  %v8524_v54 = vor.u32 %v10199_v20, %v8521_v31  ;;  %v8368_v27 = vor.u32 %v10164_v59, %v8367_v24  ;;  %v9128_v14 = vor.u32 %v10355_v56, %v9127_v25  ;;  %v10228_v20 = vld [vmem:[#allocation6 + $0x374] sm:$0xf0]  ;;  %v10323_v31 = vld [vmem:[#allocation6 + $0x66c] sm:$0xf0] }
 0x33f   :  { %5035 = vmatmul.bf16.vlgmr.msrb.gmra.mxu1 %v11764_v45  ;;  %v8908_v36 = vor.u32 %v10295_v21, %v8905_v22  ;;  %v10255_v22 = vld [vmem:[#allocation6 + $0x454] sm:$0xf]  ;;  %v8207_v25 = vld [vmem:[#allocation6 + $0x18] sm:$0xf] }
 0x340   :  { %v8745_v59 = vld [vmem:[#allocation6 + $0x470] sm:$0xf0]  ;;  %v10124_v56 = vld [vmem:[#allocation6 + $0x34] sm:$0xf0] }
 0x341   :  { %5071 = vmatpush.bf16.msra.mxu0 %v8268_v29  ;;  %5006 = vmatpush.bf16.msra.mxu3 %v9028_v4  ;;  %v8489_v29 = vld [vmem:[#allocation6 + $0x270] sm:$0xf0]  ;;  %v8748_v11 = vor.u32 %v10255_v22, %v8745_v59  ;;  %v8463_v59 = vld [vmem:[#allocation6 + $0x218] sm:$0xf] }
 0x342   :  { %5080 = vmatpush.bf16.msra.mxu1 %v8652_v57  ;;  %5045 = vmatpush.bf16.msrb.mxu2 %v8776_v39  ;;  %v8873_v57 = vld [vmem:[#allocation6 + $0x570] sm:$0xf0]  ;;  %v8492_v17 = vor.u32 %v10191_v46, %v8489_v29  ;;  %v10220_v46 = vld [vmem:[#allocation6 + $0x334] sm:$0xf0] }
 0x343   :  { %v8876_v63 = vor.u32 %v10287_v30, %v8873_v57  ;;  %v10183_v39 = vld [vmem:[#allocation6 + $0x214] sm:$0xf]  ;;  %v8433_v57 = vld [vmem:[#allocation6 + $0x1f8] sm:$0xf0] }
 0x344   :  { %v9097_v22 = vld [vmem:[#allocation6 + $0x730] sm:$0xf0] }
 0x345   :  { %5072 = vmatpush.bf16.msra.mxu0 %v8236_v40  ;;  %5007 = vmatpush.bf16.msra.mxu3 %v8996_v28  ;;  %v8457_v40 = vld [vmem:[#allocation6 + $0x230] sm:$0xf0]  ;;  %v8687_v28 = vld [vmem:[#allocation6 + $0x3d8] sm:$0xf] }
 0x346   :  { %5081 = vmatpush.bf16.msra.mxu1 %v8620_v44  ;;  %5046 = vmatpush.bf16.msrb.mxu2 %v8744_v41  ;;  %v8841_v44 = vld [vmem:[#allocation6 + $0x530] sm:$0xf0]  ;;  %v8460_v1 = vor.u32 %v10183_v39, %v8457_v40  ;;  %v8304_v41 = vor.u32 %v10148_v13, %v8303_v53  ;;  %v10212_v53 = vld [vmem:[#allocation6 + $0x2f4] sm:$0xf0] }
 0x347   :  { %v8844_v50 = vor.u32 %v10279_v43, %v8841_v44  ;;  %v10247_v39 = vld [vmem:[#allocation6 + $0x414] sm:$0xf]  ;;  %v10308_v13 = vld [vmem:[#allocation6 + $0x5f4] sm:$0xf0] }
 0x348   :  { %v8713_v40 = vld [vmem:[#allocation6 + $0x430] sm:$0xf0] }
 0x349   :  { %5073 = vmatpush.bf16.msra.mxu0 %v8204_v9  ;;  %5008 = vmatpush.bf16.msra.mxu3 %v8964_v34  ;;  %v11799_v4 = vpop.f32.mrf.mxu0  ;;  %v8688_v9 = vor.u32 %v10244_v47, %v8687_v28  ;;  %v9196_v28 = vor.u32 %v10367_v37, %v9193_v19  ;;  %v10168_v47 = vld [vmem:[#allocation6 + $0x19c] sm:$0xf]  ;;  %v10335_v19 = vld [vmem:[#allocation6 + $0x6d4] sm:$0xf] }
 0x34a   :  { %5082 = vmatpush.bf16.msra.mxu1 %v8588_v26  ;;  %5047 = vmatpush.bf16.msrb.mxu2 %v8712_v7  ;;  %v8271_v26 = vld [vmem:[#allocation6 + $0x98] sm:$0xf]  ;;  %v8777_v7 = vld [vmem:[#allocation6 + $0x4b0] sm:$0xf0] }
 0x34b   :  { %v8780_v21 = vor.u32 %v10263_v5, %v8777_v7  ;;  %v8495_v7 = vld [vmem:[#allocation6 + $0x258] sm:$0xf] }
 0x34c   :  { %5074 = vmatmul.bf16.vlgmr.msra.gmra.mxu0 %v11755_v62  ;;  %5009 = vmatmul.bf16.vlgmr.msra.gmra.mxu3 %v11785_v32 }
 0x34d   :  { %5118 = vmatpush.bf16.msrb.mxu0 %v8432_v58  ;;  %5053 = vmatpush.bf16.msrb.mxu3 %v9192_v6  ;;  %v9064_v58 = vor.u32 %v10339_v49, %v9063_v48  ;;  %v8272_v6 = vor.u32 %v10140_v55, %v8271_v26  ;;  %v8401_v48 = vld [vmem:[#allocation6 + $0x1b8] sm:$0xf0]  ;;  %v8716_v49 = vor.u32 %v10247_v39, %v8713_v40  ;;  %v10204_v26 = vld [vmem:[#allocation6 + $0x2b4] sm:$0xf0] }
 0x34e   :  { %5083 = vmatpush.bf16.msra.mxu1 %v8556_v16  ;;  %5092 = vmatpush.bf16.msra.mxu2 %v8940_v18  ;;  %v10132_v16 = vld [vmem:[#allocation6 + $0x74] sm:$0xf0]  ;;  %v8404_v52 = vor.u32 %v10168_v47, %v8401_v48  ;;  %v8657_v47 = vld [vmem:[#allocation6 + $0x3b8] sm:$0xf0]  ;;  %v10327_v48 = vld [vmem:[#allocation6 + $0x694] sm:$0xf] }
 0x34f   :  { %5048 = vmatmul.bf16.vlgmr.msrb.gmra.mxu2 %v11774_v33  ;;  %v8623_v18 = vld [vmem:[#allocation6 + $0x358] sm:$0xf] }
 0x350   :  { %v8624_v24 = vor.u32 %v10228_v20, %v8623_v18  ;;  %v10300_v55 = vld [vmem:[#allocation6 + $0x5b4] sm:$0xf0] }
 0x351   :  { %5119 = vmatpush.bf16.msrb.mxu0 %v8400_v8  ;;  %5054 = vmatpush.bf16.msrb.mxu3 %v9160_v23  ;;  %v4817_v34 = vpop.f32.mrf.mxu0  ;;  %v8999_v8 = vld [vmem:[#allocation6 + $0x650] sm:$0xf]  ;;  %v8240_v23 = vor.u32 %v10132_v16, %v8239_v10  ;;  %v8372_v10 = vor.u32 %v10160_v38, %v8369_v0  ;;  %v8879_v16 = vld [vmem:[#allocation6 + $0x558] sm:$0xf]  ;;  %v10319_v0 = vld [vmem:[#allocation6 + $0x654] sm:$0xf] }
 0x352   :  { %5084 = vmatpush.bf16.msra.mxu1 %v8524_v54  ;;  %5093 = vmatpush.bf16.msra.mxu2 %v8908_v36  ;;  %v9000_v54 = vor.u32 %v10323_v31, %v8999_v8  ;;  %v8591_v36 = vld [vmem:[#allocation6 + $0x318] sm:$0xf]  ;;  %v10152_v8 = vld [vmem:[#allocation6 + $0x11c] sm:$0xf] }
 0x353   :  { %v10292_v18 = vld [vmem:[#allocation6 + $0x574] sm:$0xf0]  ;;  %v8337_v31 = vld [vmem:[#allocation6 + $0x138] sm:$0xf0] }
 0x355   :  { %5120 = vmatpush.bf16.msrb.mxu0 %v8368_v27  ;;  %5055 = vmatpush.bf16.msrb.mxu3 %v9128_v14  ;;  %v10176_v27 = vld [vmem:[#allocation6 + $0x1dc] sm:$0xf]  ;;  %v8967_v14 = vld [vmem:[#allocation6 + $0x610] sm:$0xf] }
 0x356   :  { %5085 = vmatpush.bf16.msra.mxu1 %v8492_v17  ;;  %5094 = vmatpush.bf16.msra.mxu2 %v8876_v63  ;;  %v8208_v17 = vor.u32 %v10124_v56, %v8207_v25  ;;  %v8592_v63 = vor.u32 %v10220_v46, %v8591_v36  ;;  %v8436_v43 = vor.u32 %v10176_v27, %v8433_v57  ;;  %v10188_v25 = vld [vmem:[#allocation6 + $0x234] sm:$0xf0]  ;;  %v10144_v46 = vld [vmem:[#allocation6 + $0xdc] sm:$0xf] }
 0x357   :  { %v8968_v44 = vor.u32 %v10315_v35, %v8967_v14  ;;  %v8340_v56 = vor.u32 %v10152_v8, %v8337_v31  ;;  %v10284_v36 = vld [vmem:[#allocation6 + $0x534] sm:$0xf0]  ;;  %v8305_v14 = vld [vmem:[#allocation6 + $0xf8] sm:$0xf0]  ;;  %v9291_v31 = vld [vmem:[%s12671_s11 + $0xa8] sm:$0xf] }
 0x358   :  { %v10240_v35 = vld [vmem:[#allocation6 + $0x3dc] sm:$0xf]  ;;  %v8308_v40 = vor.u32 %v10144_v46, %v8305_v14  ;;  %v8719_v46 = vld [vmem:[#allocation6 + $0x418] sm:$0xf] }
 0x359   :  { %5121 = vmatpush.bf16.msrb.mxu0 %v8336_v42  ;;  %5056 = vmatpush.bf16.msrb.mxu3 %v9096_v12  ;;  %v11802_v29 = vpop.f32.mrf.mxu1  ;;  %v11804_v30 = vpop.f32.mrf.mxu0  ;;  %v8559_v42 = vld [vmem:[#allocation6 + $0x2d8] sm:$0xf]  ;;  %v8593_v8 = vld [vmem:[#allocation6 + $0x338] sm:$0xf0] }
 0x35a   :  { %5086 = vmatpush.bf16.msra.mxu1 %v8460_v1  ;;  %5095 = vmatpush.bf16.msra.mxu2 %v8844_v50  ;;  %v8943_v12 = vld [vmem:[#allocation6 + $0x5d8] sm:$0xf]  ;;  %v10359_v1 = vld [vmem:[#allocation6 + $0x794] sm:$0xf]  ;;  %v10208_v14 = vld [vmem:[#allocation6 + $0x2dc] sm:$0xf] }
 0x35b   :  { %v9161_v50 = vld [vmem:[#allocation6 + $0x7b0] sm:$0xf0] }
 0x35c   :  { %v9164_v34 = vor.u32 %v10359_v1, %v9161_v50 }
 0x35d   :  { %5122 = vmatpush.bf16.msrb.mxu0 %v8304_v41  ;;  %5057 = vmatpush.bf16.msrb.mxu3 %v9064_v58  ;;  %v8560_v41 = vor.u32 %v10212_v53, %v8559_v42  ;;  %v8911_v58 = vld [vmem:[#allocation6 + $0x598] sm:$0xf]  ;;  %v10136_v53 = vld [vmem:[#allocation6 + $0x9c] sm:$0xf] }
 0x35e   :  { %5131 = vmatpush.bf16.msrb.mxu1 %v8688_v9  ;;  %5096 = vmatpush.bf16.msra.mxu2 %v8812_v2  ;;  %v8944_v9 = vor.u32 %v10308_v13, %v8943_v12  ;;  %v10351_v2 = vld [vmem:[#allocation6 + $0x754] sm:$0xf]  ;;  %v8912_v5 = vor.u32 %v10300_v55, %v8911_v58  ;;  %v8273_v13 = vld [vmem:[#allocation6 + $0xb8] sm:$0xf0] }
 0x35f   :  { %5087 = vmatmul.bf16.vlgmr.msra.gmra.mxu1 %v11764_v45 }
 0x361   :  { %5123 = vmatpush.bf16.msrb.mxu0 %v8272_v6  ;;  %5058 = vmatpush.bf16.msrb.mxu3 %v9032_v15  ;;  %v4830_v60 = vpop.f32.mrf.mxu1  ;;  %v4869_v61 = vpop.f32.mrf.mxu0  ;;  %v9129_v6 = vld [vmem:[#allocation6 + $0x770] sm:$0xf0]  ;;  %v10196_v15 = vld [vmem:[#allocation6 + $0x274] sm:$0xf0] }
 0x362   :  { %5132 = vmatpush.bf16.msrb.mxu1 %v8656_v3  ;;  %5097 = vmatpush.bf16.msra.mxu2 %v8780_v21  ;;  %v8528_v3 = vor.u32 %v10204_v26, %v8527_v51  ;;  %v9132_v20 = vor.u32 %v10351_v2, %v9129_v6  ;;  %v10343_v21 = vld [vmem:[#allocation6 + $0x714] sm:$0xf]  ;;  %v8783_v51 = vld [vmem:[#allocation6 + $0x498] sm:$0xf]  ;;  %v10128_v26 = vld [vmem:[#allocation6 + $0x5c] sm:$0xf] }
 0x363   :  { %v9100_v57 = vor.u32 %v10343_v21, %v9097_v22  ;;  %v8241_v60 = vld [vmem:[#allocation6 + $0x78] sm:$0xf0]  ;;  %v9001_v2 = vld [vmem:[#allocation6 + $0x670] sm:$0xf0] }
 0x364   :  { %v10224_v61 = vld [vmem:[#allocation6 + $0x35c] sm:$0xf]  ;;  %v10395_v21 = vld [vmem:[%s12671_s11 + $0xb0] sm:$0xf0] }
 0x365   :  { %5124 = vmatpush.bf16.msrb.mxu0 %v8240_v23  ;;  %5059 = vmatpush.bf16.msrb.mxu3 %v9000_v54  ;;  %v8496_v23 = vor.u32 %v10196_v15, %v8495_v7  ;;  %v8847_v54 = vld [vmem:[#allocation6 + $0x518] sm:$0xf]  ;;  %v10120_v15 = vld [vmem:[#allocation6 + $0x1c] sm:$0xf]  ;;  %v10311_v22 = vld [vmem:[#allocation6 + $0x614] sm:$0xf] }
 0x366   :  { %5133 = vmatpush.bf16.msrb.mxu1 %v8624_v24  ;;  %5098 = vmatpush.bf16.msra.mxu2 %v8748_v11  ;;  %v8880_v24 = vor.u32 %v10292_v18, %v8879_v16  ;;  %v8689_v11 = vld [vmem:[#allocation6 + $0x3f8] sm:$0xf0]  ;;  %v8848_v39 = vor.u32 %v10284_v36, %v8847_v54  ;;  %v9004_v18 = vor.u32 %v10319_v0, %v9001_v2 }
 0x367   :  { %v8692_v42 = vor.u32 %v10240_v35, %v8689_v11  ;;  %v8209_v16 = vld [vmem:[#allocation6 + $0x38] sm:$0xf0]  ;;  %v9292_v11 = vor.u32 %v10395_v21, %v9291_v31 }
 0x368   :  { %v8212_v54 = vor.u32 %v10120_v15, %v8209_v16  ;;  %v8497_v2 = vld [vmem:[#allocation6 + $0x278] sm:$0xf0]  ;;  %v10348_v15 = vld [vmem:[#allocation6 + $0x734] sm:$0xf0]  ;;  %v11850_v16 = vld [vmem:[%s12670_s10] sm:$0xff] }
 0x369   :  { %5125 = vmatpush.bf16.msrb.mxu0 %v8208_v17  ;;  %5060 = vmatpush.bf16.msrb.mxu3 %v8968_v44  ;;  %v11809_v27 = vpop.f32.mrf.mxu1  ;;  %v9065_v17 = vld [vmem:[#allocation6 + $0x6f0] sm:$0xf0]  ;;  %v10276_v44 = vld [vmem:[#allocation6 + $0x4f4] sm:$0xf0]  ;;  %v8465_v31 = vld [vmem:[#allocation6 + $0x238] sm:$0xf0] }
 0x36a   :  { %5134 = vmatpush.bf16.msrb.mxu1 %v8592_v63  ;;  %5099 = vmatpush.bf16.msra.mxu2 %v8716_v49  ;;  %v8464_v63 = vor.u32 %v10188_v25, %v8463_v59  ;;  %v9068_v12 = vor.u32 %v10335_v19, %v9065_v17  ;;  %v9033_v49 = vld [vmem:[#allocation6 + $0x6b0] sm:$0xf0]  ;;  %v9199_v25 = vld [vmem:[#allocation6 + $0x7d8] sm:$0xf]  ;;  %v8561_v17 = vld [vmem:[#allocation6 + $0x2f8] sm:$0xf0] }
 0x36b   :  { %v11811_v37 = vpop.f32.mrf.mxu0  ;;  %v9036_v55 = vor.u32 %v10327_v48, %v9033_v49  ;;  %v8529_v49 = vld [vmem:[#allocation6 + $0x2b8] sm:$0xf0] }
 0x36c   :  { %5126 = vmatmul.bf16.vlgmr.msrb.gmra.mxu0 %v11755_v62  ;;  %5061 = vmatmul.bf16.vlgmr.msrb.gmra.mxu3 %v11785_v32 }
 0x36d   :  { %5170 = vmatpush.bf16.msra.mxu0 %v8436_v43  ;;  %5105 = vmatpush.bf16.msra.mxu3 %v9196_v28  ;;  %v8815_v43 = vld [vmem:[#allocation6 + $0x4d8] sm:$0xf]  ;;  %v10232_v28 = vld [vmem:[#allocation6 + $0x39c] sm:$0xf] }
 0x36e   :  { %5135 = vmatpush.bf16.msrb.mxu1 %v8560_v41  ;;  %5144 = vmatpush.bf16.msrb.mxu2 %v8944_v9  ;;  %v8816_v50 = vor.u32 %v10276_v44, %v8815_v43  ;;  %v8276_v41 = vor.u32 %v10136_v53, %v8273_v13  ;;  %v8660_v9 = vor.u32 %v10232_v28, %v8657_v47  ;;  %v10392_v43 = vld [vmem:[%s12671_s11 + $0x98] sm:$0xf0]  ;;  %v9167_v53 = vld [vmem:[#allocation6 + $0x798] sm:$0xf] }
 0x36f   :  { %5100 = vmatmul.bf16.vlgmr.msra.gmra.mxu2 %v11774_v33  ;;  %v11813_v1 = vpop.f32.mrf.mxu2  ;;  %v8564_v13 = vor.u32 %v10208_v14, %v8561_v17  ;;  %v10200_v47 = vld [vmem:[#allocation6 + $0x29c] sm:$0xf]  ;;  %v10340_v14 = vld [vmem:[#allocation6 + $0x6f4] sm:$0xf0] }
 0x371   :  { %5171 = vmatpush.bf16.msra.mxu0 %v8404_v52  ;;  %5106 = vmatpush.bf16.msra.mxu3 %v9164_v34  ;;  %v10268_v52 = vld [vmem:[#allocation6 + $0x4b4] sm:$0xf0]  ;;  %v4882_v58 = vpop.f32.mrf.mxu1  ;;  %v8625_v34 = vld [vmem:[#allocation6 + $0x378] sm:$0xf0] }
 0x372   :  { %5136 = vmatpush.bf16.msrb.mxu1 %v8528_v3  ;;  %5145 = vmatpush.bf16.msrb.mxu2 %v8912_v5  ;;  %v8784_v6 = vor.u32 %v10268_v52, %v8783_v51  ;;  %v8751_v3 = vld [vmem:[#allocation6 + $0x458] sm:$0xf]  ;;  %v8244_v5 = vor.u32 %v10128_v26, %v8241_v60  ;;  %v8628_v7 = vor.u32 %v10224_v61, %v8625_v34  ;;  %v10389_v52 = vld [vmem:[%s12671_s11 + $0x80] sm:$0xf0]  ;;  %v10192_v34 = vld [vmem:[#allocation6 + $0x25c] sm:$0xf] }
 0x373   :  { %v4921_v38 = vpop.f32.mrf.mxu0  ;;  %v9267_v51 = vld [vmem:[%s12671_s11 + $0x78] sm:$0xf]  ;;  %v8532_v60 = vor.u32 %v10200_v47, %v8529_v49 }
 0x374   :  { %v9135_v58 = vld [vmem:[#allocation6 + $0x758] sm:$0xf]  ;;  %v9268_v0 = vor.u32 %v10389_v52, %v9267_v51  ;;  %v10264_v51 = vld [vmem:[#allocation6 + $0x49c] sm:$0xf] }
 0x375   :  { %5172 = vmatpush.bf16.msra.mxu0 %v8372_v10  ;;  %5107 = vmatpush.bf16.msra.mxu3 %v9132_v20  ;;  %v10260_v10 = vld [vmem:[#allocation6 + $0x474] sm:$0xf0]  ;;  %v10216_v20 = vld [vmem:[#allocation6 + $0x31c] sm:$0xf] }
 0x376   :  { %5137 = vmatpush.bf16.msrb.mxu1 %v8496_v23  ;;  %5146 = vmatpush.bf16.msrb.mxu2 %v8880_v24  ;;  %v8969_v23 = vld [vmem:[#allocation6 + $0x630] sm:$0xf0]  ;;  %v8752_v59 = vor.u32 %v10260_v10, %v8751_v3  ;;  %v8596_v36 = vor.u32 %v10216_v20, %v8593_v8  ;;  %v8881_v3 = vld [vmem:[#allocation6 + $0x578] sm:$0xf0]  ;;  %v9103_v10 = vld [vmem:[#allocation6 + $0x718] sm:$0xf] }
 0x377   :  { %v4843_v24 = vpop.f32.mrf.mxu2  ;;  %v8972_v19 = vor.u32 %v10311_v22, %v8969_v23  ;;  %v10184_v8 = vld [vmem:[#allocation6 + $0x21c] sm:$0xf]  ;;  %v10332_v47 = vld [vmem:[#allocation6 + $0x6b4] sm:$0xf0] }
 0x378   :  { %v10280_v22 = vld [vmem:[#allocation6 + $0x51c] sm:$0xf]  ;;  %v9243_v24 = vld [vmem:[%s12671_s11 + $0x48] sm:$0xf] }
 0x379   :  { %5173 = vmatpush.bf16.msra.mxu0 %v8340_v56  ;;  %5108 = vmatpush.bf16.msra.mxu3 %v9100_v57  ;;  %v10372_v56 = vld [vmem:[#allocation6 + $0x7f4] sm:$0xf0]  ;;  %v11822_v35 = vpop.f32.mrf.mxu1  ;;  %v8849_v23 = vld [vmem:[#allocation6 + $0x538] sm:$0xf0] }
 0x37a   :  { %5138 = vmatpush.bf16.msrb.mxu1 %v8464_v63  ;;  %5147 = vmatpush.bf16.msrb.mxu2 %v8848_v39  ;;  %v10252_v57 = vld [vmem:[#allocation6 + $0x434] sm:$0xf0]  ;;  %v10304_v63 = vld [vmem:[#allocation6 + $0x5dc] sm:$0xf]  ;;  %v8852_v17 = vor.u32 %v10280_v22, %v8849_v23 }
 0x37b   :  { %v8945_v39 = vld [vmem:[#allocation6 + $0x5f8] sm:$0xf0]  ;;  %v8720_v44 = vor.u32 %v10252_v57, %v8719_v46  ;;  %v9071_v57 = vld [vmem:[#allocation6 + $0x6d8] sm:$0xf] }
 0x37c   :  { %v8948_v28 = vor.u32 %v10304_v63, %v8945_v39  ;;  %v8785_v52 = vld [vmem:[#allocation6 + $0x4b8] sm:$0xf0]  ;;  %v8975_v22 = vld [vmem:[#allocation6 + $0x618] sm:$0xf] }
 0x37d   :  { %5174 = vmatpush.bf16.msra.mxu0 %v8308_v40  ;;  %5109 = vmatpush.bf16.msra.mxu3 %v9068_v12  ;;  %v9200_v40 = vor.u32 %v10372_v56, %v9199_v25  ;;  %v10364_v12 = vld [vmem:[#allocation6 + $0x7b4] sm:$0xf0]  ;;  %v9104_v25 = vor.u32 %v10348_v15, %v9103_v10  ;;  %v10383_v56 = vld [vmem:[%s12671_s11 + $0x50] sm:$0xf0]  ;;  %v8753_v10 = vld [vmem:[#allocation6 + $0x478] sm:$0xf0] }
 0x37e   :  { %5183 = vmatpush.bf16.msra.mxu1 %v8692_v42  ;;  %5148 = vmatpush.bf16.msrb.mxu2 %v8816_v50  ;;  %v9279_v42 = vld [vmem:[%s12671_s11 + $0x90] sm:$0xf]  ;;  %v10296_v50 = vld [vmem:[#allocation6 + $0x59c] sm:$0xf]  ;;  %v9244_v63 = vor.u32 %v10383_v56, %v9243_v24  ;;  %v9207_v15 = vld [vmem:[%s12671_s11] sm:$0xf] }
 0x37f   :  { %5139 = vmatmul.bf16.vlgmr.msrb.gmra.mxu1 %v11764_v45  ;;  %v9280_v48 = vor.u32 %v10392_v43, %v9279_v42  ;;  %v11837_v26 = vpop.f32.mrf.mxu2  ;;  %v8817_v42 = vld [vmem:[#allocation6 + $0x4f8] sm:$0xf0]  ;;  %v9231_v43 = vld [vmem:[%s12671_s11 + $0x30] sm:$0xf]  ;;  %v10316_v23 = vld [vmem:[#allocation6 + $0x634] sm:$0xf0] }
 0x380   :  { %v10248_v56 = vld [vmem:[#allocation6 + $0x41c] sm:$0xf] }
 0x381   :  { %5175 = vmatpush.bf16.msra.mxu0 %v8276_v41  ;;  %5110 = vmatpush.bf16.msra.mxu3 %v9036_v55  ;;  %v8913_v41 = vld [vmem:[#allocation6 + $0x5b8] sm:$0xf0]  ;;  %v10356_v55 = vld [vmem:[#allocation6 + $0x774] sm:$0xf0]  ;;  %v4934_v38 = vpop.f32.mrf.mxu1 }
 0x382   :  { %5184 = vmatpush.bf16.msra.mxu1 %v8660_v9  ;;  %5149 = vmatpush.bf16.msrb.mxu2 %v8784_v6  ;;  %v9168_v9 = vor.u32 %v10364_v12, %v9167_v53  ;;  %v8916_v61 = vor.u32 %v10296_v50, %v8913_v41  ;;  %v10288_v6 = vld [vmem:[#allocation6 + $0x55c] sm:$0xf]  ;;  %v9375_v12 = vld [vmem:[%s12671_s11 + $0x150] sm:$0xf]  ;;  %v10413_v38 = vld [vmem:[%s12671_s11 + $0x140] sm:$0xf0] }
 0x383   :  { %v8884_v20 = vor.u32 %v10288_v6, %v8881_v3  ;;  %v10380_v53 = vld [vmem:[%s12671_s11 + $0x38] sm:$0xf0]  ;;  %v8788_v3 = vor.u32 %v10264_v51, %v8785_v52 }
 0x384   :  { %v9232_v41 = vor.u32 %v10380_v53, %v9231_v43  ;;  %v10391_v53 = vld [vmem:[%s12671_s11 + $0x94] sm:$0xf] }
 0x385   :  { %5176 = vmatpush.bf16.msra.mxu0 %v8244_v5  ;;  %5111 = vmatpush.bf16.msra.mxu3 %v9004_v18  ;;  %v9255_v5 = vld [vmem:[%s12671_s11 + $0x60] sm:$0xf]  ;;  %v8500_v18 = vor.u32 %v10192_v34, %v8497_v2  ;;  %v9363_v34 = vld [vmem:[%s12671_s11 + $0x138] sm:$0xf] }
 0x386   :  { %5185 = vmatpush.bf16.msra.mxu1 %v8628_v7  ;;  %5150 = vmatpush.bf16.msrb.mxu2 %v8752_v59  ;;  %v10386_v7 = vld [vmem:[%s12671_s11 + $0x68] sm:$0xf0]  ;;  %v10324_v2 = vld [vmem:[#allocation6 + $0x674] sm:$0xf0] }
 0x387   :  { %v9256_v21 = vor.u32 %v10386_v7, %v9255_v5  ;;  %v4895_v46 = vpop.f32.mrf.mxu2  ;;  %v9364_v7 = vor.u32 %v10413_v38, %v9363_v34  ;;  %v9269_v34 = vld [vmem:[%s12671_s11 + $0x84] sm:$0xf0] }
 0x389   :  { %5177 = vmatpush.bf16.msra.mxu0 %v8212_v54  ;;  %5112 = vmatpush.bf16.msra.mxu3 %v8972_v19  ;;  %v11855_v59 = vpop.f32.mrf.mxu0  ;;  %v9387_v54 = vld [vmem:[%s12671_s11 + $0x168] sm:$0xf]  ;;  %v8468_v19 = vor.u32 %v10184_v8, %v8465_v31  ;;  %v10410_v8 = vld [vmem:[%s12671_s11 + $0x128] sm:$0xf0] }
 0x38a   :  { %5186 = vmatpush.bf16.msra.mxu1 %v8596_v36  ;;  %5151 = vmatpush.bf16.msrb.mxu2 %v8720_v44  ;;  %v10419_v36 = vld [vmem:[%s12671_s11 + $0x170] sm:$0xf0]  ;;  %v9072_v44 = vor.u32 %v10340_v14, %v9071_v57  ;;  %v10394_v31 = vld [vmem:[%s12671_s11 + $0xac] sm:$0xf]  ;;  %v8721_v14 = vld [vmem:[#allocation6 + $0x438] sm:$0xf0] }
 0x38b   :  { %v9388_v39 = vor.u32 %v10419_v36, %v9387_v54  ;;  %v10368_v54 = vld [vmem:[#allocation6 + $0x7dc] sm:$0xf] }
 0x38c   :  { %5178 = vmatmul.bf16.vlgmr.msra.gmra.mxu0 %v11755_v62  ;;  %5113 = vmatmul.bf16.vlgmr.msra.gmra.mxu3 %v11785_v32  ;;  %v9136_v62 = vor.u32 %v10356_v55, %v9135_v58  ;;  %v9219_v58 = vld [vmem:[%s12671_s11 + $0x18] sm:$0xf]  ;;  %v9201_v36 = vld [vmem:[#allocation6 + $0x7f8] sm:$0xf0] }
 0x38d   :  { %5882 = vmatpush.bf16.msrb.mxu0 %v9292_v11  ;;  %5157 = vmatpush.bf16.msrb.mxu3 %v9200_v40  ;;  %v3510_v11 = vperm.slane %v11850_v16, 0  ;;  %v10272_v40 = vld [vmem:[#allocation6 + $0x4dc] sm:$0xf] }
 0x38e   :  { %5187 = vmatpush.bf16.msra.mxu1 %v8564_v13  ;;  %5196 = vmatpush.bf16.msra.mxu2 %v8948_v28  ;;  %v10416_v13 = vld [vmem:[%s12671_s11 + $0x158] sm:$0xf0]  ;;  %v9039_v28 = vld [vmem:[#allocation6 + $0x698] sm:$0xf]  ;;  %v8820_v50 = vor.u32 %v10272_v40, %v8817_v42  ;;  %v9483_v40 = vld [vmem:[%s12671_s11 + $0x228] sm:$0xf] }
 0x38f   :  { %5152 = vmatmul.bf16.vlgmr.msrb.gmra.mxu2 %v11774_v33  ;;  %v4854_v49 = vpop.f32.mrf.mxu3  ;;  %v10443_v42 = vld [vmem:[%s12671_s11 + $0x230] sm:$0xf0] }
 0x391   :  { %5883 = vmatpush.bf16.msrb.mxu0 %v9280_v48  ;;  %5158 = vmatpush.bf16.msrb.mxu3 %v9168_v9  ;;  %v4816_v48 = vadd.f32 %v11799_v4, %v3510_v11  ;;  %v9376_v9 = vor.u32 %v10416_v13, %v9375_v12  ;;  %v10377_v4 = vld [vmem:[%s12671_s11 + $0x20] sm:$0xf0]  ;;  %v9339_v11 = vld [vmem:[%s12671_s11 + $0x108] sm:$0xf]  ;;  %v9281_v12 = vld [vmem:[%s12671_s11 + $0x9c] sm:$0xf0] }
 0x392   :  { %5188 = vmatpush.bf16.msra.mxu1 %v8532_v60  ;;  %5197 = vmatpush.bf16.msra.mxu2 %v8916_v61  ;;  %v4973_v60 = vpop.f32.mrf.mxu0  ;;  %v9040_v61 = vor.u32 %v10332_v47, %v9039_v28  ;;  %v11895_v6 = vpop.f32.mrf.mxu2  ;;  %v9220_v5 = vor.u32 %v10377_v4, %v9219_v58  ;;  %v3511_v13 = vperm.slane %v11850_v16, 1  ;;  %v8724_v47 = vor.u32 %v10248_v56, %v8721_v14  ;;  %v10404_v58 = vld [vmem:[%s12671_s11 + $0xf8] sm:$0xf0]  ;;  %v10418_v14 = vld [vmem:[%s12671_s11 + $0x16c] sm:$0xf] }
 0x393   :  { %v4829_v55 = vadd.f32 %v11802_v29, %v4816_v48  ;;  %v10360_v48 = vld [vmem:[#allocation6 + $0x79c] sm:$0xf]  ;;  %v9284_v52 = vor.u32 %v10391_v53, %v9281_v12 }
 0x394   :  { %v10440_v60 = vld [vmem:[%s12671_s11 + $0x218] sm:$0xf0]  ;;  %v4868_v38 = vadd.f32 %v11804_v30, %v3511_v13 }
 0x395   :  { %5884 = vmatpush.bf16.msrb.mxu0 %v9268_v0  ;;  %5159 = vmatpush.bf16.msrb.mxu3 %v9136_v62  ;;  %v9007_v0 = vld [vmem:[#allocation6 + $0x658] sm:$0xf]  ;;  %v4842_v29 = vadd.f32 %v11813_v1, %v4829_v55  ;;  %v10256_v62 = vld [vmem:[#allocation6 + $0x45c] sm:$0xf]  ;;  %v9471_v55 = vld [vmem:[%s12671_s11 + $0x210] sm:$0xf] }
 0x396   :  { %5189 = vmatpush.bf16.msra.mxu1 %v8500_v18  ;;  %5198 = vmatpush.bf16.msra.mxu2 %v8884_v20  ;;  %v9008_v1 = vor.u32 %v10324_v2, %v9007_v0  ;;  %v9351_v20 = vld [vmem:[%s12671_s11 + $0x120] sm:$0xf]  ;;  %v10388_v4 = vld [vmem:[%s12671_s11 + $0x7c] sm:$0xf] }
 0x397   :  { %v4855_v18 = vadd.f32 %v4854_v49, %v4842_v29  ;;  %v4856_v24 = vpop.f32.mrf.mxu3  ;;  %v9352_v57 = vor.u32 %v10410_v8, %v9351_v20  ;;  %v9169_v49 = vld [vmem:[#allocation6 + $0x7b8] sm:$0xf0]  ;;  %v9272_v30 = vor.u32 %v10388_v4, %v9269_v34  ;;  %v9257_v20 = vld [vmem:[%s12671_s11 + $0x6c] sm:$0xf0] }
 0x398   :  { %v10352_v2 = vld [vmem:[#allocation6 + $0x75c] sm:$0xf]  ;;  %v10398_v24 = vld [vmem:[%s12671_s11 + $0xc8] sm:$0xf0]  ;;  %v9423_v34 = vld [vmem:[%s12671_s11 + $0x1b0] sm:$0xf] }
 0x399   :  { %5885 = vmatpush.bf16.msrb.mxu0 %v9256_v21  ;;  %5160 = vmatpush.bf16.msrb.mxu3 %v9104_v25  ;;  %v9293_v21 = vld [vmem:[%s12671_s11 + $0xb4] sm:$0xf0]  ;;  %v8756_v25 = vor.u32 %v10256_v62, %v8753_v10  ;;  %v9137_v29 = vld [vmem:[#allocation6 + $0x778] sm:$0xf0]  ;;  %v9472_v62 = vor.u32 %v10440_v60, %v9471_v55  ;;  %v10401_v10 = vld [vmem:[%s12671_s11 + $0xe0] sm:$0xf0] }
 0x39a   :  { %5190 = vmatpush.bf16.msra.mxu1 %v8468_v19  ;;  %5199 = vmatpush.bf16.msra.mxu2 %v8852_v17  ;;  %v10407_v19 = vld [vmem:[%s12671_s11 + $0x110] sm:$0xf0]  ;;  %v5222_v17 = vmax.f32 %v4855_v18, 0.0  ;;  %v4947_v28 = vpop.f32.mrf.mxu2 }
 0x39b   :  { %v10431_v28 = vld [vmem:[%s12671_s11 + $0x1d0] sm:$0xf0] }
 0x39c   :  { %v11927_v43 = vpop.f32.mrf.mxu1  ;;  %v11939_v51 = vpack.c.bf16 %v5222_v17, %v5222_v17  ;;  %v10336_v17 = vld [vmem:[#allocation6 + $0x6dc] sm:$0xf] }
 0x39d   :  { %5886 = vmatpush.bf16.msrb.mxu0 %v9244_v63  ;;  %5161 = vmatpush.bf16.msrb.mxu3 %v9072_v44  ;;  %v9296_v63 = vor.u32 %v10394_v31, %v9293_v21  ;;  %v9204_v44 = vor.u32 %v10368_v54, %v9201_v36  ;;  %v10344_v31 = vld [vmem:[#allocation6 + $0x71c] sm:$0xf]  ;;  %v10434_v54 = vld [vmem:[%s12671_s11 + $0x1e8] sm:$0xf0] }
 0x39e   :  { %5895 = vmatpush.bf16.msrb.mxu1 %v9388_v39  ;;  %5200 = vmatpush.bf16.msra.mxu2 %v8820_v50  ;;  %v8976_v39 = vor.u32 %v10316_v23, %v8975_v22  ;;  %v9340_v50 = vor.u32 %v10407_v19, %v9339_v11  ;;  %v9105_v21 = vld [vmem:[#allocation6 + $0x738] sm:$0xf0]  ;;  %v10382_v36 = vld [vmem:[%s12671_s11 + $0x4c] sm:$0xf]  ;;  %v9389_v11 = vld [vmem:[%s12671_s11 + $0x174] sm:$0xf0] }
 0x39f   :  { %5191 = vmatmul.bf16.vlgmr.msra.gmra.mxu1 %v11764_v45  ;;  %v10374_v45 = vld [vmem:[%s12671_s11 + $0x8] sm:$0xf0]  ;;  %v4906_v0 = vpop.f32.mrf.mxu3  ;;  %v9392_v13 = vor.u32 %v10418_v14, %v9389_v11  ;;  %v9399_v11 = vld [vmem:[%s12671_s11 + $0x180] sm:$0xf] }
 0x3a0   :  { %v9208_v46 = vor.u32 %v10374_v45, %v9207_v15  ;;  %v9459_v15 = vld [vmem:[%s12671_s11 + $0x1f8] sm:$0xf]  ;;  %v10437_v45 = vld [vmem:[%s12671_s11 + $0x200] sm:$0xf0] }
 0x3a1   :  { %5887 = vmatpush.bf16.msrb.mxu0 %v9232_v41  ;;  %5162 = vmatpush.bf16.msrb.mxu3 %v9040_v61  ;;  %v9484_v41 = vor.u32 %v10443_v42, %v9483_v40  ;;  %v9172_v61 = vor.u32 %v10360_v48, %v9169_v49  ;;  %v9460_v23 = vor.u32 %v10437_v45, %v9459_v15  ;;  %v9233_v49 = vld [vmem:[%s12671_s11 + $0x3c] sm:$0xf0] }
 0x3a2   :  { %5896 = vmatpush.bf16.msrb.mxu1 %v9376_v9  ;;  %5201 = vmatpush.bf16.msra.mxu2 %v8788_v3  ;;  %v9327_v9 = vld [vmem:[%s12671_s11 + $0xf0] sm:$0xf] }
 0x3a3   :  { %v9328_v3 = vor.u32 %v10404_v58, %v9327_v9  ;;  %v3512_v9 = vperm.slane %v11850_v16, 2  ;;  %v9041_v58 = vld [vmem:[#allocation6 + $0x6b8] sm:$0xf0] }
 0x3a4   :  { %v4986_v18 = vpop.f32.mrf.mxu1 }
 0x3a5   :  { %5888 = vmatpush.bf16.msrb.mxu0 %v9220_v5  ;;  %5163 = vmatpush.bf16.msrb.mxu3 %v9008_v1  ;;  %v9315_v5 = vld [vmem:[%s12671_s11 + $0xd8] sm:$0xf]  ;;  %v10385_v1 = vld [vmem:[%s12671_s11 + $0x64] sm:$0xf] }
 0x3a6   :  { %5897 = vmatpush.bf16.msrb.mxu1 %v9364_v7  ;;  %5202 = vmatpush.bf16.msra.mxu2 %v8756_v25  ;;  %v4881_v7 = vadd.f32 %v11809_v27, %v4868_v38  ;;  %v9140_v27 = vor.u32 %v10352_v2, %v9137_v29  ;;  %v9316_v22 = vor.u32 %v10401_v10, %v9315_v5  ;;  %v10428_v38 = vld [vmem:[%s12671_s11 + $0x1b8] sm:$0xf0]  ;;  %v9221_v29 = vld [vmem:[%s12671_s11 + $0x24] sm:$0xf0]  ;;  %v9411_v18 = vld [vmem:[%s12671_s11 + $0x198] sm:$0xf] }
 0x3a7   :  { %v9260_v56 = vor.u32 %v10385_v1, %v9257_v20  ;;  %v4908_v19 = vpop.f32.mrf.mxu3  ;;  %v4920_v5 = vadd.f32 %v11811_v37, %v3512_v9  ;;  %v9424_v45 = vor.u32 %v10428_v38, %v9423_v34  ;;  %v9329_v34 = vld [vmem:[%s12671_s11 + $0xfc] sm:$0xf0]  ;;  %v10439_v38 = vld [vmem:[%s12671_s11 + $0x214] sm:$0xf] }
 0x3a8   :  { %v4894_v8 = vadd.f32 %v11837_v26, %v4881_v7  ;;  %v9447_v26 = vld [vmem:[%s12671_s11 + $0x1e0] sm:$0xf]  ;;  %v10320_v7 = vld [vmem:[#allocation6 + $0x65c] sm:$0xf]  ;;  %v10422_v19 = vld [vmem:[%s12671_s11 + $0x188] sm:$0xf0] }
 0x3a9   :  { %5889 = vmatpush.bf16.msrb.mxu0 %v9208_v46  ;;  %5164 = vmatpush.bf16.msrb.mxu3 %v8976_v39  ;;  %v9108_v46 = vor.u32 %v10344_v31, %v9105_v21  ;;  %v12004_v39 = vpop.f32.mrf.mxu0  ;;  %v9448_v42 = vor.u32 %v10434_v54, %v9447_v26  ;;  %v10373_v31 = vld [vmem:[%s12671_s11 + $0x4] sm:$0xf]  ;;  %v9209_v21 = vld [vmem:[%s12671_s11 + $0xc] sm:$0xf0]  ;;  %v8977_v26 = vld [vmem:[#allocation6 + $0x638] sm:$0xf0] }
 0x3aa   :  { %5898 = vmatpush.bf16.msrb.mxu1 %v9352_v57  ;;  %5203 = vmatpush.bf16.msra.mxu2 %v8724_v47  ;;  %v4907_v25 = vadd.f32 %v4906_v0, %v4894_v8  ;;  %v9245_v57 = vld [vmem:[%s12671_s11 + $0x54] sm:$0xf0]  ;;  %v10379_v47 = vld [vmem:[%s12671_s11 + $0x34] sm:$0xf]  ;;  %v10376_v0 = vld [vmem:[%s12671_s11 + $0x1c] sm:$0xf] }
 0x3ab   :  { %v9248_v12 = vor.u32 %v10382_v36, %v9245_v57  ;;  %v9224_v20 = vor.u32 %v10376_v0, %v9221_v29  ;;  %v10425_v8 = vld [vmem:[%s12671_s11 + $0x1a0] sm:$0xf0]  ;;  %v9579_v36 = vld [vmem:[%s12671_s11 + $0x2e8] sm:$0xf]  ;;  %v9473_v0 = vld [vmem:[%s12671_s11 + $0x21c] sm:$0xf0] }
 0x3ac   :  { %5890 = vmatmul.bf16.vlgmr.msrb.gmra.mxu0 %v11939_v51  ;;  %5165 = vmatmul.bf16.vlgmr.msrb.gmra.mxu3 %v11785_v32  ;;  %v5223_v53 = vmax.f32 %v4907_v25, 0.0  ;;  %v10396_v25 = vld [vmem:[%s12671_s11 + $0xb8] sm:$0xf0]  ;;  %v9412_v54 = vor.u32 %v10425_v8, %v9411_v18  ;;  %v9275_v29 = vld [vmem:[%s12671_s11 + $0x80] sm:$0xf] }
 0x3ad   :  { %5934 = vmatpush.bf16.msra.mxu0 %v9296_v63  ;;  %5209 = vmatpush.bf16.msra.mxu3 %v9204_v44  ;;  %v9073_v63 = vld [vmem:[#allocation6 + $0x6f8] sm:$0xf0]  ;;  %v9435_v44 = vld [vmem:[%s12671_s11 + $0x1c8] sm:$0xf] }
 0x3ae   :  { %5899 = vmatpush.bf16.msrb.mxu1 %v9340_v50  ;;  %5908 = vmatpush.bf16.msrb.mxu2 %v9484_v41  ;;  %v9076_v48 = vor.u32 %v10336_v17, %v9073_v63  ;;  %v10415_v50 = vld [vmem:[%s12671_s11 + $0x154] sm:$0xf]  ;;  %v9377_v41 = vld [vmem:[%s12671_s11 + $0x15c] sm:$0xf0]  ;;  %v9436_v55 = vor.u32 %v10431_v28, %v9435_v44  ;;  %v12025_v60 = vpack.c.bf16 %v5223_v53, %v5223_v53  ;;  %v10406_v17 = vld [vmem:[%s12671_s11 + $0x10c] sm:$0xf] }
 0x3af   :  { %5204 = vmatmul.bf16.vlgmr.msra.gmra.mxu2 %v11774_v33  ;;  %v9303_v33 = vld [vmem:[%s12671_s11 + $0xc0] sm:$0xf]  ;;  %v9380_v4 = vor.u32 %v10415_v50, %v9377_v41  ;;  %v4958_v15 = vpop.f32.mrf.mxu3  ;;  %v10442_v44 = vld [vmem:[%s12671_s11 + $0x22c] sm:$0xf]  ;;  %v9485_v53 = vld [vmem:[%s12671_s11 + $0x234] sm:$0xf0] }
 0x3b0   :  { %v9304_v40 = vor.u32 %v10398_v24, %v9303_v33  ;;  %v9299_v33 = vld [vmem:[%s12671_s11 + $0xb0] sm:$0xf]  ;;  %v9287_v28 = vld [vmem:[%s12671_s11 + $0x98] sm:$0xf]  ;;  %v10464_v41 = vld [vmem:[%s12671_s11 + $0x2d8] sm:$0xf0] }
 0x3b1   :  { %5935 = vmatpush.bf16.msra.mxu0 %v9284_v52  ;;  %5210 = vmatpush.bf16.msra.mxu3 %v9172_v61  ;;  %v10328_v52 = vld [vmem:[#allocation6 + $0x69c] sm:$0xf]  ;;  %v9236_v61 = vor.u32 %v10379_v47, %v9233_v49  ;;  %v5025_v10 = vpop.f32.mrf.mxu0  ;;  %v9300_v63 = vor.u32 %v10396_v25, %v9299_v33  ;;  %v10393_v47 = vld [vmem:[%s12671_s11 + $0xa0] sm:$0xf0]  ;;  %v9400_v49 = vor.u32 %v10422_v19, %v9399_v11  ;;  %v9567_v50 = vld [vmem:[%s12671_s11 + $0x2d0] sm:$0xf] }
 0x3b2   :  { %5900 = vmatpush.bf16.msrb.mxu1 %v9328_v3  ;;  %5909 = vmatpush.bf16.msrb.mxu2 %v9472_v62  ;;  %v9044_v2 = vor.u32 %v10328_v52, %v9041_v58  ;;  %v10412_v3 = vld [vmem:[%s12671_s11 + $0x13c] sm:$0xf]  ;;  %v9365_v62 = vld [vmem:[%s12671_s11 + $0x144] sm:$0xf0]  ;;  %v12051_v1 = vpop.f32.mrf.mxu2  ;;  %v9476_v10 = vor.u32 %v10439_v38, %v9473_v0  ;;  %v10397_v33 = vld [vmem:[%s12671_s11 + $0xc4] sm:$0xf] }
 0x3b3   :  { %v9368_v37 = vor.u32 %v10412_v3, %v9365_v62  ;;  %v10390_v3 = vld [vmem:[%s12671_s11 + $0x88] sm:$0xf0]  ;;  %v9555_v62 = vld [vmem:[%s12671_s11 + $0x2b8] sm:$0xf]  ;;  %v9317_v18 = vld [vmem:[%s12671_s11 + $0xe4] sm:$0xf0] }
 0x3b4   :  { %v9531_v11 = vld [vmem:[%s12671_s11 + $0x288] sm:$0xf]  ;;  %v10455_v19 = vld [vmem:[%s12671_s11 + $0x290] sm:$0xf0] }
 0x3b5   :  { %5936 = vmatpush.bf16.msra.mxu0 %v9272_v30  ;;  %5211 = vmatpush.bf16.msra.mxu3 %v9140_v27  ;;  %v9009_v30 = vld [vmem:[#allocation6 + $0x678] sm:$0xf0]  ;;  %v4933_v27 = vadd.f32 %v11822_v35, %v4920_v5  ;;  %v10461_v5 = vld [vmem:[%s12671_s11 + $0x2c0] sm:$0xf0] }
 0x3b6   :  { %5901 = vmatpush.bf16.msrb.mxu1 %v9316_v22  ;;  %5910 = vmatpush.bf16.msrb.mxu2 %v9460_v23  ;;  %v9012_v35 = vor.u32 %v10320_v7, %v9009_v30  ;;  %v10409_v22 = vld [vmem:[%s12671_s11 + $0x124] sm:$0xf]  ;;  %v9353_v23 = vld [vmem:[%s12671_s11 + $0x12c] sm:$0xf0]  ;;  %v9556_v8 = vor.u32 %v10461_v5, %v9555_v62 }
 0x3b7   :  { %v4946_v24 = vadd.f32 %v11895_v6, %v4933_v27  ;;  %v9212_v6 = vor.u32 %v10373_v31, %v9209_v21  ;;  %v9356_v14 = vor.u32 %v10409_v22, %v9353_v23  ;;  %v10436_v27 = vld [vmem:[%s12671_s11 + $0x1fc] sm:$0xf]  ;;  %v10387_v31 = vld [vmem:[%s12671_s11 + $0x70] sm:$0xf0]  ;;  %v9543_v21 = vld [vmem:[%s12671_s11 + $0x2a0] sm:$0xf] }
 0x3b8   :  { %v10449_v5 = vld [vmem:[%s12671_s11 + $0x260] sm:$0xf0] }
 0x3b9   :  { %5937 = vmatpush.bf16.msra.mxu0 %v9260_v56  ;;  %5212 = vmatpush.bf16.msra.mxu3 %v9108_v46  ;;  %v10312_v56 = vld [vmem:[#allocation6 + $0x61c] sm:$0xf]  ;;  %v10467_v46 = vld [vmem:[%s12671_s11 + $0x2f0] sm:$0xf0]  ;;  %v4959_v57 = vadd.f32 %v4958_v15, %v4946_v24  ;;  %v9305_v24 = vld [vmem:[%s12671_s11 + $0xcc] sm:$0xf0] }
 0x3ba   :  { %5902 = vmatpush.bf16.msrb.mxu1 %v9304_v40  ;;  %5911 = vmatpush.bf16.msrb.mxu2 %v9448_v42  ;;  %v8980_v40 = vor.u32 %v10312_v56, %v8977_v26  ;;  %v9341_v42 = vld [vmem:[%s12671_s11 + $0x114] sm:$0xf0]  ;;  %v4999_v52 = vpop.f32.mrf.mxu2  ;;  %v10400_v15 = vld [vmem:[%s12671_s11 + $0xdc] sm:$0xf]  ;;  %v10433_v56 = vld [vmem:[%s12671_s11 + $0x1e4] sm:$0xf] }
 0x3bb   :  { %v5224_v9 = vmax.f32 %v4959_v57, 0.0  ;;  %v9344_v58 = vor.u32 %v10406_v17, %v9341_v42  ;;  %v9320_v22 = vor.u32 %v10400_v15, %v9317_v18  ;;  %v9449_v26 = vld [vmem:[%s12671_s11 + $0x1ec] sm:$0xf0]  ;;  %v3513_v17 = vperm.slane %v11850_v16, 3 }
 0x3bc   :  { %v9395_v57 = vld [vmem:[%s12671_s11 + $0x170] sm:$0xf] }
 0x3bd   :  { %5938 = vmatpush.bf16.msra.mxu0 %v9248_v12  ;;  %5213 = vmatpush.bf16.msra.mxu3 %v9076_v48  ;;  %v12099_v12 = vpop.f32.mrf.mxu1  ;;  %v4960_v48 = vpop.f32.mrf.mxu3  ;;  %v12138_v7 = vpack.c.bf16 %v5224_v9, %v5224_v9  ;;  %v10452_v9 = vld [vmem:[%s12671_s11 + $0x278] sm:$0xf0]  ;;  %v4972_v38 = vadd.f32 %v11855_v59, %v3513_v17  ;;  %v9507_v59 = vld [vmem:[%s12671_s11 + $0x258] sm:$0xf] }
 0x3be   :  { %5947 = vmatpush.bf16.msra.mxu1 %v9392_v13  ;;  %5912 = vmatpush.bf16.msrb.mxu2 %v9436_v55  ;;  %v9580_v13 = vor.u32 %v10467_v46, %v9579_v36  ;;  %v9488_v55 = vor.u32 %v10442_v44, %v9485_v53  ;;  %v10384_v46 = vld [vmem:[%s12671_s11 + $0x58] sm:$0xf0]  ;;  %v10430_v53 = vld [vmem:[%s12671_s11 + $0x1cc] sm:$0xf]  ;;  %v10381_v48 = vld [vmem:[%s12671_s11 + $0x40] sm:$0xf0] }
 0x3bf   :  { %5903 = vmatmul.bf16.vlgmr.msrb.gmra.mxu1 %v12025_v60  ;;  %v10444_v17 = vld [vmem:[%s12671_s11 + $0x238] sm:$0xf0] }
 0x3c1   :  { %5939 = vmatpush.bf16.msra.mxu0 %v9236_v61  ;;  %5214 = vmatpush.bf16.msra.mxu3 %v9044_v2  ;;  %v10403_v61 = vld [vmem:[%s12671_s11 + $0xf4] sm:$0xf]  ;;  %v9568_v2 = vor.u32 %v10464_v41, %v9567_v50  ;;  %v10417_v50 = vld [vmem:[%s12671_s11 + $0x160] sm:$0xf0]  ;;  %v9519_v41 = vld [vmem:[%s12671_s11 + $0x270] sm:$0xf] }
 0x3c2   :  { %5948 = vmatpush.bf16.msra.mxu1 %v9380_v4  ;;  %5913 = vmatpush.bf16.msrb.mxu2 %v9424_v45  ;;  %v9288_v4 = vor.u32 %v10393_v47, %v9287_v28  ;;  %v9332_v30 = vor.u32 %v10403_v61, %v9329_v34  ;;  %v9276_v45 = vor.u32 %v10390_v3, %v9275_v29  ;;  %v9239_v28 = vld [vmem:[%s12671_s11 + $0x38] sm:$0xf]  ;;  %v10427_v61 = vld [vmem:[%s12671_s11 + $0x1b4] sm:$0xf]  ;;  %v9227_v34 = vld [vmem:[%s12671_s11 + $0x20] sm:$0xf] }
 0x3c3   :  { %v9532_v47 = vor.u32 %v10455_v19, %v9531_v11  ;;  %v9520_v0 = vor.u32 %v10452_v9, %v9519_v41  ;;  %v9371_v29 = vld [vmem:[%s12671_s11 + $0x140] sm:$0xf]  ;;  %v10414_v3 = vld [vmem:[%s12671_s11 + $0x148] sm:$0xf0]  ;;  %v10408_v11 = vld [vmem:[%s12671_s11 + $0x118] sm:$0xf0] }
 0x3c4   :  { %v9491_v19 = vld [vmem:[%s12671_s11 + $0x230] sm:$0xf]  ;;  %v9335_v41 = vld [vmem:[%s12671_s11 + $0xf8] sm:$0xf]  ;;  %v10405_v9 = vld [vmem:[%s12671_s11 + $0x100] sm:$0xf0] }
 0x3c5   :  { %5940 = vmatpush.bf16.msra.mxu0 %v9224_v20  ;;  %5215 = vmatpush.bf16.msra.mxu3 %v9012_v35  ;;  %v9461_v20 = vld [vmem:[%s12671_s11 + $0x204] sm:$0xf0]  ;;  %v10458_v35 = vld [vmem:[%s12671_s11 + $0x2a8] sm:$0xf0] }
 0x3c6   :  { %5949 = vmatpush.bf16.msra.mxu1 %v9368_v37  ;;  %5914 = vmatpush.bf16.msrb.mxu2 %v9412_v54  ;;  %v5038_v37 = vpop.f32.mrf.mxu1  ;;  %v9464_v23 = vor.u32 %v10436_v27, %v9461_v20  ;;  %v9251_v54 = vld [vmem:[%s12671_s11 + $0x50] sm:$0xf]  ;;  %v9544_v36 = vor.u32 %v10458_v35, %v9543_v21  ;;  %v9372_v27 = vor.u32 %v10414_v3, %v9371_v29  ;;  %v10424_v20 = vld [vmem:[%s12671_s11 + $0x19c] sm:$0xf]  ;;  %v9359_v21 = vld [vmem:[%s12671_s11 + $0x128] sm:$0xf] }
 0x3c7   :  { %v9252_v42 = vor.u32 %v10384_v46, %v9251_v54  ;;  %v9413_v37 = vld [vmem:[%s12671_s11 + $0x1a4] sm:$0xf0]  ;;  %v10411_v35 = vld [vmem:[%s12671_s11 + $0x130] sm:$0xf0]  ;;  %v9401_v46 = vld [vmem:[%s12671_s11 + $0x18c] sm:$0xf0] }
 0x3c8   :  { %v9360_v54 = vor.u32 %v10411_v35, %v9359_v21  ;;  %v10402_v29 = vld [vmem:[%s12671_s11 + $0xe8] sm:$0xf0]  ;;  %v9467_v3 = vld [vmem:[%s12671_s11 + $0x200] sm:$0xf]  ;;  %v9533_v21 = vld [vmem:[%s12671_s11 + $0x294] sm:$0xf0] }
 0x3c9   :  { %5941 = vmatpush.bf16.msra.mxu0 %v9212_v6  ;;  %5216 = vmatpush.bf16.msra.mxu3 %v8980_v40  ;;  %v10420_v6 = vld [vmem:[%s12671_s11 + $0x178] sm:$0xf0]  ;;  %v9452_v40 = vor.u32 %v10433_v56, %v9449_v26  ;;  %v9581_v56 = vld [vmem:[%s12671_s11 + $0x2f4] sm:$0xf0]  ;;  %v3514_v35 = vperm.slane %v11850_v16, 4 }
 0x3ca   :  { %5950 = vmatpush.bf16.msra.mxu1 %v9356_v14  ;;  %5915 = vmatpush.bf16.msrb.mxu2 %v9400_v49  ;;  %v12190_v14 = vpop.f32.mrf.mxu0  ;;  %v9396_v44 = vor.u32 %v10420_v6, %v9395_v57  ;;  %v9383_v49 = vld [vmem:[%s12671_s11 + $0x158] sm:$0xf]  ;;  %v9347_v57 = vld [vmem:[%s12671_s11 + $0x110] sm:$0xf] }
 0x3cb   :  { %v10484_v16 = vld [vmem:[%s12673_s13 + $0x78] sm:$0xff] }
 0x3cc   :  { %5942 = vmatmul.bf16.vlgmr.msra.gmra.mxu0 %v11939_v51  ;;  %5217 = vmatmul.bf16.vlgmr.msra.gmra.mxu3 %v11785_v32  ;;  %v9263_v32 = vld [vmem:[%s12671_s11 + $0x68] sm:$0xf] }
 0x3cd   :  { %5986 = vmatpush.bf16.msrb.mxu0 %v9300_v63  ;;  %5921 = vmatpush.bf16.msrb.mxu3 %v9580_v13  ;;  %v9264_v25 = vor.u32 %v10387_v31, %v9263_v32  ;;  %v9308_v63 = vor.u32 %v10397_v33, %v9305_v24  ;;  %v9437_v13 = vld [vmem:[%s12671_s11 + $0x1d4] sm:$0xf0]  ;;  %v9508_v32 = vor.u32 %v10449_v5, %v9507_v59  ;;  %v10375_v31 = vld [vmem:[%s12671_s11 + $0x10] sm:$0xf0] }
 0x3ce   :  { %5951 = vmatpush.bf16.msra.mxu1 %v9344_v58  ;;  %5960 = vmatpush.bf16.msra.mxu2 %v9488_v55  ;;  %v9440_v52 = vor.u32 %v10430_v53, %v9437_v13  ;;  %v9240_v58 = vor.u32 %v10381_v48, %v9239_v28  ;;  %v9384_v55 = vor.u32 %v10417_v50, %v9383_v49  ;;  %v10476_v24 = vld [vmem:[%s12673_s13 + $0x38] sm:$0xff]  ;;  %v10463_v13 = vld [vmem:[%s12671_s11 + $0x2d4] sm:$0xf]  ;;  %v9569_v28 = vld [vmem:[%s12671_s11 + $0x2dc] sm:$0xf0] }
 0x3cf   :  { %5916 = vmatmul.bf16.vlgmr.msrb.gmra.mxu2 %v12138_v7  ;;  %v9416_v33 = vor.u32 %v10424_v20, %v9413_v37  ;;  %v9348_v48 = vor.u32 %v10408_v11, %v9347_v57  ;;  %v9492_v49 = vor.u32 %v10444_v17, %v9491_v19  ;;  %v10475_v50 = vld [vmem:[%s12673_s13 + $0x30] sm:$0xff]  ;;  %v9311_v20 = vld [vmem:[%s12671_s11 + $0xc8] sm:$0xf]  ;;  %v10429_v11 = vld [vmem:[%s12671_s11 + $0x1c0] sm:$0xf0] }
 0x3d0   :  { %v10399_v37 = vld [vmem:[%s12671_s11 + $0xd0] sm:$0xf0] }
 0x3d1   :  { %5987 = vmatpush.bf16.msrb.mxu0 %v9288_v4  ;;  %5922 = vmatpush.bf16.msrb.mxu3 %v9568_v2  ;;  %v9425_v4 = vld [vmem:[%s12671_s11 + $0x1bc] sm:$0xf0]  ;;  %v10378_v2 = vld [vmem:[%s12671_s11 + $0x28] sm:$0xf0]  ;;  %v10471_v57 = vld [vmem:[%s12673_s13 + $0x10] sm:$0xff] }
 0x3d2   :  { %5952 = vmatpush.bf16.msra.mxu1 %v9332_v30  ;;  %5961 = vmatpush.bf16.msra.mxu2 %v9476_v10  ;;  %v5077_v62 = vpop.f32.mrf.mxu0  ;;  %v4985_v30 = vadd.f32 %v11927_v43, %v4972_v38  ;;  %v5010_v10 = vpop.f32.mrf.mxu3  ;;  %v9428_v15 = vor.u32 %v10427_v61, %v9425_v4  ;;  %v9228_v18 = vor.u32 %v10378_v2, %v9227_v34  ;;  %v9215_v43 = vld [vmem:[%s12671_s11 + $0x8] sm:$0xf]  ;;  %v10460_v4 = vld [vmem:[%s12671_s11 + $0x2bc] sm:$0xf] }
 0x3d3   :  { %v9216_v26 = vor.u32 %v10375_v31, %v9215_v43  ;;  %v9557_v34 = vld [vmem:[%s12671_s11 + $0x2c4] sm:$0xf0]  ;;  %v9336_v38 = vor.u32 %v10405_v9, %v9335_v41  ;;  %v10438_v62 = vld [vmem:[%s12671_s11 + $0x208] sm:$0xf0]  ;;  %v10445_v41 = vld [vmem:[%s12671_s11 + $0x244] sm:$0xf] }
 0x3d4   :  { %v10474_v2 = vld [vmem:[%s12673_s13 + $0x28] sm:$0xff]  ;;  %v9560_v59 = vor.u32 %v10460_v4, %v9557_v34  ;;  %v9497_v9 = vld [vmem:[%s12671_s11 + $0x24c] sm:$0xf0]  ;;  %v10468_v4 = vld [vmem:[%s12671_s11 + $0x2f8] sm:$0xf0] }
 0x3d5   :  { %5988 = vmatpush.bf16.msrb.mxu0 %v9276_v45  ;;  %5923 = vmatpush.bf16.msrb.mxu3 %v9556_v8  ;;  %v12250_v45 = vpop.f32.mrf.mxu2  ;;  %v4998_v8 = vadd.f32 %v12051_v1, %v4985_v30  ;;  %v10446_v1 = vld [vmem:[%s12671_s11 + $0x248] sm:$0xf0]  ;;  %v10457_v30 = vld [vmem:[%s12671_s11 + $0x2a4] sm:$0xf]  ;;  %v9455_v43 = vld [vmem:[%s12671_s11 + $0x1e8] sm:$0xf] }
 0x3d6   :  { %5953 = vmatpush.bf16.msra.mxu1 %v9320_v22  ;;  %5962 = vmatpush.bf16.msra.mxu2 %v9464_v23  ;;  %v9495_v22 = vld [vmem:[%s12671_s11 + $0x240] sm:$0xf]  ;;  %v10454_v31 = vld [vmem:[%s12671_s11 + $0x28c] sm:$0xf]  ;;  %v9407_v34 = vld [vmem:[%s12671_s11 + $0x188] sm:$0xf] }
 0x3d7   :  { %v5011_v23 = vadd.f32 %v5010_v10, %v4998_v8  ;;  %v9496_v6 = vor.u32 %v10446_v1, %v9495_v22  ;;  %v9545_v10 = vld [vmem:[%s12671_s11 + $0x2ac] sm:$0xf0]  ;;  %v10435_v8 = vld [vmem:[%s12671_s11 + $0x1f0] sm:$0xf0]  ;;  %v9312_v1 = vor.u32 %v10399_v37, %v9311_v20  ;;  %v9563_v37 = vld [vmem:[%s12671_s11 + $0x2c0] sm:$0xf] }
 0x3d9   :  { %5989 = vmatpush.bf16.msrb.mxu0 %v9264_v25  ;;  %5924 = vmatpush.bf16.msrb.mxu3 %v9544_v36  ;;  %v10466_v25 = vld [vmem:[%s12671_s11 + $0x2ec] sm:$0xf]  ;;  %v10421_v36 = vld [vmem:[%s12671_s11 + $0x184] sm:$0xf] }
 0x3da   :  { %5954 = vmatpush.bf16.msra.mxu1 %v9308_v63  ;;  %5963 = vmatpush.bf16.msra.mxu2 %v9452_v40  ;;  %v9584_v63 = vor.u32 %v10466_v25, %v9581_v56  ;;  %v5225_v40 = vmax.f32 %v5011_v23, 0.0  ;;  %v9404_v53 = vor.u32 %v10421_v36, %v9401_v46  ;;  %v9456_v23 = vor.u32 %v10435_v8, %v9455_v43  ;;  %v10432_v25 = vld [vmem:[%s12671_s11 + $0x1d8] sm:$0xf0]  ;;  %v10462_v43 = vld [vmem:[%s12671_s11 + $0x2c8] sm:$0xf0]  ;;  %v10479_v8 = vld [vmem:[%s12673_s13 + $0x50] sm:$0xff] }
 0x3db   :  { %v9536_v56 = vor.u32 %v10454_v31, %v9533_v21  ;;  %v5024_v36 = vadd.f32 %v12004_v39, %v3514_v35  ;;  %v10483_v39 = vld [vmem:[%s12673_s13 + $0x70] sm:$0xff]  ;;  %v9564_v31 = vor.u32 %v10462_v43, %v9563_v37  ;;  %v9551_v35 = vld [vmem:[%s12671_s11 + $0x2a8] sm:$0xf] }
 0x3dc   :  { %v12327_v61 = vpack.c.bf16 %v5225_v40, %v5225_v40  ;;  %v9509_v40 = vld [vmem:[%s12671_s11 + $0x264] sm:$0xf0] }
 0x3dd   :  { %5990 = vmatpush.bf16.msrb.mxu0 %v9252_v42  ;;  %5925 = vmatpush.bf16.msrb.mxu3 %v9532_v47  ;;  %v5012_v42 = vpop.f32.mrf.mxu3  ;;  %v5051_v47 = vpop.f32.mrf.mxu2  ;;  %v5037_v19 = vadd.f32 %v12099_v12, %v5024_v36  ;;  %v10470_v12 = vld [vmem:[%s12673_s13 + $0x8] sm:$0xff]  ;;  %v10489_v36 = vld [vmem:[%s12673_s13 + $0xa0] sm:$0xff] }
 0x3de   :  { %5999 = vmatpush.bf16.msrb.mxu1 %v9396_v44  ;;  %5964 = vmatpush.bf16.msra.mxu2 %v9440_v52  ;;  %v12304_v44 = vpop.f32.mrf.mxu1  ;;  %v9479_v52 = vld [vmem:[%s12671_s11 + $0x218] sm:$0xf] }
 0x3df   :  { %5955 = vmatmul.bf16.vlgmr.msra.gmra.mxu1 %v12025_v60  ;;  %v5050_v42 = vadd.f32 %v12250_v45, %v5037_v19  ;;  %v10482_v45 = vld [vmem:[%s12673_s13 + $0x68] sm:$0xff]  ;;  %v10488_v19 = vld [vmem:[%s12673_s13 + $0x98] sm:$0xff] }
 0x3e1   :  { %5991 = vmatpush.bf16.msrb.mxu0 %v9240_v58  ;;  %5926 = vmatpush.bf16.msrb.mxu3 %v9520_v0  ;;  %v10441_v58 = vld [vmem:[%s12671_s11 + $0x220] sm:$0xf0] }
 0x3e2   :  { %6000 = vmatpush.bf16.msrb.mxu1 %v9384_v55  ;;  %5965 = vmatpush.bf16.msra.mxu2 %v9428_v15  ;;  %v9572_v55 = vor.u32 %v10463_v13, %v9569_v28  ;;  %v9480_v0 = vor.u32 %v10441_v58, %v9479_v52  ;;  %v10469_v58 = vld [vmem:[%s12673_s13] sm:$0xff] }
 0x3e5   :  { %5992 = vmatpush.bf16.msrb.mxu0 %v9228_v18  ;;  %5927 = vmatpush.bf16.msrb.mxu3 %v9508_v32  ;;  %v9468_v18 = vor.u32 %v10438_v62, %v9467_v3  ;;  %v9548_v32 = vor.u32 %v10457_v30, %v9545_v10  ;;  %v10465_v30 = vld [vmem:[%s12671_s11 + $0x2e0] sm:$0xf0] }
 0x3e6   :  { %6001 = vmatpush.bf16.msrb.mxu1 %v9372_v27  ;;  %5966 = vmatpush.bf16.msra.mxu2 %v9416_v33  ;;  %v5090_v5 = vpop.f32.mrf.mxu1  ;;  %v10473_v27 = vld [vmem:[%s12673_s13 + $0x20] sm:$0xff]  ;;  %v10472_v33 = vld [vmem:[%s12673_s13 + $0x18] sm:$0xff] }
 0x3e7   :  { %v9575_v5 = vld [vmem:[%s12671_s11 + $0x2d8] sm:$0xf] }
 0x3e8   :  { %v9576_v20 = vor.u32 %v10465_v30, %v9575_v5 }
 0x3e9   :  { %5993 = vmatpush.bf16.msrb.mxu0 %v9216_v26  ;;  %5928 = vmatpush.bf16.msrb.mxu3 %v9496_v6  ;;  %v12381_v22 = vpop.f32.mrf.mxu0  ;;  %v10451_v26 = vld [vmem:[%s12671_s11 + $0x274] sm:$0xf]  ;;  %v9431_v6 = vld [vmem:[%s12671_s11 + $0x1b8] sm:$0xf] }
 0x3ea   :  { %6002 = vmatpush.bf16.msrb.mxu1 %v9360_v54  ;;  %5967 = vmatpush.bf16.msra.mxu2 %v9404_v53  ;;  %v9521_v54 = vld [vmem:[%s12671_s11 + $0x27c] sm:$0xf0]  ;;  %v9432_v28 = vor.u32 %v10429_v11, %v9431_v6  ;;  %v9527_v6 = vld [vmem:[%s12671_s11 + $0x278] sm:$0xf]  ;;  %v10453_v11 = vld [vmem:[%s12671_s11 + $0x280] sm:$0xf0] }
 0x3eb   :  { %v9524_v17 = vor.u32 %v10451_v26, %v9521_v54  ;;  %v10477_v54 = vld [vmem:[%s12673_s13 + $0x40] sm:$0xff] }
 0x3ec   :  { %5994 = vmatmul.bf16.vlgmr.msrb.gmra.mxu0 %v11939_v51  ;;  %v9323_v51 = vld [vmem:[%s12671_s11 + $0xe0] sm:$0xf]  ;;  %5929 = vmatmul.bf16.vlgmr.msrb.gmra.mxu3 %v12327_v61 }
 0x3ed   :  { %6302 = vmatpush.bf16.msra.mxu0 %v10476_v24  ;;  %5973 = vmatpush.bf16.msra.mxu3 %v9584_v63  ;;  %v9324_v15 = vor.u32 %v10402_v29, %v9323_v51  ;;  %v9443_v24 = vld [vmem:[%s12671_s11 + $0x1d0] sm:$0xf]  ;;  %v10448_v63 = vld [vmem:[%s12671_s11 + $0x25c] sm:$0xf]  ;;  %v9500_v51 = vor.u32 %v10445_v41, %v9497_v9 }
 0x3ee   :  { %6003 = vmatpush.bf16.msrb.mxu1 %v9348_v48  ;;  %6012 = vmatpush.bf16.msrb.mxu2 %v9492_v49  ;;  %v9444_v46 = vor.u32 %v10432_v25, %v9443_v24  ;;  %v10426_v48 = vld [vmem:[%s12671_s11 + $0x1a8] sm:$0xf0]  ;;  %v12504_v24 = vld [vmem:[%s12670_s10] sm:$0xff]  ;;  %v10500_v41 = vld [vmem:[%s12673_s13 + $0xf8] sm:$0xff] }
 0x3ef   :  { %5968 = vmatmul.bf16.vlgmr.msra.gmra.mxu2 %v12138_v7  ;;  %v5062_v53 = vpop.f32.mrf.mxu3  ;;  %v3515_v25 = vperm.slane %v12504_v24, 5 }
 0x3f0   :  { %v5063_v49 = vadd.f32 %v5062_v53, %v5050_v42 }
 0x3f1   :  { %6303 = vmatpush.bf16.msra.mxu0 %v10475_v50  ;;  %5974 = vmatpush.bf16.msra.mxu3 %v9572_v55  ;;  %v5129_v13 = vpop.f32.mrf.mxu0  ;;  %v9512_v50 = vor.u32 %v10448_v63, %v9509_v40  ;;  %v9587_v55 = vld [vmem:[%s12671_s11 + $0x2f0] sm:$0xf]  ;;  %v9515_v63 = vld [vmem:[%s12671_s11 + $0x260] sm:$0xf]  ;;  %v10450_v40 = vld [vmem:[%s12671_s11 + $0x268] sm:$0xf0] }
 0x3f2   :  { %6004 = vmatpush.bf16.msrb.mxu1 %v9336_v38  ;;  %6013 = vmatpush.bf16.msrb.mxu2 %v9480_v0  ;;  %v12426_v47 = vpop.f32.mrf.mxu2  ;;  %v10423_v38 = vld [vmem:[%s12671_s11 + $0x190] sm:$0xf0]  ;;  %v10481_v0 = vld [vmem:[%s12673_s13 + $0x60] sm:$0xff]  ;;  %v9588_v29 = vor.u32 %v10468_v4, %v9587_v55 }
 0x3f3   :  { %v10485_v55 = vld [vmem:[%s12673_s13 + $0x80] sm:$0xff]  ;;  %v10499_v4 = vld [vmem:[%s12673_s13 + $0xf0] sm:$0xff] }
 0x3f5   :  { %6304 = vmatpush.bf16.msra.mxu0 %v10474_v2  ;;  %5975 = vmatpush.bf16.msra.mxu3 %v9560_v59  ;;  %v5226_v2 = vmax.f32 %v5063_v49, 0.0  ;;  %v9408_v59 = vor.u32 %v10423_v38, %v9407_v34  ;;  %v10486_v49 = vld [vmem:[%s12673_s13 + $0x88] sm:$0xff] }
 0x3f6   :  { %6005 = vmatpush.bf16.msrb.mxu1 %v9324_v15  ;;  %6014 = vmatpush.bf16.msrb.mxu2 %v9468_v18  ;;  %v10480_v15 = vld [vmem:[%s12673_s13 + $0x58] sm:$0xff]  ;;  %v10498_v34 = vld [vmem:[%s12673_s13 + $0xe8] sm:$0xff] }
 0x3f7   :  { %v5064_v3 = vpop.f32.mrf.mxu3  ;;  %v6038_v18 = vpack.c.bf16 %v5226_v2, %v5226_v2  ;;  %v3516_v2 = vperm.slane %v12504_v24, 6 }
 0x3f9   :  { %6305 = vmatpush.bf16.msra.mxu0 %v10473_v27  ;;  %5976 = vmatpush.bf16.msra.mxu3 %v9548_v32  ;;  %v10492_v27 = vld [vmem:[%s12673_s13 + $0xb8] sm:$0xff]  ;;  %v10491_v32 = vld [vmem:[%s12673_s13 + $0xb0] sm:$0xff] }
 0x3fa   :  { %6006 = vmatpush.bf16.msrb.mxu1 %v9312_v1  ;;  %6015 = vmatpush.bf16.msrb.mxu2 %v9456_v23  ;;  %v5103_v10 = vpop.f32.mrf.mxu2  ;;  %v10459_v1 = vld [vmem:[%s12671_s11 + $0x2b0] sm:$0xf0]  ;;  %v10478_v23 = vld [vmem:[%s12673_s13 + $0x48] sm:$0xff] }
 0x3fc   :  { %v12461_v62 = vpop.f32.mrf.mxu1 }
 0x3fd   :  { %6306 = vmatpush.bf16.msra.mxu0 %v10472_v33  ;;  %5977 = vmatpush.bf16.msra.mxu3 %v9536_v56  ;;  %v9552_v33 = vor.u32 %v10459_v1, %v9551_v35  ;;  %v10456_v56 = vld [vmem:[%s12671_s11 + $0x298] sm:$0xf0] }
 0x3fe   :  { %6315 = vmatpush.bf16.msra.mxu1 %v10484_v16  ;;  %6016 = vmatpush.bf16.msrb.mxu2 %v9444_v46  ;;  %v9539_v16 = vld [vmem:[%s12671_s11 + $0x290] sm:$0xf] }
 0x3ff   :  { %6007 = vmatmul.bf16.vlgmr.msrb.gmra.mxu1 %v12025_v60  ;;  %v9419_v60 = vld [vmem:[%s12671_s11 + $0x1a0] sm:$0xf]  ;;  %v9540_v46 = vor.u32 %v10456_v56, %v9539_v16 }
 0x400   :  { %v9420_v52 = vor.u32 %v10426_v48, %v9419_v60  ;;  %v9503_v60 = vld [vmem:[%s12671_s11 + $0x248] sm:$0xf]  ;;  %v10447_v48 = vld [vmem:[%s12671_s11 + $0x250] sm:$0xf0] }
 0x401   :  { %6307 = vmatpush.bf16.msra.mxu0 %v10471_v57  ;;  %5978 = vmatpush.bf16.msra.mxu3 %v9524_v17  ;;  %v5076_v57 = vadd.f32 %v12190_v14, %v3515_v25  ;;  %v9528_v17 = vor.u32 %v10453_v11, %v9527_v6 }
 0x402   :  { %6316 = vmatpush.bf16.msra.mxu1 %v10483_v39  ;;  %6017 = vmatpush.bf16.msrb.mxu2 %v9432_v28  ;;  %v10487_v28 = vld [vmem:[%s12673_s13 + $0x90] sm:$0xff] }
 0x403   :  { %v5089_v39 = vadd.f32 %v12304_v44, %v5076_v57 }
 0x404   :  { %v5142_v21 = vpop.f32.mrf.mxu1 }
 0x405   :  { %6308 = vmatpush.bf16.msra.mxu0 %v10470_v12  ;;  %5979 = vmatpush.bf16.msra.mxu3 %v9512_v50  ;;  %v5102_v14 = vadd.f32 %v12426_v47, %v5089_v39  ;;  %v9516_v12 = vor.u32 %v10450_v40, %v9515_v63  ;;  %v9504_v50 = vor.u32 %v10447_v48, %v9503_v60 }
 0x406   :  { %6317 = vmatpush.bf16.msra.mxu1 %v10482_v45  ;;  %6018 = vmatpush.bf16.msrb.mxu2 %v9420_v52 }
 0x409   :  { %6309 = vmatpush.bf16.msra.mxu0 %v10469_v58  ;;  %5980 = vmatpush.bf16.msra.mxu3 %v9500_v51  ;;  %v12513_v26 = vpop.f32.mrf.mxu0 }
 0x40a   :  { %6318 = vmatpush.bf16.msra.mxu1 %v10481_v0  ;;  %6019 = vmatpush.bf16.msrb.mxu2 %v9408_v59  ;;  %v10497_v0 = vld [vmem:[%s12673_s13 + $0xe0] sm:$0xff]  ;;  %v10495_v59 = vld [vmem:[%s12673_s13 + $0xd0] sm:$0xff] }
 0x40c   :  { %6310 = vmatmul.bf16.vlgmr.msra.gmra.mxu0 %v6038_v18  ;;  %5981 = vmatmul.bf16.vlgmr.msra.gmra.mxu3 %v12327_v61 }
 0x40d   :  { %6025 = vmatpush.bf16.msrb.mxu3 %v9588_v29  ;;  %6020 = vmatmul.bf16.vlgmr.msrb.gmra.mxu2 %v12138_v7  ;;  %v10490_v7 = vld [vmem:[%s12673_s13 + $0xa8] sm:$0xff]  ;;  %v5128_v29 = vadd.f32 %v12381_v22, %v3516_v2  ;;  %v10493_v22 = vld [vmem:[%s12673_s13 + $0xc0] sm:$0xff] }
 0x40e   :  { %6319 = vmatpush.bf16.msra.mxu1 %v10480_v15  ;;  %6328 = vmatpush.bf16.msra.mxu2 %v10492_v27  ;;  %v10494_v27 = vld [vmem:[%s12673_s13 + $0xc8] sm:$0xff] }
 0x40f   :  { %v5114_v42 = vpop.f32.mrf.mxu3  ;;  %v5141_v3 = vadd.f32 %v12461_v62, %v5128_v29 }
 0x410   :  { %v5115_v44 = vadd.f32 %v5114_v42, %v5102_v14 }
 0x411   :  { %6026 = vmatpush.bf16.msrb.mxu3 %v9576_v20  ;;  %v5181_v53 = vpop.f32.mrf.mxu0 }
 0x412   :  { %6320 = vmatpush.bf16.msra.mxu1 %v10479_v8  ;;  %6329 = vmatpush.bf16.msra.mxu2 %v10491_v32  ;;  %v5153_v13 = vpop.f32.mrf.mxu2  ;;  %v5227_v47 = vmax.f32 %v5115_v44, 0.0 }
 0x413   :  { %v5154_v5 = vadd.f32 %v5153_v13, %v5141_v3 }
 0x414   :  { %v6039_v45 = vpack.c.bf16 %v5227_v47, %v5227_v47 }
 0x415   :  { %6027 = vmatpush.bf16.msrb.mxu3 %v9564_v31  ;;  %v3517_v31 = vperm.slane %v12504_v24, 7  ;;  %v5362_v24 = vld [vmem:[%s12672_s12] sm:$0x7]  ;;  %s10629_s12 = smov 52  }
 0x416   :  { %6321 = vmatpush.bf16.msra.mxu1 %v10478_v23  ;;  %6330 = vmatpush.bf16.msra.mxu2 %v10490_v7  ;;  %v5364_v11 = vperm.slane %v5362_v24, 0 }
 0x417   :  { %v5116_v9 = vpop.f32.mrf.mxu3  ;;  %v5180_v35 = vadd.f32 %v12513_v26, %v3517_v31 }
 0x419   :  { %6028 = vmatpush.bf16.msrb.mxu3 %v9552_v33 }
 0x41a   :  { %6322 = vmatpush.bf16.msra.mxu1 %v10477_v54  ;;  %6331 = vmatpush.bf16.msra.mxu2 %v10489_v36  ;;  %v5155_v58 = vpop.f32.mrf.mxu2 }
 0x41c   :  { %v5192_v52 = vpop.f32.mrf.mxu1 }
 0x41d   :  { %6029 = vmatpush.bf16.msrb.mxu3 %v9540_v46  ;;  %6323 = vmatmul.bf16.vlgmr.msra.gmra.mxu1 %v6039_v45  ;;  %v5193_v1 = vadd.f32 %v5192_v52, %v5180_v35 }
 0x41e   :  { %6332 = vmatpush.bf16.msra.mxu2 %v10488_v19 }
 0x421   :  { %6030 = vmatpush.bf16.msrb.mxu3 %v9528_v17 }
 0x422   :  { %6333 = vmatpush.bf16.msra.mxu2 %v10487_v28 }
 0x424   :  { %v5194_v38 = vpop.f32.mrf.mxu1 }
 0x425   :  { %6031 = vmatpush.bf16.msrb.mxu3 %v9516_v12  ;;  %v5365_v12 = vperm.slane %v5362_v24, 1 }
 0x426   :  { %6334 = vmatpush.bf16.msra.mxu2 %v10486_v49 }
 0x429   :  { %6032 = vmatpush.bf16.msrb.mxu3 %v9504_v50  ;;  %v5891_v51 = vpop.f32.mrf.mxu0 }
 0x42a   :  { %6335 = vmatpush.bf16.msra.mxu2 %v10485_v55  ;;  %v5892_v26 = vadd.f32 %v5891_v51, %v5364_v11  ;;  %v10518_v55 = vld [vmem:[%s12674_s14] ss:$0 sm:$0xff]  ;;  %s10632_s14 = smov 25  }
 0x42c   :  { %6033 = vmatmul.bf16.vlgmr.msrb.gmra.mxu3 %v12327_v61  ;;  %v10496_v61 = vld [vmem:[%s12673_s13 + $0xd8] sm:$0xff] }
 0x42d   :  { %6341 = vmatpush.bf16.msra.mxu3 %v10500_v41 }
 0x42f   :  { %v5166_v30 = vpop.f32.mrf.mxu3 }
 0x430   :  { %v5167_v15 = vadd.f32 %v5166_v30, %v5154_v5 }
 0x431   :  { %6342 = vmatpush.bf16.msra.mxu3 %v10499_v4  ;;  %v5893_v10 = vpop.f32.mrf.mxu0 }
 0x432   :  { %v5205_v18 = vpop.f32.mrf.mxu2  ;;  %v5228_v20 = vmax.f32 %v5167_v15, 0.0 }
 0x433   :  { %v5206_v23 = vadd.f32 %v5205_v18, %v5193_v1 }
 0x434   :  { %v6040_v37 = vpack.c.bf16 %v5228_v20, %v5228_v20 }
 0x435   :  { %6343 = vmatpush.bf16.msra.mxu3 %v10498_v34 }
 0x436   :  { %6336 = vmatmul.bf16.vlgmr.msra.gmra.mxu2 %v6040_v37 }
 0x437   :  { %v5168_v62 = vpop.f32.mrf.mxu3 }
 0x439   :  { %6344 = vmatpush.bf16.msra.mxu3 %v10497_v0  ;;  %v5366_v0 = vperm.slane %v5362_v24, 2 }
 0x43a   :  { %v5207_v8 = vpop.f32.mrf.mxu2 }
 0x43c   :  { %v5904_v43 = vpop.f32.mrf.mxu1 }
 0x43d   :  { %6345 = vmatpush.bf16.msra.mxu3 %v10496_v61  ;;  %v5905_v19 = vadd.f32 %v5904_v43, %v5892_v26 }
 0x441   :  { %6346 = vmatpush.bf16.msra.mxu3 %v10495_v59 }
 0x444   :  { %v5906_v32 = vpop.f32.mrf.mxu1 }
 0x445   :  { %6347 = vmatpush.bf16.msra.mxu3 %v10494_v27 }
 0x449   :  { %6348 = vmatpush.bf16.msra.mxu3 %v10493_v22  ;;  %v5943_v21 = vpop.f32.mrf.mxu0 }
 0x44a   :  { %v5944_v60 = vadd.f32 %v5943_v21, %v5365_v12 }
 0x44f   :  { %v5218_v7 = vpop.f32.mrf.mxu3 }
 0x450   :  { %v5219_v25 = vadd.f32 %v5218_v7, %v5206_v23 }
 0x451   :  { %v5945_v33 = vpop.f32.mrf.mxu0 }
 0x452   :  { %v5917_v16 = vpop.f32.mrf.mxu2  ;;  %v5229_v56 = vmax.f32 %v5219_v25, 0.0 }
 0x453   :  { %v5918_v17 = vadd.f32 %v5917_v16, %v5905_v19 }
 0x454   :  { %v6041_v54 = vpack.c.bf16 %v5229_v56, %v5229_v56 }
 0x456   :  { %6349 = vmatmul.bf16.vlgmr.msra.gmra.mxu3 %v6041_v54 }
 0x457   :  { %v5220_v36 = vpop.f32.mrf.mxu3 }
 0x45a   :  { %v5919_v57 = vpop.f32.mrf.mxu2 }
 0x45c   :  { %v5956_v46 = vpop.f32.mrf.mxu1 }
 0x45d   :  { %v5957_v48 = vadd.f32 %v5956_v46, %v5944_v60 }
 0x464   :  { %v5958_v6 = vpop.f32.mrf.mxu1 }
 0x469   :  { %v5995_v39 = vpop.f32.mrf.mxu0 }
 0x46a   :  { %v5996_v2 = vadd.f32 %v5995_v39, %v5366_v0 }
 0x46f   :  { %v5930_v14 = vpop.f32.mrf.mxu3 }
 0x470   :  { %v12587_v40 = vadd.f32 %v5930_v14, %v5918_v17 }
 0x471   :  { %v5997_v63 = vpop.f32.mrf.mxu0 }
 0x472   :  { %v5969_v42 = vpop.f32.mrf.mxu2  ;;  %6355 = vrot.lane.b32.xlu0 %v12587_v40, %s10627_s8 }
 0x473   :  { %v5970_v45 = vadd.f32 %v5969_v42, %v5957_v48 }
 0x477   :  { %v5932_v53 = vpop.f32.mrf.mxu3 }
 0x47a   :  { %v5971_v13 = vpop.f32.mrf.mxu2  ;;  %6360 = vrot.lane.b32.xlu0 %v12587_v40, %s10628_s2 }
 0x47c   :  { %v6008_v44 = vpop.f32.mrf.mxu1 }
 0x47d   :  { %v6009_v61 = vadd.f32 %v6008_v44, %v5996_v2 }
 0x484   :  { %v6010_v28 = vpop.f32.mrf.mxu1 }
 0x489   :  { %v6311_v47 = vpop.f32.mrf.mxu0 }
 0x48a   :  { %v6312_v4 = vadd.f32 %v10518_v55, %v6311_v47 }
 0x48f   :  { %v5982_v49 = vpop.f32.mrf.mxu3 }
 0x490   :  { %v5983_v50 = vadd.f32 %v5982_v49, %v5970_v45  ;;  %v6021_v9 = vpop.f32.mrf.mxu2 }
 0x491   :  { %v6313_v41 = vpop.f32.mrf.mxu0  ;;  %v6022_v29 = vadd.f32 %v6021_v9, %v6009_v61 }
 0x492   :  { %6372 = vrot.lane.b32.xlu2 %v5983_v50, %s10629_s12  ;;  %6362 = vrot.lane.b32.xlu1 %v5983_v50, %s10628_s2 }
 0x497   :  { %v5984_v52 = vpop.f32.mrf.mxu3 }
 0x498   :  { %v6023_v58 = vpop.f32.mrf.mxu2 }
 0x49a   :  { %6377 = vrot.lane.b32.xlu2 %v5983_v50, %s10630_s21  ;;  %6368 = vrot.lane.b32.xlu1 %v5983_v50, %s10631_s1  ;;  %v6324_v34 = vpop.f32.mrf.mxu1 }
 0x49b   :  { %v6325_v38 = vadd.f32 %v6324_v34, %v6312_v4 }
 0x4a2   :  { %v6326_v51 = vpop.f32.mrf.mxu1 }
 0x4af   :  { %v6034_v3 = vpop.f32.mrf.mxu3 }
 0x4b0   :  { %v6035_v59 = vadd.f32 %v6034_v3, %v6022_v29 }
 0x4b2   :  { %6379 = vrot.lane.b32.xlu0 %v6035_v59, %s10630_s21 }
 0x4b7   :  { %v6036_v5 = vpop.f32.mrf.mxu3 }
 0x4b9   :  { %v6337_v30 = vpop.f32.mrf.mxu2 }
 0x4ba   :  { %v6338_v10 = vadd.f32 %v6337_v30, %v6325_v38 }
 0x4c1   :  { %v6339_v15 = vpop.f32.mrf.mxu2 }
 0x4d9   :  { %v6350_v18 = vpop.f32.mrf.mxu3 }
 0x4da   :  { %v6351_v27 = vadd.f32 %v6350_v18, %v6338_v10 }
 0x4e1   :  { %v6352_v20 = vpop.f32.mrf.mxu3 }
 0x4e4   :  { %v6356_v37 = vpop.permute.xlu0 %6355 }
 0x4e5   :  { %v6358_v32 = vadd.f32 %v6356_v37, %v12587_v40 }
 0x4ec   :  { %v6373_v62 = vpop.permute.xlu2 %6372  ;;  %v6361_v43 = vpop.permute.xlu0 %6360 }
 0x4f4   :  { %v6378_v1 = vpop.permute.xlu2 %6377 }
 0x504   :  { %v6363_v22 = vpop.permute.xlu1 %6362 }
 0x505   :  { %v6365_v8 = vsel %vm6364_vm1, %v6361_v43, %v6363_v22 }
 0x506   :  { %v6367_v21 = vadd.f32 %v6365_v8, %v6358_v32 }
 0x50c   :  { %v6369_v31 = vpop.permute.xlu1 %6368 }
 0x50d   :  { %v6371_v35 = vadd.f32 %v6369_v31, %v6367_v21 }
 0x50f   :  { %v6375_v23 = vadd.f32 %v6373_v62, %v6371_v35 }
 0x524   :  { %v6380_v7 = vpop.permute.xlu0 %6379 }
 0x525   :  { %v6382_v33 = vsel %vm6381_vm2, %v6378_v1, %v6380_v7 }
 0x526   :  { %v6384_v25 = vadd.f32 %v6382_v33, %v6375_v23 }
 0x528   :  { %v6385_v16 = vmul.f32 0.16666667, %v6384_v25 }
 0x52a   :  { %v6386_v56 = vsub.f32 %v6351_v27, %v6385_v16 }
 0x52c   :  { %v6390_v54 = vadd.f32 %v6386_v56, %v6369_v31  ;;  %v6389_v36 = vadd.f32 %v6386_v56, %v6365_v8  ;;  %v6388_v46 = vadd.f32 %v6386_v56, %v6356_v37  ;;  %v6391_v11 = vadd.f32 %v6386_v56, %v6373_v62 }
 0x52d   :  { %v6392_v39 = vadd.f32 %v6386_v56, %v6382_v33  ;;  %v6387_v17 = vadd.f32 %v6386_v56, %v12587_v40 }
 0x52e   :  { %v6403_v57 = vsel %vm6393_vm3, %v6390_v54, -inf  ;;  %v6400_v6 = vsel %vm6393_vm3, %v6389_v36, -inf  ;;  %v6397_v24 = vsel %vm6393_vm3, %v6388_v46, -inf  ;;  %v6406_v26 = vsel %vm6393_vm3, %v6391_v11, -inf }
 0x52f   :  { %6404 = vmax.xlane.f32.xlu2 %v6403_v57  ;;  %6401 = vmax.xlane.f32.xlu1 %v6400_v6  ;;  %v6409_v19 = vsel %vm6393_vm3, %v6392_v39, -inf  ;;  %v6394_v14 = vsel %vm6393_vm3, %v6387_v17, -inf }
 0x530   :  { %6398 = vmax.xlane.f32.xlu0 %v6397_v24 }
 0x537   :  { %6407 = vmax.xlane.f32.xlu2 %v6406_v26  ;;  %6410 = vmax.xlane.f32.xlu1 %v6409_v19 }
 0x53f   :  { %6395 = vmax.xlane.f32.xlu2 %v6394_v14 }
 0x5a2   :  { %v6405_v63 = vpop.xlane.xlu2 %6404  ;;  %v6402_v42 = vpop.xlane.xlu1 %6401 }
 0x5a3   :  { %v6415_v53 = vsub.f32 %v6390_v54, %v6405_v63  ;;  %v6414_v44 = vsub.f32 %v6389_v36, %v6402_v42  ;;  %v6399_v13 = vpop.xlane.xlu0 %6398 }
 0x5a4   :  { %v6413_v28 = vsub.f32 %v6388_v46, %v6399_v13 }
 0x5a5   :  { %v6424_v12 = vmul.f32 1.442695, %v6415_v53  ;;  %v6422_v47 = vmul.f32 1.442695, %v6414_v44 }
 0x5a6   :  { %v6420_v60 = vmul.f32 1.442695, %v6413_v28 }
 0x5a7   :  { %10519 = vpow2.f32 %v6424_v12 }
 0x5a8   :  { %10521 = vpow2.f32 %v6422_v47 }
 0x5a9   :  { %10523 = vpow2.f32 %v6420_v60 }
 0x5aa   :  { %v6408_v48 = vpop.xlane.xlu2 %6407  ;;  %v6411_v45 = vpop.xlane.xlu1 %6410 }
 0x5ab   :  { %v6416_v49 = vsub.f32 %v6391_v11, %v6408_v48  ;;  %v6417_v50 = vsub.f32 %v6392_v39, %v6411_v45 }
 0x5ad   :  { %v12602_v40 = vpop.eup %10519  ;;  %v6426_v41 = vmul.f32 1.442695, %v6416_v49  ;;  %v6428_v9 = vmul.f32 1.442695, %v6417_v50 }
 0x5ae   :  { %v12604_v52 = vpop.eup %10521  ;;  %v6439_v58 = vsel %vm6393_vm3, %v12602_v40, 0.0 }
 0x5af   :  { %v12608_v55 = vpop.eup %10523  ;;  %10525 = vpow2.f32 %v6426_v41  ;;  %6440 = vadd.xlane.f32.xlu1 %v6439_v58  ;;  %v6436_v4 = vsel %vm6393_vm3, %v12604_v52, 0.0 }
 0x5b0   :  { %10527 = vpow2.f32 %v6428_v9  ;;  %6437 = vadd.xlane.f32.xlu0 %v6436_v4  ;;  %v6433_v34 = vsel %vm6393_vm3, %v12608_v55, 0.0 }
 0x5b1   :  { %6434 = vadd.xlane.f32.xlu2 %v6433_v34 }
 0x5b2   :  { %v6396_v38 = vpop.xlane.xlu2 %6395 }
 0x5b3   :  { %v6412_v0 = vsub.f32 %v6387_v17, %v6396_v38 }
 0x5b5   :  { %v12614_v2 = vpop.eup %10525  ;;  %v6418_v51 = vmul.f32 1.442695, %v6412_v0 }
 0x5b6   :  { %v12616_v61 = vpop.eup %10527  ;;  %v6442_v29 = vsel %vm6393_vm3, %v12614_v2, 0.0 }
 0x5b7   :  { %10529 = vpow2.f32 %v6418_v51  ;;  %v6445_v3 = vsel %vm6393_vm3, %v12616_v61, 0.0 }
 0x5b8   :  { %6446 = vadd.xlane.f32.xlu1 %v6445_v3  ;;  %6443 = vadd.xlane.f32.xlu0 %v6442_v29 }
 0x5bd   :  { %v12622_v59 = vpop.eup %10529 }
 0x5be   :  { %v6430_v5 = vsel %vm6393_vm3, %v12622_v59, 0.0 }
 0x5bf   :  { %6431 = vadd.xlane.f32.xlu2 %v6430_v5 }
 0x622   :  { %v6441_v30 = vpop.xlane.xlu1 %6440 }
 0x623   :  { %10531 = vrcp.f32 %v6441_v30  ;;  %v6438_v10 = vpop.xlane.xlu0 %6437  ;;  %vm6495_vm4 = vweird.f32 %v6441_v30  ;;  %v6501_v31 = vand.u32 2147483648, %v6441_v30  ;;  %v6499_v25 = vand.u32 2147483647, %v6441_v30 }
 0x624   :  { %10533 = vrcp.f32 %v6438_v10  ;;  %v6435_v15 = vpop.xlane.xlu2 %6434  ;;  %v6487_v1 = vand.u32 2147483648, %v6438_v10  ;;  %v6485_v16 = vand.u32 2147483647, %v6438_v10  ;;  %vm6481_vm7 = vweird.f32 %v6438_v10 }
 0x625   :  { %10535 = vrcp.f32 %v6435_v15  ;;  %v6473_v33 = vand.u32 2147483648, %v6435_v15  ;;  %v6471_v36 = vand.u32 2147483647, %v6435_v15  ;;  %v6502_v46 = vor.u32 1.1754944e-38, %v6501_v31 }
 0x626   :  { %vm6467_vm8 = vweird.f32 %v6435_v15  ;;  %v6488_v24 = vor.u32 1.1754944e-38, %v6487_v1  ;;  %vm6500_vm11 = vcmp.eq.f32.partialorder %v6499_v25, 8.507059e+37  ;;  %vm6486_vm13 = vcmp.eq.f32.partialorder %v6485_v16, 8.507059e+37 }
 0x627   :  { %v6474_v19 = vor.u32 1.1754944e-38, %v6473_v33  ;;  %vm6472_vm14 = vcmp.eq.f32.partialorder %v6471_v36, 8.507059e+37 }
 0x629   :  { %v10532_v18 = vpop.eup %10531 }
 0x62a   :  { %v10534_v27 = vpop.eup %10533  ;;  %v6491_v20 = vmul.f32 %v10532_v18, %v6441_v30  ;;  %vm6496_vm5 = vweird.f32 %v10532_v18 }
 0x62b   :  { %v10536_v37 = vpop.eup %10535  ;;  %v6477_v22 = vmul.f32 %v10534_v27, %v6438_v10  ;;  %v12626_v62 = vpop.xlane.xlu1 %6446  ;;  %vm6482_vm6 = vweird.f32 %v10534_v27  ;;  %vm6497_vm9 = vmor %vm6495_vm4, %vm6496_vm5 }
 0x62c   :  { %v12628_v43 = vpop.xlane.xlu0 %6443  ;;  %v6492_v8 = vsub.f32 1.0, %v6491_v20  ;;  %v6463_v32 = vmul.f32 %v10536_v37, %v6435_v15  ;;  %10537 = vrcp.f32 %v12626_v62  ;;  %vm6468_vm10 = vweird.f32 %v10536_v37  ;;  %vm6483_vm12 = vmor %vm6481_vm7, %vm6482_vm6 }
 0x62d   :  { %v6478_v21 = vsub.f32 1.0, %v6477_v22  ;;  %10539 = vrcp.f32 %v12628_v43  ;;  %v6529_v44 = vand.u32 2147483648, %v12626_v62  ;;  %vm6469_vm15 = vmor %vm6467_vm8, %vm6468_vm10  ;;  %v6515_v47 = vand.u32 2147483648, %v12628_v43 }
 0x62e   :  { %v6493_v35 = vmul.f32 %v10532_v18, %v6492_v8  ;;  %v6464_v23 = vsub.f32 1.0, %v6463_v32  ;;  %v6527_v50 = vand.u32 2147483647, %v12626_v62  ;;  %v6513_v9 = vand.u32 2147483647, %v12628_v43 }
 0x62f   :  { %v6479_v7 = vmul.f32 %v10534_v27, %v6478_v21  ;;  %vm6523_vm2 = vweird.f32 %v12626_v62  ;;  %vm6509_vm4 = vweird.f32 %v12628_v43  ;;  %v6516_v34 = vor.u32 1.1754944e-38, %v6515_v47 }
 0x630   :  { %v6465_v56 = vmul.f32 %v10536_v37, %v6464_v23  ;;  %v6494_v54 = vadd.f32 %v10532_v18, %v6493_v35  ;;  %vm6528_vm6 = vcmp.eq.f32.partialorder %v6527_v50, 8.507059e+37  ;;  %vm6514_vm8 = vcmp.eq.f32.partialorder %v6513_v9, 8.507059e+37 }
 0x631   :  { %v6480_v57 = vadd.f32 %v10534_v27, %v6479_v7 }
 0x632   :  { %v10538_v6 = vpop.eup %10537  ;;  %v6498_v11 = vsel %vm6497_vm9, %v10532_v18, %v6494_v54  ;;  %v6466_v39 = vadd.f32 %v10536_v37, %v6465_v56  ;;  %v6432_v5 = vpop.xlane.xlu2 %6431 }
 0x633   :  { %v10540_v26 = vpop.eup %10539  ;;  %v6519_v17 = vmul.f32 %v10538_v6, %v12626_v62  ;;  %v6503_v63 = vsel %vm6500_vm11, %v6502_v46, %v6498_v11  ;;  %v6484_v42 = vsel %vm6483_vm12, %v10534_v27, %v6480_v57  ;;  %vm6524_vm0 = vweird.f32 %v10538_v6 }
 0x634   :  { %v6505_v14 = vmul.f32 %v10540_v26, %v12628_v43  ;;  %v6535_v13 = vmul.f32 %v12602_v40, %v6503_v63  ;;  %v6489_v28 = vsel %vm6486_vm13, %v6488_v24, %v6484_v42  ;;  %v6470_v48 = vsel %vm6469_vm15, %v10536_v37, %v6466_v39  ;;  %vm6525_vm5 = vmor %vm6523_vm2, %vm6524_vm0 }
 0x635   :  { %v6520_v53 = vsub.f32 1.0, %v6519_v17  ;;  %v6534_v60 = vmul.f32 %v12604_v52, %v6489_v28  ;;  %v6475_v49 = vsel %vm6472_vm14, %v6474_v19, %v6470_v48  ;;  %vm6510_vm1 = vweird.f32 %v10540_v26 }
 0x636   :  { %v6506_v12 = vsub.f32 1.0, %v6505_v14  ;;  %6547 = vrot.lane.b32.xlu1 %v6535_v13, %s10632_s14  ;;  %v6533_v40 = vmul.f32 %v12608_v55, %v6475_v49  ;;  %v6530_v52 = vor.u32 1.1754944e-38, %v6529_v44  ;;  %vm6511_vm7 = vmor %vm6509_vm4, %vm6510_vm1  ;;  %10541 = vrcp.f32 %v6432_v5 }
 0x637   :  { %v6521_v45 = vmul.f32 %v10538_v6, %v6520_v53  ;;  %6543 = vrot.lane.b32.xlu0 %v6534_v60, %s10633_s20  ;;  %v6459_v20 = vand.u32 2147483648, %v6432_v5  ;;  %vm6453_vm10 = vweird.f32 %v6432_v5  ;;  %v6457_v37 = vand.u32 2147483647, %v6432_v5 }
 0x638   :  { %v6507_v41 = vmul.f32 %v10540_v26, %v6506_v12  ;;  %6539 = vrot.lane.b32.xlu2 %v6533_v40, %s10634_s22  ;;  %vm6559_vm13 = vcmask 834560   ;;  %vm6561_vm14 = vcmask 203776   ;;  %vm6569_vm15 = vcmask 408576  }
 0x639   :  { %v6522_v58 = vadd.f32 %v10538_v6, %v6521_v45  ;;  %v6460_v22 = vor.u32 1.1754944e-38, %v6459_v20  ;;  %vm6458_vm12 = vcmp.eq.f32.partialorder %v6457_v37, 8.507059e+37  ;;  %vm6563_vm0 = vcmask 621568  }
 0x63a   :  { %v6508_v4 = vadd.f32 %v10540_v26, %v6507_v41  ;;  %vm6565_vm1 = vcmask 1039360  }
 0x63b   :  { %v6526_v38 = vsel %vm6525_vm5, %v10538_v6, %v6522_v58 }
 0x63c   :  { %v6531_v0 = vsel %vm6528_vm6, %v6530_v52, %v6526_v38  ;;  %v6512_v51 = vsel %vm6511_vm7, %v10540_v26, %v6508_v4  ;;  %v10542_v30 = vpop.eup %10541 }
 0x63d   :  { %v6537_v55 = vmul.f32 %v12616_v61, %v6531_v0  ;;  %v6517_v29 = vsel %vm6514_vm8, %v6516_v34, %v6512_v51  ;;  %v6449_v10 = vmul.f32 %v10542_v30, %v6432_v5  ;;  %vm6454_vm9 = vweird.f32 %v10542_v30 }
 0x63e   :  { %v6536_v3 = vmul.f32 %v12614_v2, %v6517_v29  ;;  %vm6455_vm11 = vmor %vm6453_vm10, %vm6454_vm9 }
 0x63f   :  { %6555 = vrot.lane.b32.xlu1 %v6537_v55, %s10635_s23  ;;  %v6450_v15 = vsub.f32 1.0, %v6449_v10 }
 0x640   :  { %6551 = vrot.lane.b32.xlu0 %v6536_v3, %s10636_s9 }
 0x641   :  { %v6451_v18 = vmul.f32 %v10542_v30, %v6450_v15 }
 0x643   :  { %v6452_v27 = vadd.f32 %v10542_v30, %v6451_v18 }
 0x645   :  { %v6456_v61 = vsel %vm6455_vm11, %v10542_v30, %v6452_v27 }
 0x646   :  { %v6461_v2 = vsel %vm6458_vm12, %v6460_v22, %v6456_v61 }
 0x647   :  { %v6532_v43 = vmul.f32 %v12622_v59, %v6461_v2 }
 0x692   :  { %v6540_v62 = vpop.permute.xlu2 %6539 }
 0x693   :  { %v6558_v32 = vsel %vm6393_vm3, %v6532_v43, %v6540_v62 }
 0x6a8   :  { %v6548_v8 = vpop.permute.xlu1 %6547 }
 0x6a9   :  { %v6544_v31 = vpop.permute.xlu0 %6543 }
 0x6aa   :  { %v6560_v21 = vsel %vm6559_vm13, %v6558_v32, %v6544_v31  ;;  %v6562_v1 = vsel %vm6561_vm14, %v6544_v31, %v6548_v8 }
 0x6ab   :  { %6567 = vst [vmem:[%s12675_s15] sm:$0xff] %v6560_v21 }
 0x6b1   :  { %v6556_v35 = vpop.permute.xlu1 %6555 }
 0x6b2   :  { %6570 = vst.msk [vmem:[%s12675_s15 + $0x10] sm:$0xff] %vm6569_vm15, %v6556_v35  ;;  %v6552_v59 = vpop.permute.xlu0 %6551 }
 0x6b3   :  { %v6564_v23 = vsel %vm6563_vm0, %v6562_v1, %v6552_v59 }
 0x6b4   :  { %v6566_v7 = vsel %vm6565_vm1, %v6564_v23, %v6556_v35 }
 0x6b5   :  { %6568 = vst [vmem:[%s12675_s15 + $0x8] sm:$0xff] %v6566_v7 }
 0x6b6   :  { %6575 = vsyncpa [#allocation3], 1 }
 0x6b7   :  { %6576 = vsyncpa [#allocation5], 1 }

</bundles_post_ra>
